<compile_context>
chip_gen: v6e
topology: v6e:2x2x1
jax: 0.10.0
libtpu: 0.0.40
codegen_flags: <defaults>
</compile_context>

<pallas_src>
import functools

import jax
import jax.numpy as jnp
import numpy as np
from jax.experimental import pallas as pl
from jax.experimental.pallas import tpu as pltpu


def _round_up(x, m):
    return ((x + m - 1) // m) * m


def _vru_kernel(so_ref, q_ref, ba_ref, fm_ref, w23_ref, w3a_ref, b2_ref, b3_ref,
                out_ref, attn_ref,
                m_scr, l_scr, acc_scr,
                *, n_valid):
    """One (batch-group, N-tile) step of the fused interaction + attention."""
    bg, n_tile, d_pad = fm_ref.shape
    mxu_dtype = fm_ref.dtype
    n = pl.program_id(1)
    n_tiles = pl.num_programs(1)

    # ---- init online-softmax state at the first N tile of this batch group
    @pl.when(n == 0)
    def _():
        m_scr[...] = jnp.full_like(m_scr, -1e30)
        l_scr[...] = jnp.zeros_like(l_scr)
        acc_scr[...] = jnp.zeros_like(acc_scr)
        attn_ref[...] = jnp.zeros_like(attn_ref)

    fm3 = fm_ref[...]                                       # (bg, n_tile, d_pad)
    fm_flat = fm3.reshape(bg * n_tile, d_pad)               # layout-free flatten

    # ---- InteractionModule -------------------------------------------------
    # One MXU pass of fm over the fused RHS [w2.T | w3b.T]  -> (rows, 2*d_pad)
    both = jnp.dot(fm_flat, w23_ref[...], preferred_element_type=jnp.float32)
    fm_proj = both[:, :d_pad] + b2_ref[...]                  # f32
    fm_w3b = both[:, d_pad:]                                 # fm @ w3b.T, f32
    prod = (so_ref[...].reshape(bg, 1, d_pad)
            * fm_proj.reshape(bg, n_tile, d_pad)).reshape(bg * n_tile, d_pad)
    fm_mod = (jnp.dot(prod.astype(mxu_dtype), w3a_ref[...],
                      preferred_element_type=jnp.float32)
              + fm_w3b + b3_ref[...])                        # (rows, d_pad) f32

    # ---- attention logits: VPU multiply + lane reduce, lane-dense over N ---
    fm_mod3 = fm_mod.reshape(bg, n_tile, d_pad)
    logits = (jnp.sum(fm_mod3 * q_ref[...].reshape(bg, 1, d_pad), axis=-1)
              + ba_ref[...])                                 # (bg, n_tile)

    if n_valid % n_tile != 0:
        # mask padded N positions (only the last tile is partially valid)
        idx = n * n_tile + jax.lax.broadcasted_iota(jnp.int32, (bg, n_tile), 1)
        logits = jnp.where(idx < n_valid, logits, -1e30)

    # ---- flash-style online softmax across the N grid axis -----------------
    m_old = m_scr[...]                                       # (bg, 1)
    m_new = jnp.maximum(m_old, jnp.max(logits, axis=-1, keepdims=True))
    alpha = jnp.exp(m_old - m_new)                           # (bg, 1)
    e = jnp.exp(logits - m_new)                              # (bg, n_tile)

    # rescale previously emitted (still unnormalized) attention, then emit this
    # tile's slice into the resident lane-dense attn block.
    attn_ref[...] = attn_ref[...] * alpha
    start = pl.multiple_of(n * n_tile, n_tile)
    attn_ref[:, pl.ds(start, n_tile)] = e

    l_scr[...] = l_scr[...] * alpha + jnp.sum(e, axis=-1, keepdims=True)
    acc_scr[...] = (acc_scr[...] * alpha
                    + jnp.einsum("bqn,bnd->bqd",
                                 e.reshape(bg, 1, n_tile).astype(mxu_dtype), fm3,
                                 preferred_element_type=jnp.float32
                                 ).reshape(bg, d_pad))
    m_scr[...] = m_new

    # ---- finalize: exact normalization (rows sum to 1) ----------------------
    @pl.when(n == n_tiles - 1)
    def _():
        inv_l = 1.0 / l_scr[...]
        out_ref[...] = acc_scr[...] * inv_l
        attn_ref[...] = attn_ref[...] * inv_l


def visual_retrieval_unit(summary_object, feature_maps, ctrl_state, params,
                          *, n_tile=128, batch_tile=8,
                          mxu_dtype=jnp.bfloat16):
    B, N, d = feature_maps.shape
    f32 = jnp.float32

    d_pad = _round_up(d, 128)
    n_tile = min(n_tile, _round_up(N, 128))
    n_pad = _round_up(N, n_tile)
    bg = batch_tile
    b_pad = _round_up(B, bg)

    # ---- tile-invariant per-batch precompute (tiny, plain XLA) -------------
    so_proj = (summary_object.astype(f32) @ params["w1"].T.astype(f32)
               + params["b1"].astype(f32))                       # [B, d]
    q = ctrl_state.astype(f32) * params["wa"].reshape(1, d).astype(f32)  # [B, d]

    def pad2(x, rows, cols):
        return jnp.pad(x, ((0, rows - x.shape[0]), (0, cols - x.shape[1])))

    so_p = pad2(so_proj, b_pad, d_pad)
    q_p = pad2(q, b_pad, d_pad)
    fm_p = jnp.pad(feature_maps.astype(f32),
                   ((0, b_pad - B), (0, n_pad - N), (0, d_pad - d))
                   ).astype(mxu_dtype)

    # ---- weight prep: split W3, fuse [w2.T | w3b.T], zero-pad, cast ---------
    w2_t = pad2(params["w2"].T.astype(f32), d_pad, d_pad)
    w3 = params["w3"].astype(f32)                                # [d, 2d]
    w3a_t = pad2(w3[:, :d].T, d_pad, d_pad)                      # prod half
    w3b_t = pad2(w3[:, d:].T, d_pad, d_pad)                      # fm half
    w23 = jnp.concatenate([w2_t, w3b_t], axis=1).astype(mxu_dtype)
    w3a = w3a_t.astype(mxu_dtype)

    b2 = pad2(params["b2"].reshape(1, d).astype(f32), 1, d_pad)
    b3 = pad2(params["b3"].reshape(1, d).astype(f32), 1, d_pad)
    ba = params["ba"].reshape(1, 1).astype(f32)

    grid = (b_pad // bg, n_pad // n_tile)

    itemsize = jnp.dtype(mxu_dtype).itemsize
    flops = (2 * b_pad * n_pad * d_pad * (2 * d_pad)   # fused fm @ [w2.T|w3b.T]
             + 2 * b_pad * n_pad * d_pad * d_pad       # prod @ w3a.T
             + 2 * b_pad * n_pad * d_pad               # logits mul + reduce
             + 2 * b_pad * n_pad * d_pad)              # attention-weighted sum
    bytes_accessed = int(fm_p.size * itemsize
                         + (w23.size + w3a.size) * itemsize
                         + 4 * (so_p.size + q_p.size + b2.size + b3.size + ba.size)
                         + 4 * (b_pad * d_pad + b_pad * n_pad))
    cost = pl.CostEstimate(flops=flops, transcendentals=2 * b_pad * n_pad,
                           bytes_accessed=bytes_accessed)

    kernel = functools.partial(_vru_kernel, n_valid=N)

    out_p, attn_p = pl.pallas_call(
        kernel,
        out_shape=(jax.ShapeDtypeStruct((b_pad, d_pad), f32),
                   jax.ShapeDtypeStruct((b_pad, n_pad), f32)),
        grid=grid,
        in_specs=[
            pl.BlockSpec((bg, d_pad), lambda g, n: (g, 0)),            # so_proj
            pl.BlockSpec((bg, d_pad), lambda g, n: (g, 0)),            # q
            pl.BlockSpec((1, 1), lambda g, n: (0, 0)),                 # ba
            pl.BlockSpec((bg, n_tile, d_pad), lambda g, n: (g, n, 0)),  # fm
            pl.BlockSpec((d_pad, 2 * d_pad), lambda g, n: (0, 0)),     # [w2|w3b]
            pl.BlockSpec((d_pad, d_pad), lambda g, n: (0, 0)),         # w3a
            pl.BlockSpec((1, d_pad), lambda g, n: (0, 0)),             # b2
            pl.BlockSpec((1, d_pad), lambda g, n: (0, 0)),             # b3
        ],
        out_specs=(pl.BlockSpec((bg, d_pad), lambda g, n: (g, 0)),     # visual_output
                   pl.BlockSpec((bg, n_pad), lambda g, n: (g, 0))),    # visual_attention
        scratch_shapes=[pltpu.VMEM((bg, 1), f32),       # running max m
                        pltpu.VMEM((bg, 1), f32),       # running denom l
                        pltpu.VMEM((bg, d_pad), f32)],  # weighted-sum acc
        compiler_params=pltpu.CompilerParams(
            dimension_semantics=("parallel", "arbitrary")),
        cost_estimate=cost,
    )(so_p, q_p, ba, fm_p, w23, w3a, b2, b3)

    return out_p[:B, :d], attn_p[:B, :N]


def _reference(so, fm, c, params):
    """Plain-JAX f32 reference reproducing the PyTorch forward exactly."""
    so_proj = so @ params["w1"].T + params["b1"]
    fm_proj = jnp.einsum("bnd,ed->bne", fm, params["w2"]) + params["b2"]
    cat = jnp.concatenate([so_proj[:, None, :] * fm_proj, fm], axis=-1)
    fm_mod = jnp.einsum("bnk,ek->bne", cat, params["w3"]) + params["b3"]
    ca = c[:, None, :] * fm_mod
    logits = jnp.einsum("bnd,od->bno", ca, params["wa"]) + params["ba"]
    attn = jax.nn.softmax(logits, axis=1)
    out = jnp.sum(attn * fm, axis=1)
    return out, attn[..., 0]


def _xavier(key, out_f, in_f):
    bound = float(np.sqrt(6.0 / (in_f + out_f)))
    return jax.random.uniform(key, (out_f, in_f), jnp.float32, -bound, bound)


if __name__ == "__main__":
    # Small but representative: 14x14 CNN grid -> N=196 (2 N-tiles of 128,
    # exercising the online softmax, the padded-N mask, d- and batch-padding).
    B, H, W, d = 2, 14, 14, 32
    N = H * W

    key = jax.random.PRNGKey(0)
    ks = jax.random.split(key, 11)

    params = {
        "w1": _xavier(ks[0], d, d),
        "b1": 0.1 * jax.random.normal(ks[1], (d,), jnp.float32),
        "w2": _xavier(ks[2], d, d),
        "b2": 0.1 * jax.random.normal(ks[3], (d,), jnp.float32),
        "w3": _xavier(ks[4], d, 2 * d),
        "b3": 0.1 * jax.random.normal(ks[5], (d,), jnp.float32),
        "wa": _xavier(ks[6], 1, d),
        "ba": 0.1 * jax.random.normal(ks[7], (1,), jnp.float32),
    }

    summary_object = jax.random.normal(ks[8], (B, d), jnp.float32)
    feature_maps = jax.random.normal(ks[9], (B, N, d), jnp.float32)
    ctrl_state = jax.random.normal(ks[10], (B, d), jnp.float32)

    visual_output, visual_attention = visual_retrieval_unit(
        summary_object, feature_maps, ctrl_state, params)
    jax.block_until_ready((visual_output, visual_attention))

    ref_out, ref_attn = _reference(summary_object, feature_maps, ctrl_state,
                                   params)

    assert visual_output.shape == (B, d)
    assert visual_attention.shape == (B, N)

    # Exact-division normalization: attention rows sum to 1.
    np.testing.assert_allclose(np.asarray(visual_attention).sum(-1),
                               np.ones((B,), np.float32), rtol=0, atol=1e-5)
    # Tolerances account for bf16 MXU inputs (f32 accumulation) vs f32 ref.
    np.testing.assert_allclose(np.asarray(visual_attention),
                               np.asarray(ref_attn), rtol=5e-2, atol=1e-2)
    np.testing.assert_allclose(np.asarray(visual_output), np.asarray(ref_out),
                               rtol=5e-2, atol=3e-2)

    print("KERNEL_OK")
</pallas_src>

<mosaic_0001>
module attributes {stable_mosaic.version = 11 : i64} {
  func.func @_vru_kernel(%arg0: i32, %arg1: i32, %arg2: memref<8x128xf32, #tpu.memory_space<vmem>>, %arg3: memref<8x128xf32, #tpu.memory_space<vmem>>, %arg4: memref<1x1xf32, #tpu.memory_space<vmem>>, %arg5: memref<8x128x128xbf16, #tpu.memory_space<vmem>>, %arg6: memref<128x256xbf16, #tpu.memory_space<vmem>>, %arg7: memref<128x128xbf16, #tpu.memory_space<vmem>>, %arg8: memref<1x128xf32, #tpu.memory_space<vmem>>, %arg9: memref<1x128xf32, #tpu.memory_space<vmem>>, %arg10: memref<8x128xf32, #tpu.memory_space<vmem>>, %arg11: memref<8x256xf32, #tpu.memory_space<vmem>>, %arg12: memref<8x1xf32, #tpu.memory_space<vmem>>, %arg13: memref<8x1xf32, #tpu.memory_space<vmem>>, %arg14: memref<8x128xf32, #tpu.memory_space<vmem>>) attributes {dimension_semantics = [#tpu.dimension_semantics<parallel>, #tpu.dimension_semantics<arbitrary>], iteration_bounds = array<i64: 1, 2>, scalar_prefetch = 0 : i64, scratch_operands = 3 : i64, tpu.core_type = #tpu.core_type<tc>, window_params = [{transform_indices = @transform_0, window_bounds = array<i64: 8, 128>}, {transform_indices = @transform_1, window_bounds = array<i64: 8, 128>}, {pipeline_mode = #tpu.pipeline_mode<synchronous>, transform_indices = @transform_2, window_bounds = array<i64: 1, 1>}, {transform_indices = @transform_3, window_bounds = array<i64: 8, 128, 128>}, {pipeline_mode = #tpu.pipeline_mode<synchronous>, transform_indices = @transform_4, window_bounds = array<i64: 128, 256>}, {pipeline_mode = #tpu.pipeline_mode<synchronous>, transform_indices = @transform_5, window_bounds = array<i64: 128, 128>}, {pipeline_mode = #tpu.pipeline_mode<synchronous>, transform_indices = @transform_6, window_bounds = array<i64: 1, 128>}, {pipeline_mode = #tpu.pipeline_mode<synchronous>, transform_indices = @transform_7, window_bounds = array<i64: 1, 128>}, {transform_indices = @transform_8, window_bounds = array<i64: 8, 128>}, {transform_indices = @transform_9, window_bounds = array<i64: 8, 256>}]} {
    %c0_i32 = arith.constant 0 : i32
    %0 = arith.cmpi eq, %arg1, %c0_i32 : i32
    %1 = arith.extui %0 : i1 to i32
    %c0_i32_0 = arith.constant 0 : i32
    %2 = arith.cmpi ne, %1, %c0_i32_0 : i32
    scf.if %2 {
      %cst_42 = arith.constant -1.000000e+30 : f32
      %78 = vector.broadcast %cst_42 : f32 to vector<8x1xf32>
      %c0_43 = arith.constant 0 : index
      %c0_44 = arith.constant 0 : index
      %79 = vector.load %arg12[%c0_43, %c0_44] : memref<8x1xf32, #tpu.memory_space<vmem>>, vector<8x1xf32>
      tpu.vector_store %arg12[%c0_43, %c0_44], %78 {strides = array<i32>} : memref<8x1xf32, #tpu.memory_space<vmem>>, vector<8x1xf32>,
      %cst_45 = arith.constant 0.000000e+00 : f32
      %80 = vector.broadcast %cst_45 : f32 to vector<8x1xf32>
      %c0_46 = arith.constant 0 : index
      %c0_47 = arith.constant 0 : index
      %81 = vector.load %arg13[%c0_46, %c0_47] : memref<8x1xf32, #tpu.memory_space<vmem>>, vector<8x1xf32>
      tpu.vector_store %arg13[%c0_46, %c0_47], %80 {strides = array<i32>} : memref<8x1xf32, #tpu.memory_space<vmem>>, vector<8x1xf32>,
      %cst_48 = arith.constant 0.000000e+00 : f32
      %82 = vector.broadcast %cst_48 : f32 to vector<8x128xf32>
      %c0_49 = arith.constant 0 : index
      %c0_50 = arith.constant 0 : index
      %83 = vector.load %arg14[%c0_49, %c0_50] : memref<8x128xf32, #tpu.memory_space<vmem>>, vector<8x128xf32>
      tpu.vector_store %arg14[%c0_49, %c0_50], %82 {strides = array<i32>} : memref<8x128xf32, #tpu.memory_space<vmem>>, vector<8x128xf32>,
      %cst_51 = arith.constant 0.000000e+00 : f32
      %84 = vector.broadcast %cst_51 : f32 to vector<8x256xf32>
      %c0_52 = arith.constant 0 : index
      %c0_53 = arith.constant 0 : index
      %85 = vector.load %arg11[%c0_52, %c0_53] : memref<8x256xf32, #tpu.memory_space<vmem>>, vector<8x256xf32>
      tpu.vector_store %arg11[%c0_52, %c0_53], %84 {strides = array<i32>} : memref<8x256xf32, #tpu.memory_space<vmem>>, vector<8x256xf32>,
    } else {
    }
    %c0 = arith.constant 0 : index
    %c0_1 = arith.constant 0 : index
    %c0_2 = arith.constant 0 : index
    %3 = vector.load %arg5[%c0, %c0_1, %c0_2] : memref<8x128x128xbf16, #tpu.memory_space<vmem>>, vector<8x128x128xbf16>
    %4 = vector.shape_cast %3 : vector<8x128x128xbf16> to vector<1024x128xbf16>
    %c0_3 = arith.constant 0 : index
    %c0_4 = arith.constant 0 : index
    %5 = vector.load %arg6[%c0_3, %c0_4] : memref<128x256xbf16, #tpu.memory_space<vmem>>, vector<128x256xbf16>
    %cst = arith.constant dense<0.000000e+00> : vector<1024x256xf32>
    %6 = tpu.matmul %4, %5, %cst {dimension_numbers = #tpu.dot_dimension_numbers<[1], [0], [0], [1], [0, 0, 1, 1], [], []>} : vector<1024x128xbf16>, vector<128x256xbf16>, vector<1024x256xf32> -> vector<1024x256xf32>
    %7 = vector.extract_strided_slice %6 {offsets = [0, 0], sizes = [1024, 128], strides = [1, 1]} : vector<1024x256xf32> to vector<1024x128xf32>
    %c0_5 = arith.constant 0 : index
    %c0_6 = arith.constant 0 : index
    %8 = vector.load %arg8[%c0_5, %c0_6] : memref<1x128xf32, #tpu.memory_space<vmem>>, vector<1x128xf32>
    %9 = vector.broadcast %8 : vector<1x128xf32> to vector<1024x128xf32>
    %10 = arith.addf %7, %9 : vector<1024x128xf32>
    %11 = vector.extract_strided_slice %6 {offsets = [0, 128], sizes = [1024, 128], strides = [1, 1]} : vector<1024x256xf32> to vector<1024x128xf32>
    %c0_7 = arith.constant 0 : index
    %c0_8 = arith.constant 0 : index
    %12 = vector.load %arg2[%c0_7, %c0_8] : memref<8x128xf32, #tpu.memory_space<vmem>>, vector<8x128xf32>
    %13 = vector.shape_cast %12 : vector<8x128xf32> to vector<8x1x128xf32>
    %14 = vector.shape_cast %10 : vector<1024x128xf32> to vector<8x128x128xf32>
    %15 = vector.broadcast %13 : vector<8x1x128xf32> to vector<8x128x128xf32>
    %16 = arith.mulf %15, %14 : vector<8x128x128xf32>
    %17 = vector.shape_cast %16 : vector<8x128x128xf32> to vector<1024x128xf32>
    %18 = arith.truncf %17 : vector<1024x128xf32> to vector<1024x128xbf16>
    %c0_9 = arith.constant 0 : index
    %c0_10 = arith.constant 0 : index
    %19 = vector.load %arg7[%c0_9, %c0_10] : memref<128x128xbf16, #tpu.memory_space<vmem>>, vector<128x128xbf16>
    %cst_11 = arith.constant dense<0.000000e+00> : vector<1024x128xf32>
    %20 = tpu.matmul %18, %19, %cst_11 {dimension_numbers = #tpu.dot_dimension_numbers<[1], [0], [0], [1], [0, 0, 1, 1], [], []>} : vector<1024x128xbf16>, vector<128x128xbf16>, vector<1024x128xf32> -> vector<1024x128xf32>
    %21 = arith.addf %20, %11 : vector<1024x128xf32>
    %c0_12 = arith.constant 0 : index
    %c0_13 = arith.constant 0 : index
    %22 = vector.load %arg9[%c0_12, %c0_13] : memref<1x128xf32, #tpu.memory_space<vmem>>, vector<1x128xf32>
    %23 = vector.broadcast %22 : vector<1x128xf32> to vector<1024x128xf32>
    %24 = arith.addf %21, %23 : vector<1024x128xf32>
    %25 = vector.shape_cast %24 : vector<1024x128xf32> to vector<8x128x128xf32>
    %c0_14 = arith.constant 0 : index
    %c0_15 = arith.constant 0 : index
    %26 = vector.load %arg3[%c0_14, %c0_15] : memref<8x128xf32, #tpu.memory_space<vmem>>, vector<8x128xf32>
    %27 = vector.shape_cast %26 : vector<8x128xf32> to vector<8x1x128xf32>
    %28 = vector.broadcast %27 : vector<8x1x128xf32> to vector<8x128x128xf32>
    %29 = arith.mulf %25, %28 : vector<8x128x128xf32>
    %cst_16 = arith.constant dense<0.000000e+00> : vector<8x128xf32>
    %30 = vector.multi_reduction <add>, %29, %cst_16 [2] : vector<8x128x128xf32> to vector<8x128xf32>
    %c0_17 = arith.constant 0 : index
    %c0_18 = arith.constant 0 : index
    %31 = vector.load %arg4[%c0_17, %c0_18] : memref<1x1xf32, #tpu.memory_space<vmem>>, vector<1x1xf32>
    %32 = vector.broadcast %31 : vector<1x1xf32> to vector<8x128xf32>
    %33 = arith.addf %30, %32 : vector<8x128xf32>
    %c128_i32 = arith.constant 128 : i32
    %34 = arith.muli %arg1, %c128_i32 : i32
    %35 = tpu.iota {dimensions = array<i32: 1>} : vector<8x128xi32>
    %36 = vector.broadcast %34 : i32 to vector<8x128xi32>
    %37 = arith.addi %36, %35 : vector<8x128xi32>
    %c196_i32 = arith.constant 196 : i32
    %38 = vector.broadcast %c196_i32 : i32 to vector<8x128xi32>
    %39 = arith.cmpi slt, %37, %38 : vector<8x128xi32>
    %cst_19 = arith.constant -1.000000e+30 : f32
    %40 = vector.broadcast %cst_19 : f32 to vector<8x128xf32>
    %41 = arith.select %39, %33, %40 : vector<8x128xi1>, vector<8x128xf32>
    %c0_20 = arith.constant 0 : index
    %c0_21 = arith.constant 0 : index
    %42 = vector.load %arg12[%c0_20, %c0_21] : memref<8x1xf32, #tpu.memory_space<vmem>>, vector<8x1xf32>
    %cst_22 = arith.constant dense<0xFF800000> : vector<8xf32>
    %43 = vector.multi_reduction <maximumf>, %41, %cst_22 [1] : vector<8x128xf32> to vector<8xf32>
    %44 = vector.shape_cast %43 : vector<8xf32> to vector<8x1xf32>
    %45 = arith.maximumf %42, %44 : vector<8x1xf32>
    %46 = arith.subf %42, %45 : vector<8x1xf32>
    %47 = math.exp %46 : vector<8x1xf32>
    %48 = vector.broadcast %45 : vector<8x1xf32> to vector<8x128xf32>
    %49 = arith.subf %41, %48 : vector<8x128xf32>
    %50 = math.exp %49 : vector<8x128xf32>
    %c0_23 = arith.constant 0 : index
    %c0_24 = arith.constant 0 : index
    %51 = vector.load %arg11[%c0_23, %c0_24] : memref<8x256xf32, #tpu.memory_space<vmem>>, vector<8x256xf32>
    %52 = vector.broadcast %47 : vector<8x1xf32> to vector<8x256xf32>
    %53 = arith.mulf %51, %52 : vector<8x256xf32>
    %c0_25 = arith.constant 0 : index
    %c0_26 = arith.constant 0 : index
    %54 = vector.load %arg11[%c0_25, %c0_26] : memref<8x256xf32, #tpu.memory_space<vmem>>, vector<8x256xf32>
    tpu.vector_store %arg11[%c0_25, %c0_26], %53 {strides = array<i32>} : memref<8x256xf32, #tpu.memory_space<vmem>>, vector<8x256xf32>,
    %c128_i32_27 = arith.constant 128 : i32
    %55 = arith.muli %arg1, %c128_i32_27 : i32
    %56 = tpu.assume_multiple %55, 128 : i32
    %c0_28 = arith.constant 0 : index
    %57 = arith.index_cast %56 : i32 to index
    %58 = vector.load %arg11[%c0_28, %57] : memref<8x256xf32, #tpu.memory_space<vmem>>, vector<8x128xf32>
    tpu.vector_store %arg11[%c0_28, %57], %50 {strides = array<i32>} : memref<8x256xf32, #tpu.memory_space<vmem>>, vector<8x128xf32>,
    %c0_29 = arith.constant 0 : index
    %c0_30 = arith.constant 0 : index
    %59 = vector.load %arg13[%c0_29, %c0_30] : memref<8x1xf32, #tpu.memory_space<vmem>>, vector<8x1xf32>
    %60 = arith.mulf %59, %47 : vector<8x1xf32>
    %cst_31 = arith.constant dense<0.000000e+00> : vector<8xf32>
    %61 = vector.multi_reduction <add>, %50, %cst_31 [1] : vector<8x128xf32> to vector<8xf32>
    %62 = vector.shape_cast %61 : vector<8xf32> to vector<8x1xf32>
    %63 = arith.addf %60, %62 : vector<8x1xf32>
    %c0_32 = arith.constant 0 : index
    %c0_33 = arith.constant 0 : index
    %64 = vector.load %arg13[%c0_32, %c0_33] : memref<8x1xf32, #tpu.memory_space<vmem>>, vector<8x1xf32>
    tpu.vector_store %arg13[%c0_32, %c0_33], %63 {strides = array<i32>} : memref<8x1xf32, #tpu.memory_space<vmem>>, vector<8x1xf32>,
    %c0_34 = arith.constant 0 : index
    %c0_35 = arith.constant 0 : index
    %65 = vector.load %arg14[%c0_34, %c0_35] : memref<8x128xf32, #tpu.memory_space<vmem>>, vector<8x128xf32>
    %66 = vector.broadcast %47 : vector<8x1xf32> to vector<8x128xf32>
    %67 = arith.mulf %65, %66 : vector<8x128xf32>
    %68 = vector.shape_cast %50 : vector<8x128xf32> to vector<8x1x128xf32>
    %69 = arith.truncf %68 : vector<8x1x128xf32> to vector<8x1x128xbf16>
    "tpu.trace_start"() <{level = 10 : i32, message = "bqn,bnd->bqd"}> : () -> ()
    %cst_36 = arith.constant dense<0.000000e+00> : vector<8x1x128xf32>
    %70 = tpu.matmul %69, %3, %cst_36 {dimension_numbers = #tpu.dot_dimension_numbers<[2], [1], [1], [2], [0, 0, 0, 1, 1, 2], [0], [0]>} : vector<8x1x128xbf16>, vector<8x128x128xbf16>, vector<8x1x128xf32> -> vector<8x1x128xf32>
    "tpu.trace_stop"() : () -> ()
    %71 = vector.shape_cast %70 : vector<8x1x128xf32> to vector<8x128xf32>
    %72 = arith.addf %67, %71 : vector<8x128xf32>
    %c0_37 = arith.constant 0 : index
    %c0_38 = arith.constant 0 : index
    %73 = vector.load %arg14[%c0_37, %c0_38] : memref<8x128xf32, #tpu.memory_space<vmem>>, vector<8x128xf32>
    tpu.vector_store %arg14[%c0_37, %c0_38], %72 {strides = array<i32>} : memref<8x128xf32, #tpu.memory_space<vmem>>, vector<8x128xf32>,
    %c0_39 = arith.constant 0 : index
    %c0_40 = arith.constant 0 : index
    %74 = vector.load %arg12[%c0_39, %c0_40] : memref<8x1xf32, #tpu.memory_space<vmem>>, vector<8x1xf32>
    tpu.vector_store %arg12[%c0_39, %c0_40], %45 {strides = array<i32>} : memref<8x1xf32, #tpu.memory_space<vmem>>, vector<8x1xf32>,
    %c1_i32 = arith.constant 1 : i32
    %75 = arith.cmpi eq, %arg1, %c1_i32 : i32
    %76 = arith.extui %75 : i1 to i32
    %c0_i32_41 = arith.constant 0 : i32
    %77 = arith.cmpi ne, %76, %c0_i32_41 : i32
    scf.if %77 {
      %c0_42 = arith.constant 0 : index
      %c0_43 = arith.constant 0 : index
      %78 = vector.load %arg13[%c0_42, %c0_43] : memref<8x1xf32, #tpu.memory_space<vmem>>, vector<8x1xf32>
      %cst_44 = arith.constant 1.000000e+00 : f32
      %79 = vector.broadcast %cst_44 : f32 to vector<8x1xf32>
      %80 = arith.divf %79, %78 : vector<8x1xf32>
      %c0_45 = arith.constant 0 : index
      %c0_46 = arith.constant 0 : index
      %81 = vector.load %arg14[%c0_45, %c0_46] : memref<8x128xf32, #tpu.memory_space<vmem>>, vector<8x128xf32>
      %82 = vector.broadcast %80 : vector<8x1xf32> to vector<8x128xf32>
      %83 = arith.mulf %81, %82 : vector<8x128xf32>
      %c0_47 = arith.constant 0 : index
      %c0_48 = arith.constant 0 : index
      %84 = vector.load %arg10[%c0_47, %c0_48] : memref<8x128xf32, #tpu.memory_space<vmem>>, vector<8x128xf32>
      tpu.vector_store %arg10[%c0_47, %c0_48], %83 {strides = array<i32>} : memref<8x128xf32, #tpu.memory_space<vmem>>, vector<8x128xf32>,
      %c0_49 = arith.constant 0 : index
      %c0_50 = arith.constant 0 : index
      %85 = vector.load %arg11[%c0_49, %c0_50] : memref<8x256xf32, #tpu.memory_space<vmem>>, vector<8x256xf32>
      %86 = vector.broadcast %80 : vector<8x1xf32> to vector<8x256xf32>
      %87 = arith.mulf %85, %86 : vector<8x256xf32>
      %c0_51 = arith.constant 0 : index
      %c0_52 = arith.constant 0 : index
      %88 = vector.load %arg11[%c0_51, %c0_52] : memref<8x256xf32, #tpu.memory_space<vmem>>, vector<8x256xf32>
      tpu.vector_store %arg11[%c0_51, %c0_52], %87 {strides = array<i32>} : memref<8x256xf32, #tpu.memory_space<vmem>>, vector<8x256xf32>,
    } else {
    }
    return
  }
  func.func @transform_0(%arg0: i32, %arg1: i32) -> (i32, i32) {
    %c0_i32 = arith.constant 0 : i32
    %c0_i32_0 = arith.constant 0 : i32
    return %arg0, %c0_i32 : i32, i32
  }
  func.func @transform_1(%arg0: i32, %arg1: i32) -> (i32, i32) {
    %c0_i32 = arith.constant 0 : i32
    %c0_i32_0 = arith.constant 0 : i32
    return %arg0, %c0_i32 : i32, i32
  }
  func.func @transform_2(%arg0: i32, %arg1: i32) -> (i32, i32) {
    %c0_i32 = arith.constant 0 : i32
    %c0_i32_0 = arith.constant 0 : i32
    %c0_i32_1 = arith.constant 0 : i32
    return %c0_i32, %c0_i32_0 : i32, i32
  }
  func.func @transform_3(%arg0: i32, %arg1: i32) -> (i32, i32, i32) {
    %c0_i32 = arith.constant 0 : i32
    %c0_i32_0 = arith.constant 0 : i32
    return %arg0, %arg1, %c0_i32 : i32, i32, i32
  }
  func.func @transform_4(%arg0: i32, %arg1: i32) -> (i32, i32) {
    %c0_i32 = arith.constant 0 : i32
    %c0_i32_0 = arith.constant 0 : i32
    %c0_i32_1 = arith.constant 0 : i32
    return %c0_i32, %c0_i32_0 : i32, i32
  }
  func.func @transform_5(%arg0: i32, %arg1: i32) -> (i32, i32) {
    %c0_i32 = arith.constant 0 : i32
    %c0_i32_0 = arith.constant 0 : i32
    %c0_i32_1 = arith.constant 0 : i32
    return %c0_i32, %c0_i32_0 : i32, i32
  }
  func.func @transform_6(%arg0: i32, %arg1: i32) -> (i32, i32) {
    %c0_i32 = arith.constant 0 : i32
    %c0_i32_0 = arith.constant 0 : i32
    %c0_i32_1 = arith.constant 0 : i32
    return %c0_i32, %c0_i32_0 : i32, i32
  }
  func.func @transform_7(%arg0: i32, %arg1: i32) -> (i32, i32) {
    %c0_i32 = arith.constant 0 : i32
    %c0_i32_0 = arith.constant 0 : i32
    %c0_i32_1 = arith.constant 0 : i32
    return %c0_i32, %c0_i32_0 : i32, i32
  }
  func.func @transform_8(%arg0: i32, %arg1: i32) -> (i32, i32) {
    %c0_i32 = arith.constant 0 : i32
    %c0_i32_0 = arith.constant 0 : i32
    return %arg0, %c0_i32 : i32, i32
  }
  func.func @transform_9(%arg0: i32, %arg1: i32) -> (i32, i32) {
    %c0_i32 = arith.constant 0 : i32
    %c0_i32_0 = arith.constant 0 : i32
    return %arg0, %c0_i32 : i32, i32
  }
}

</mosaic_0001>

<bundles_post_ra>
// kernel: tpu_custom_call.1
= control target key start
LH: loop header
LB: loop body
LE: loop exit
PB: predicated region body
PF: predicated region fallthrough
CT: control target
= control target key end

     0   :  { %s8256_s0 = inlined_call_operand.hbm [shape: f32[8,128], index: 0, kind: input, shape index: {}]   ;;  %s8257_s1 = inlined_call_operand.hbm [shape: f32[8,128], index: 1, kind: input, shape index: {}]   ;;  %s8258_s2 = inlined_call_operand.<no memory space> [shape: f32[1,1], index: 2, kind: input, shape index: {}]   ;;  %s8259_s3 = inlined_call_operand.hbm [shape: bf16[8,256,128], index: 3, kind: input, shape index: {}]   ;;  %s8260_s4 = inlined_call_operand.hbm [shape: bf16[128,256], index: 4, kind: input, shape index: {}]   ;;  %s8261_s5 = inlined_call_operand.hbm [shape: bf16[128,128], index: 5, kind: input, shape index: {}]   ;;  %s8262_s6 = inlined_call_operand.vmem [shape: f32[1,128], index: 6, kind: input, shape index: {}]   ;;  %s8263_s7 = inlined_call_operand.vmem [shape: f32[1,128], index: 7, kind: input, shape index: {}]   ;;  %s8264_s8 = inlined_call_operand.hbm [shape: f32[8,128], index: 8, kind: output, shape index: {0}]   ;;  %s8265_s9 = inlined_call_operand.hbm [shape: f32[8,256], index: 9, kind: output, shape index: {1}]  }
   0x1   :  { %8280 = sst [smem:[#allocation81_spill]] %s8256_s0  ;;  %v15_v0 = vstv %s8258_s2 }
   0x2   :  { %8281 = sst [smem:[#allocation82_spill]] %s8257_s1  ;;  %16 = vst [vmem:[#allocation5] sm:$0x1] %v15_v0 }
   0x3   :  { %8282 = sst [smem:[#allocation83_spill]] %s8260_s4 }
   0x4   :  { %17 = vsyncpa [#allocation7], 0 }
   0x5   :  { %18 = vsyncpa [#allocation10], 0 }
   0x6   :  { %19 = vsyncpa [#allocation14], 0 }
   0x7   :  { %20 = vsyncpa [#allocation8], 0 }
   0x8   :  { %21 = vsyncpa [#allocation17], 0  ;;  %s6134_s11 = smov 0   ;;  %s6136_s12 = smov 0  }
   0x9   :  { %s6138_s13 = smov 0   ;;  %s6140_s14 = smov 0  }
   0xa   :  { %s6142_s15 = smov 0   ;;  %s6144_s16 = smov 0  }
   0xb LB: > { %s6163_s2 = sadd.s32 4294967295, %s6056_s16   ;;  %s36_s17 = sadd.s32 1, %s6052_s15  ;;  %s6056_s16 = sphi %s6144_s16, %s27_s16   ;;  %s6052_s15 = sphi %s6142_s15, %s8455_s15   ;;  %s6048_s14 = sphi %s6140_s14, %s8454_s14   ;;  %s6044_s13 = sphi %s6138_s13, %s8453_s13   ;;  %s6040_s12 = sphi %s6136_s12, %s8452_s12   ;;  %s6036_s11 = sphi %s6134_s11, %s8451_s11  }
   0xc   : > { %p37_p0 = scmp.ge.s32.totalorder %s36_s17, 2  ;;  %s121_s18 = sadd.s32 1, %s6044_s13 }
   0xd   : > { %p128_p1 = scmp.ne.s32.totalorder %s6044_s13, %s6040_s12  ;;  %p129_p2 = scmp.eq.s32.totalorder %s6056_s16, 0 }
   0xe   : > { %s8457_s17 = smov (%p37_p0, %s36_s17), 0  ;;  %p134_p4 = scmp.ne.s32.totalorder %s6040_s12, %s6036_s11 }
   0xf   : > { %p6172_p3 = por %p129_p2, %p128_p1  ;;  %s117_s20 = ssub.s32 %s6052_s15, %s8457_s17 }
  0x10   : > { %p8266_p5 = scmp.eq.s32.totalorder %s6163_s2, 0  ;;  %p119_p6 = scmp.eq.s32.totalorder %s117_s20, 0 }
  0x11   : > { %s8283_s19 = scalar_select %p6172_p3, 1, 0 }
  0x12   : > { %p4957_p7 = scmp.ge.s32.totalorder %s6056_s16, 1  ;;  %p6183_p8 = por %p8266_p5, %p134_p4 }
  0x13   : > { %p281_p9 = scmp.lt.s32.totalorder %s6056_s16, 3  ;;  %s6058_s24 = smov [#allocation9]  }
  0x14   : > { %s8284_s21 = scalar_select %p6183_p8, 1, 0 }
  0x15   : > { %s6189_s22 = scalar_select %p119_p6, %s6044_s13, %s121_s18  }
  0x16   : > { %p6191_p10 = pnand %p4957_p7, %p281_p9  ;;  %s309_s25 = sshll.u32 %s6058_s24, 4  ;;  %s310_s25 = int_to_ptr.vmem [resolvable:$true] %s309_s25 }
  0x17   : > { %s6059_s27 = smov [#allocation6]   ;;  %s5841_s29 = scalar_lea.vmem %s310_s25, 128 }
  0x18   : > { %s8285_s23 = scalar_select %p6191_p10, 1, 0 }
  0x19   : > { %p5557_p11 = pneg %p6191_p10  ;;  %s296_s28 = sshll.u32 %s6059_s27, 4  ;;  %s297_s28 = int_to_ptr.vmem [resolvable:$true] %s296_s28 }
  0x1a   : > { %p5842_p0 = scmp.ne.s32.totalorder %s310_s25, %s5841_s29  ;;  %p5849_p4 = scmp.lt.s32.totalorder %s310_s25, %s310_s25 }
  0x1b   : > { %p6199_p12 = pnand %p5557_p11, %p8266_p5  ;;  %p5850_p6 = scmp.lt.s32.totalorder %s5841_s29, %s5841_s29 }
  0x1d   : > { %p5832_p13 = pneg %p6199_p12  ;;  %p5851_p7 = por %p5850_p6, %p5849_p4 }
  0x1f   : > { %p5844_p1 = pnand %p5842_p0, %p5832_p13 }
  0x21   : > { %p5845_p2 = pneg %p5844_p1 }
  0x23   : > { %p5852_p9 = pnand %p5851_p7, %p5845_p2 }
  0x25   : > { %5855 = shalt.err (!%p5852_p9)
}
  0x26   : > { %s8287_s1 = sld [smem:[#allocation82_spill]]  ;;  %s5867_s11 = scalar_lea.vmem %s297_s28, 128 }
  0x27   : > { %p5868_p11 = scmp.ne.s32.totalorder %s297_s28, %s5867_s11  ;;  %p5875_p0 = scmp.lt.s32.totalorder %s297_s28, %s297_s28 }
  0x28   : > { %p5876_p1 = scmp.lt.s32.totalorder %s5867_s11, %s5867_s11 }
  0x29   : > { %p5870_p5 = pnand %p5868_p11, %p5832_p13 }
  0x2a   : > { %p5877_p10 = por %p5876_p1, %p5875_p0 }
  0x2b   : > { %p5871_p8 = pneg %p5870_p5 }
  0x2c   : > { %5563 = dma.hbm_to_vmem [thread:$0]  (!%p6199_p12), %s8287_s1, 128, %s310_s25, [#allocation10]  }
  0x2d   : > { %p5878_p3 = pnand %p5877_p10, %p5871_p8 }
  0x2f   : > { %5881 = shalt.err (!%p5878_p3)
}
  0x30   : > { %s8288_s0 = sld [smem:[#allocation81_spill]]  ;;  %s6060_s24 = smov [#allocation12]  }
  0x31   : > { %s322_s25 = sshll.u32 %s6060_s24, 4  ;;  %s323_s25 = int_to_ptr.vmem [resolvable:$true] %s322_s25 }
  0x32   : > { %s5893_s27 = scalar_lea.vmem %s323_s25, 2048  ;;  %p5901_p6 = scmp.lt.s32.totalorder %s323_s25, %s323_s25 }
  0x33   : > { %p5894_p2 = scmp.ne.s32.totalorder %s323_s25, %s5893_s27  ;;  %p5902_p7 = scmp.lt.s32.totalorder %s5893_s27, %s5893_s27 }
  0x35   : > { %p5896_p5 = pnand %p5894_p2, %p5832_p13  ;;  %p5903_p8 = por %p5902_p7, %p5901_p6 }
  0x36   : > { %5560 = dma.hbm_to_vmem [thread:$0]  (!%p6199_p12), %s8288_s0, 128, %s297_s28, [#allocation7]  }
  0x37   : > { %p5897_p4 = pneg %p5896_p5 }
  0x39   : > { %p5904_p3 = pnand %p5903_p8, %p5897_p4 }
  0x3b   : > { %5907 = shalt.err (!%p5904_p3)
}
  0x3c   : > { %s6061_s29 = smov 128   ;;  %s6062_s30 = smov 8  }
  0x3d   : > { %s8289_s4 = sld [smem:[#allocation83_spill]]  ;;  %s6063_s11 = smov [#allocation13]  }
  0x3e   : > { %s335_s18 = sshll.u32 %s6063_s11, 4  ;;  %s336_s18 = int_to_ptr.vmem [resolvable:$true] %s335_s18 }
  0x3f   : > { %s5919_s20 = scalar_lea.vmem %s336_s18, 1024  ;;  %p5927_p0 = scmp.lt.s32.totalorder %s336_s18, %s336_s18 }
  0x40   : > { %p5920_p10 = scmp.ne.s32.totalorder %s336_s18, %s5919_s20  ;;  %p5928_p1 = scmp.lt.s32.totalorder %s5919_s20, %s5919_s20 }
  0x42   : > { %p5922_p9 = pnand %p5920_p10, %p5832_p13  ;;  %p5929_p2 = por %p5928_p1, %p5927_p0 }
  0x43   : > { %5566 = dma.hbm_to_vmem [thread:$0]  (!%p6199_p12), %s8289_s4, 2048, %s323_s25, [#allocation10], %s6061_s29, %s6061_s29, %s6062_s30  }
  0x44   : > { %p5923_p11 = pneg %p5922_p9 }
  0x46   : > { %p5930_p5 = pnand %p5929_p2, %p5923_p11 }
  0x48   : > { %5933 = shalt.err (!%p5930_p5)
}
  0x49   : > { %s6064_s24 = smov 64   ;;  %s6065_s27 = smov 4  }
  0x4a   : > { %5569 = dma.hbm_to_vmem [thread:$0]  (!%p6199_p12), %s8261_s5, 1024, %s336_s18, [#allocation14], %s6064_s24, %s6064_s24, %s6065_s27  }
  0x4b   : > { %p4962_p4 = scmp.ge.s32.totalorder %s6056_s16, 2 }
  0x4d   : > { %351 = sbr.rel (%p4962_p4) target bundleno = 97 (0x61), region = 44 }
  0x52   : > { %s355_s29 = sand.u32 1, %s6056_s16   ;;  %s357_s30 = sand.u32 1, %s6044_s13  }
  0x53   : > { %s4963_s10 = sshll.u32 %s357_s30, 9  ;;  %s5075_s26 = sshll.u32 %s6052_s15, 10 }
  0x54   : > { %s368_s18 = scalar_lea.hbm %s8259_s3, %s5075_s26  ;;  %p8290_p12 = scmp.ne.s32.totalorder %s8283_s19, 0 }
  0x55   : > { %s359_s27 = scalar_lea.vmem [#allocation11], %s4963_s10  ;;  %s6066_s0 = smov 2048  }
  0x56   : > { %s5532_s24 = scalar_select %p8290_p12, [#allocation0], [#allocation20] }
  0x57   : > { %s381_s28 = sshll.u32 %s359_s27, 4  ;;  %5533 = sst [smem:[#allocation19]] (%p8290_p12), %s6066_s0  ;;  %s382_s28 = int_to_ptr.vmem [resolvable:$true] %s381_s28 }
  0x58   : > { %s373_s25 = sld [smem:[%s5532_s24]]   ;;  %s6067_s1 = smov 1024  }
  0x59   : > { %5534 = sst [smem:[#allocation19 + $0x1]] (%p8290_p12), %s6067_s1  ;;  %s6068_s30 = smov 16  }
  0x5a   : > { %5535 = sst [smem:[#allocation19 + $0x2]] (%p8290_p12), %s6068_s30  ;;  %s6069_s4 = smov 64  }
  0x5b   : > { %5536 = sst [smem:[#allocation19 + $0x3]] (%p8290_p12), %s6069_s4  ;;  %s6070_s10 = smov 4  }
  0x5c   : > { %5537 = sst [smem:[#allocation19 + $0x4]] (%p8290_p12), %s6069_s4  ;;  %s356_s20 = scalar_lea.sflag [#allocation7], %s355_s29 }
  0x5d   : > { %5538 = sst [smem:[#allocation19 + $0x5]] (%p8290_p12), %s6070_s10  ;;  %s6071_s24 = smov 131072  }
  0x5e   : > { %s4966_s26 = sshll.u32 %s373_s25, 26 }
  0x5f   : > { %s4967_s11 = sadd.s32 134217728, %s4966_s26 }
  0x60   : > { %5539 = dma.general (%p8290_p12), %s368_s18, 8192, %s382_s28, %s356_s20, %s6071_s24, [#allocation19], %s4967_s11, 0  }
  0x61 PF: > { %p8291_p13 = scmp.ne.s32.totalorder %s8285_s23, 0 }
  0x63   : > { %406 = sbr.rel (%p8291_p13) target bundleno = 2111 (0x83f), region = 52 }
  0x68   : > { %p8292_p6 = scmp.eq.s32.totalorder %s6163_s2, 0 }
  0x6a   : > { %6007 = dma.done.wait (%p8292_p6), [#allocation7], 128   ;;  %p8293_p7 = pmov %p8292_p6 }
  0x6b   : > { %p8294_p8 = pmov %p8292_p6 }
  0x6c   : > { %6009 = vsyncadd (%p8293_p7), [#allocation7], 4294967168 }
  0x6d   : > { %6011 = dma.done.wait (%p8294_p8), [#allocation10], 128   ;;  %p8295_p3 = pmov %p8292_p6 }
  0x6e   : > { %s416_s0 = sand.u32 1, %s6163_s2   ;;  %s418_s1 = sand.u32 1, %s6040_s12  }
  0x6f   : > { %6013 = vsyncadd (%p8295_p3), [#allocation10], 4294967168  ;;  %s4971_s4 = sshll.u32 %s418_s1, 9  ;;  %s417_s19 = scalar_lea.sflag [#allocation7], %s416_s0 }
  0x70   : > { %s6272_s23 = scalar_lea.vmem [#allocation11], %s4971_s4  ;;  %p8296_p10 = scmp.ne.s32.totalorder %s8284_s21, 0 }
  0x72   : > { %6015 = dma.done.wait (%p8296_p10), %s417_s19, 8192  }
  0x73   : > { %6017 = vsyncadd (%p8296_p10), %s417_s19, 4294959104  ;;  %p8297_p9 = pmov %p8295_p3 }
  0x74   : > { %p8298_p11 = pmov %p8295_p3 }
  0x75   : > { %6019 = dma.done.wait (%p8297_p9), [#allocation10], 2048  }
  0x76   : > { %6021 = vsyncadd (%p8298_p11), [#allocation10], 4294965248  ;;  %p8299_p0 = pmov %p8295_p3 }
  0x78   : > { %6023 = dma.done.wait (%p8299_p0), [#allocation14], 1024   ;;  %p8300_p1 = pmov %p8299_p0 }
  0x79   : > { %p4974_p2 = scmp.ne.s32.totalorder %s6048_s14, 0 }
  0x7a   : > { %6025 = vsyncadd (%p8300_p1), [#allocation14], 4294966272 }
  0x7b   : > { %464 = sbr.rel (%p4974_p2) target bundleno = 132 (0x84), region = 76 }
  0x80   : > { %vm465_vm0 = vcmask 7168   ;;  %v6072_v1 = vmov -1e+30   ;;  %v6073_v2 = vmov 0.0  }
  0x81   : > { %466 = vst.msk [vmem:[#allocation2] sm:$0xff] %vm465_vm0, %v6072_v1  ;;  %467 = vst.msk [vmem:[#allocation3] sm:$0xff] %vm465_vm0, %v6073_v2 }
  0x82   : > { %468 = vst [vmem:[#allocation4] sm:$0xff] %v6073_v2  ;;  %469 = vst [vmem:[#allocation16] sm:$0xff] %v6073_v2 }
  0x83   : > { %470 = vst [vmem:[#allocation16 + $0x8] sm:$0xff] %v6073_v2 }
  0x84 PF: > { %v5655_v3 = vld [vmem:[#allocation12 + $0x74] ss:$8 sps:$4 sm:$0xff]   ;;  %v5657_v4 = vld [vmem:[#allocation12 + $0x70] ss:$8 sps:$4 sm:$0xff]   ;;  %v8273_v5 = vmov 0   ;;  %v5679_v20 = vld [vmem:[%s6272_s23] sm:$0xff]   ;;  %v8270_v53 = vlaneseq }
  0x85   : > { %1111 = vmatprep.mubr.bf16.mxu0 %v8273_v5  ;;  %5653 = vset.pattern.permute.xlu1 %v8273_v5  ;;  %v5658_v6 = vld [vmem:[#allocation12 + $0x64] ss:$8 sps:$4 sm:$0xff]   ;;  %v5660_v7 = vld [vmem:[#allocation12 + $0x60] ss:$8 sps:$4 sm:$0xff]   ;;  %v5661_v8 = vld [vmem:[#allocation12 + $0x54] ss:$8 sps:$4 sm:$0xff]  }
  0x86   : > { %1079 = vmatprep.subr.bf16.mxu0 %v5655_v3  ;;  %5654 = vset.pattern.permute.xlu0 %v8273_v5  ;;  %v5663_v9 = vld [vmem:[#allocation12 + $0x50] ss:$8 sps:$4 sm:$0xff]   ;;  %v5664_v10 = vld [vmem:[#allocation12 + $0x44] ss:$8 sps:$4 sm:$0xff]   ;;  %v5666_v11 = vld [vmem:[#allocation12 + $0x40] ss:$8 sps:$4 sm:$0xff]  }
  0x87   : > { %1080 = vmatpush1.bf16.msra.mxu0 %v5657_v4  ;;  %v5667_v12 = vld [vmem:[#allocation12 + $0x34] ss:$8 sps:$4 sm:$0xff]   ;;  %v5669_v13 = vld [vmem:[#allocation12 + $0x30] ss:$8 sps:$4 sm:$0xff]   ;;  %v5670_v14 = vld [vmem:[#allocation12 + $0x24] ss:$8 sps:$4 sm:$0xff]  }
  0x88   : > { %1081 = vmatprep.subr.bf16.mxu0 %v5658_v6  ;;  %v5672_v15 = vld [vmem:[#allocation12 + $0x20] ss:$8 sps:$4 sm:$0xff]   ;;  %v5673_v16 = vld [vmem:[#allocation12 + $0x14] ss:$8 sps:$4 sm:$0xff]   ;;  %v5675_v17 = vld [vmem:[#allocation12 + $0x10] ss:$8 sps:$4 sm:$0xff]  }
  0x89   : > { %v5676_v18 = vld [vmem:[#allocation12 + $0x4] ss:$8 sps:$4 sm:$0xff]   ;;  %v5678_v19 = vld [vmem:[#allocation12] ss:$8 sps:$4 sm:$0xff]   ;;  %v5681_v22 = vld [vmem:[%s6272_s23 + $0x10] sm:$0xff]   ;;  %v6337_v55 = vshrl.u32 %v8270_v53, 7 }
  0x8a   : > { %v5680_v21 = vld [vmem:[%s6272_s23 + $0x8] sm:$0xff]   ;;  %v5682_v23 = vld [vmem:[%s6272_s23 + $0x18] sm:$0xff]   ;;  %v5683_v24 = vld [vmem:[%s6272_s23 + $0x20] sm:$0xff]   ;;  %v6075_v51 = vmov 1966171168   ;;  %vm3670_vm1 = vcmask 130112  }
  0x8b   : > { %1082 = vmatpush1.bf16.msra.mxu0 %v5660_v7  ;;  %v5684_v25 = vld [vmem:[%s6272_s23 + $0x28] sm:$0xff]   ;;  %v5685_v26 = vld [vmem:[%s6272_s23 + $0x30] sm:$0xff]   ;;  %v5702_v27 = vld [vmem:[#allocation13 + $0x38] sm:$0xff]   ;;  %v1891_v52 = vunpack.c.l.s4 %v6075_v51  ;;  %8301 = vst [vmem:[#allocation28_spill] sm:$0xff] %v6337_v55  ;;  %v6356_v62 = vsub.s32 0, %v6337_v55  ;;  %vm3677_vm2 = vcmask 195712  }
  0x8c   : > { %1083 = vmatprep.subr.bf16.mxu0 %v5661_v8  ;;  %v5703_v28 = vld [vmem:[#allocation13 + $0x30] sm:$0xff]   ;;  %5220 = vmatprep.subr.bf16.mxu1 %v5702_v27  ;;  %v5686_v29 = vld [vmem:[%s6272_s23 + $0x38] sm:$0xff]   ;;  %v5705_v30 = vld [vmem:[#allocation13 + $0x28] sm:$0xff]   ;;  %vm3684_vm3 = vcmask 261312   ;;  %vm3691_vm4 = vcmask 326912   ;;  %vm3698_vm5 = vcmask 392512  }
  0x8d   : > { %5221 = vmatpush3.bf16.msra.mxu1 %v5702_v27  ;;  %v5706_v31 = vld [vmem:[#allocation13 + $0x20] sm:$0xff]   ;;  %v5708_v33 = vld [vmem:[#allocation13 + $0x18] sm:$0xff]   ;;  %v5688_v34 = vld [vmem:[%s6272_s23 + $0x48] sm:$0xff]   ;;  %v1892_v54 = vunpack.c.0.s8 %v1891_v52  ;;  %vm3705_vm6 = vcmask 458112   ;;  %vm3712_vm7 = vcmask 523712   ;;  %vm3719_vm8 = vcmask 589312  }
  0x8e   : > { %5222 = vmatprep.subr.bf16.mxu1 %v5703_v28  ;;  %v5687_v32 = vld [vmem:[%s6272_s23 + $0x40] sm:$0xff]   ;;  %v5709_v35 = vld [vmem:[#allocation13 + $0x10] sm:$0xff]   ;;  %v5711_v36 = vld [vmem:[#allocation13 + $0x8] sm:$0xff]   ;;  %vm3726_vm9 = vcmask 654912   ;;  %vm3733_vm10 = vcmask 720512   ;;  %vm3740_vm11 = vcmask 786112  }
  0x8f   : > { %1084 = vmatpush1.bf16.msra.mxu0 %v5663_v9  ;;  %v5689_v37 = vld [vmem:[%s6272_s23 + $0x50] sm:$0xff]   ;;  %v5712_v38 = vld [vmem:[#allocation13] sm:$0xff]   ;;  %v5690_v39 = vld [vmem:[%s6272_s23 + $0x58] sm:$0xff]   ;;  %v6341_v57 = vsub.s32 %v1892_v54, %v6337_v55  ;;  %vm8275_vm12 = vcmask 851712   ;;  %vm3754_vm13 = vcmask 917312   ;;  %vm3761_vm14 = vcmask 982912  }
  0x90   : > { %1085 = vmatprep.subr.bf16.mxu0 %v5664_v10  ;;  %v5691_v40 = vld [vmem:[%s6272_s23 + $0x60] sm:$0xff]   ;;  %v5692_v41 = vld [vmem:[%s6272_s23 + $0x68] sm:$0xff]   ;;  %v5693_v42 = vld [vmem:[%s6272_s23 + $0x70] sm:$0xff]   ;;  %vm3768_vm15 = vcmask 1048512   ;;  %vm8277_vm0 = vcmask 1041409   ;;  %s5066_s0 = sshll.u32 %s6048_s14, 7 }
  0x91   : > { %5223 = vmatpush3.bf16.msra.mxu1 %v5703_v28  ;;  %v5694_v43 = vld [vmem:[%s6272_s23 + $0x78] sm:$0xff]   ;;  %v5695_v44 = vld [vmem:[%s6272_s23 + $0x80] sm:$0xff]   ;;  %v5696_v45 = vld [vmem:[%s6272_s23 + $0x88] sm:$0xff]   ;;  %s4365_s1 = sshra.s32 %s5066_s0, 7  ;;  %p5068_p5 = scmp.ne.s32.totalorder %s6048_s14, 1 }
  0x92   : > { %5224 = vmatprep.subr.bf16.mxu1 %v5705_v30  ;;  %v5697_v46 = vld [vmem:[%s6272_s23 + $0x90] sm:$0xff]   ;;  %v5698_v47 = vld [vmem:[%s6272_s23 + $0x98] sm:$0xff]   ;;  %v5699_v48 = vld [vmem:[%s6272_s23 + $0xa0] sm:$0xff]   ;;  %s5067_s4 = sshll.u32 %s4365_s1, 3 }
  0x93   : > { %1086 = vmatpush1.bf16.msra.mxu0 %v5666_v11  ;;  %v5700_v49 = vld [vmem:[%s6272_s23 + $0xa8] sm:$0xff]   ;;  %v5701_v50 = vld [vmem:[%s6272_s23 + $0xb0] sm:$0xff]   ;;  %v5704_v56 = vld [vmem:[%s6272_s23 + $0xb8] sm:$0xff]   ;;  %s4368_s19 = scalar_lea.vmem [#allocation16], %s5067_s4 }
  0x94   : > { %1087 = vmatprep.subr.bf16.mxu0 %v5667_v12  ;;  %v6343_v58 = vld [vmem:[#allocation6] sm:$0xff]  ;;  %v5707_v60 = vld [vmem:[%s6272_s23 + $0xc0] sm:$0xff]   ;;  %v5710_v6 = vld [vmem:[%s6272_s23 + $0xc8] sm:$0xff]  }
  0x95   : > { %5225 = vmatpush3.bf16.msra.mxu1 %v5705_v30  ;;  %v6348_v59 = vrot.slane %v6343_v58, %v6341_v57  ;;  %v6361_v0 = vld [vmem:[%s8262_s6] ss:$0 sm:$0xff]  ;;  %v5734_v53 = vld [vmem:[%s6272_s23 + $0x178] sm:$0xff]  }
  0x96   : > { %5226 = vmatprep.subr.bf16.mxu1 %v5706_v31 }
  0x97   : > { %1088 = vmatpush1.bf16.msra.mxu0 %v5669_v13  ;;  %v6353_v61 = vrot.slane %v6348_v59, %v6341_v57 }
  0x98   : > { %1089 = vmatprep.subr.bf16.mxu0 %v5670_v14 }
  0x99   : > { %5227 = vmatpush3.bf16.msra.mxu1 %v5706_v31  ;;  %v6369_v3 = vrot.slane %v6353_v61, %v6356_v62 }
  0x9a   : > { %5228 = vmatprep.subr.bf16.mxu1 %v5708_v33 }
  0x9b   : > { %1090 = vmatpush1.bf16.msra.mxu0 %v5672_v15 }
  0x9c   : > { %1091 = vmatprep.subr.bf16.mxu0 %v5673_v16  ;;  %v5713_v16 = vld [vmem:[%s6272_s23 + $0xd0] sm:$0xff]  }
  0x9d   : > { %5229 = vmatpush3.bf16.msra.mxu1 %v5708_v33 }
  0x9e   : > { %5230 = vmatprep.subr.bf16.mxu1 %v5709_v35 }
  0x9f   : > { %1092 = vmatpush1.bf16.msra.mxu0 %v5675_v17 }
  0xa0   : > { %1093 = vmatprep.subr.bf16.mxu0 %v5676_v18 }
  0xa1   : > { %5231 = vmatpush3.bf16.msra.mxu1 %v5709_v35 }
  0xa2   : > { %5232 = vmatprep.subr.bf16.mxu1 %v5711_v36 }
  0xa3   : > { %1094 = vmatpush1.bf16.msra.mxu0 %v5678_v19 }
  0xa5   : > { %5233 = vmatpush3.bf16.msra.mxu1 %v5711_v36  ;;  %v5715_v36 = vld [vmem:[%s6272_s23 + $0xe0] sm:$0xff]  }
  0xa6   : > { %1112 = vmatmul.mubr.bf16.vlgmr.msra.gmra.mxu0 %v5679_v20  ;;  %5234 = vmatprep.subr.bf16.mxu1 %v5712_v38 }
  0xa7   : > { %1121 = vmatprep.mubr.bf16.mxu0 %v8273_v5 }
  0xa9   : > { %5235 = vmatpush3.bf16.msra.mxu1 %v5712_v38 }
  0xae   : > { %1122 = vmatmul.mubr.bf16.gmra.mxu0 %v5680_v21 }
  0xaf   : > { %1131 = vmatprep.mubr.bf16.mxu0 %v8273_v5 }
  0xb6   : > { %1132 = vmatmul.mubr.bf16.gmra.mxu0 %v5681_v22 }
  0xb7   : > { %1141 = vmatprep.mubr.bf16.mxu0 %v8273_v5 }
  0xbe   : > { %1142 = vmatmul.mubr.bf16.gmra.mxu0 %v5682_v23 }
  0xbf   : > { %1151 = vmatprep.mubr.bf16.mxu0 %v8273_v5 }
  0xc6   : > { %1152 = vmatmul.mubr.bf16.gmra.mxu0 %v5683_v24 }
  0xc7   : > { %1161 = vmatprep.mubr.bf16.mxu0 %v8273_v5 }
  0xce   : > { %1162 = vmatmul.mubr.bf16.gmra.mxu0 %v5684_v25 }
  0xcf   : > { %1171 = vmatprep.mubr.bf16.mxu0 %v8273_v5 }
  0xd6   : > { %1172 = vmatmul.mubr.bf16.gmra.mxu0 %v5685_v26  ;;  %v5714_v26 = vld [vmem:[%s6272_s23 + $0xd8] sm:$0xff]  }
  0xd7   : > { %1181 = vmatprep.mubr.bf16.mxu0 %v8273_v5 }
  0xde   : > { %1182 = vmatmul.mubr.bf16.gmra.mxu0 %v5686_v29 }
  0xdf   : > { %1191 = vmatprep.mubr.bf16.mxu0 %v8273_v5 }
  0xe6   : > { %1192 = vmatmul.mubr.bf16.gmra.mxu0 %v5687_v32 }
  0xe7   : > { %1201 = vmatprep.mubr.bf16.mxu0 %v8273_v5 }
  0xee   : > { %1202 = vmatmul.mubr.bf16.gmra.mxu0 %v5688_v34 }
  0xef   : > { %1211 = vmatprep.mubr.bf16.mxu0 %v8273_v5 }
  0xf6   : > { %1212 = vmatmul.mubr.bf16.gmra.mxu0 %v5689_v37 }
  0xf7   : > { %1221 = vmatprep.mubr.bf16.mxu0 %v8273_v5 }
  0xfe   : > { %1222 = vmatmul.mubr.bf16.gmra.mxu0 %v5690_v39 }
  0xff   : > { %1231 = vmatprep.mubr.bf16.mxu0 %v8273_v5 }
 0x106   : > { %1232 = vmatmul.mubr.bf16.gmra.mxu0 %v5691_v40 }
 0x107   : > { %1241 = vmatprep.mubr.bf16.mxu0 %v8273_v5 }
 0x10e   : > { %1242 = vmatmul.mubr.bf16.gmra.mxu0 %v5692_v41 }
 0x10f   : > { %1251 = vmatprep.mubr.bf16.mxu0 %v8273_v5 }
 0x116   : > { %1252 = vmatmul.mubr.bf16.gmra.mxu0 %v5693_v42 }
 0x117   : > { %1261 = vmatprep.mubr.bf16.mxu0 %v8273_v5 }
 0x11e   : > { %1262 = vmatmul.mubr.bf16.gmra.mxu0 %v5694_v43 }
 0x11f   : > { %1271 = vmatprep.mubr.bf16.mxu0 %v8273_v5 }
 0x126   : > { %1272 = vmatmul.mubr.bf16.gmra.mxu0 %v5695_v44 }
 0x127   : > { %1281 = vmatprep.mubr.bf16.mxu0 %v8273_v5 }
 0x12e   : > { %1282 = vmatmul.mubr.bf16.gmra.mxu0 %v5696_v45 }
 0x12f   : > { %1291 = vmatprep.mubr.bf16.mxu0 %v8273_v5 }
 0x136   : > { %1292 = vmatmul.mubr.bf16.gmra.mxu0 %v5697_v46  ;;  %v5716_v46 = vld [vmem:[%s6272_s23 + $0xe8] sm:$0xff]  }
 0x137   : > { %1301 = vmatprep.mubr.bf16.mxu0 %v8273_v5 }
 0x13e   : > { %1302 = vmatmul.mubr.bf16.gmra.mxu0 %v5698_v47 }
 0x13f   : > { %1311 = vmatprep.mubr.bf16.mxu0 %v8273_v5 }
 0x146   : > { %1312 = vmatmul.mubr.bf16.gmra.mxu0 %v5699_v48 }
 0x147   : > { %1321 = vmatprep.mubr.bf16.mxu0 %v8273_v5 }
 0x14e   : > { %1322 = vmatmul.mubr.bf16.gmra.mxu0 %v5700_v49 }
 0x14f   : > { %1331 = vmatprep.mubr.bf16.mxu0 %v8273_v5 }
 0x156   : > { %1332 = vmatmul.mubr.bf16.gmra.mxu0 %v5701_v50 }
 0x157   : > { %1341 = vmatprep.mubr.bf16.mxu0 %v8273_v5 }
 0x15e   : > { %1342 = vmatmul.mubr.bf16.gmra.mxu0 %v5704_v56 }
 0x15f   : > { %1351 = vmatprep.mubr.bf16.mxu0 %v8273_v5 }
 0x166   : > { %v1113_v63 = vpop.f32.mrf.mxu0  ;;  %1352 = vmatmul.mubr.bf16.gmra.mxu0 %v5707_v60 }
 0x167   : > { %1361 = vmatprep.mubr.bf16.mxu0 %v8273_v5  ;;  %v1759_v2 = vadd.f32 %v6361_v0, %v1113_v63  ;;  %v5717_v63 = vld [vmem:[%s6272_s23 + $0xf0] sm:$0xff]  }
 0x168   : > { %v6364_v1 = vpop.f32.mrf.mxu0 }
 0x169   : > { %v1978_v9 = vmul.f32 %v6369_v3, %v1759_v2 }
 0x16a   : > { %v1117_v4 = vpop.f32.mrf.mxu0 }
 0x16b   : > { %v1760_v7 = vadd.f32 %v6361_v0, %v1117_v4 }
 0x16c   : > { %v6373_v8 = vpop.f32.mrf.mxu0 }
 0x16d   : > { %v1979_v10 = vmul.f32 %v6369_v3, %v1760_v7 }
 0x16e   : > { %v1123_v11 = vpop.f32.mrf.mxu0  ;;  %1362 = vmatmul.mubr.bf16.gmra.mxu0 %v5710_v6 }
 0x16f   : > { %v2106_v12 = vpack.c.bf16 %v1979_v10, %v1978_v9  ;;  %1371 = vmatprep.mubr.bf16.mxu0 %v8273_v5  ;;  %v1761_v14 = vadd.f32 %v6361_v0, %v1123_v11 }
 0x170   : > { %v6378_v13 = vpop.f32.mrf.mxu0 }
 0x171   : > { %5236 = vmatprep.mubr.bf16.mxu1 %v2106_v12  ;;  %v1980_v19 = vmul.f32 %v6369_v3, %v1761_v14 }
 0x172   : > { %v1127_v15 = vpop.f32.mrf.mxu0 }
 0x173   : > { %v1762_v17 = vadd.f32 %v6361_v0, %v1127_v15  ;;  %v5718_v15 = vld [vmem:[%s6272_s23 + $0xf8] sm:$0xff]  }
 0x174   : > { %v6383_v18 = vpop.f32.mrf.mxu0 }
 0x175   : > { %v1981_v20 = vmul.f32 %v6369_v3, %v1762_v17 }
 0x176   : > { %v1133_v21 = vpop.f32.mrf.mxu0  ;;  %1372 = vmatmul.mubr.bf16.gmra.mxu0 %v5713_v16 }
 0x177   : > { %v2107_v22 = vpack.c.bf16 %v1981_v20, %v1980_v19  ;;  %1381 = vmatprep.mubr.bf16.mxu0 %v8273_v5  ;;  %v1763_v24 = vadd.f32 %v6361_v0, %v1133_v21 }
 0x178   : > { %v6388_v23 = vpop.f32.mrf.mxu0 }
 0x179   : > { %5237 = vmatmul.mubr.bf16.vlgmr.msra.gmra.mxu1 %v2107_v22  ;;  %v1982_v29 = vmul.f32 %v6369_v3, %v1763_v24 }
 0x17a   : > { %v1137_v25 = vpop.f32.mrf.mxu0 }
 0x17b   : > { %v1764_v27 = vadd.f32 %v6361_v0, %v1137_v25 }
 0x17c   : > { %v6393_v28 = vpop.f32.mrf.mxu0 }
 0x17d   : > { %v1983_v30 = vmul.f32 %v6369_v3, %v1764_v27 }
 0x17e   : > { %v1143_v31 = vpop.f32.mrf.mxu0  ;;  %1382 = vmatmul.mubr.bf16.gmra.mxu0 %v5714_v26  ;;  %v1904_v26 = vcombine.high %v6348_v59, %v6348_v59 }
 0x17f   : > { %v2108_v32 = vpack.c.bf16 %v1983_v30, %v1982_v29  ;;  %1391 = vmatprep.mubr.bf16.mxu0 %v8273_v5  ;;  %v1765_v34 = vadd.f32 %v6361_v0, %v1143_v31  ;;  %v5719_v29 = vld [vmem:[%s6272_s23 + $0x100] sm:$0xff]  }
 0x180   : > { %v6398_v33 = vpop.f32.mrf.mxu0 }
 0x181   : > { %5240 = vmatprep.mubr.bf16.mxu1 %v2108_v32  ;;  %v1984_v39 = vmul.f32 %v6369_v3, %v1765_v34 }
 0x182   : > { %v1147_v35 = vpop.f32.mrf.mxu0 }
 0x183   : > { %v1766_v37 = vadd.f32 %v6361_v0, %v1147_v35  ;;  %v6450_v35 = vrot.slane %v1904_v26, %v6341_v57 }
 0x184   : > { %v6403_v38 = vpop.f32.mrf.mxu0 }
 0x185   : > { %v1985_v40 = vmul.f32 %v6369_v3, %v1766_v37 }
 0x186   : > { %v1153_v41 = vpop.f32.mrf.mxu0  ;;  %1392 = vmatmul.mubr.bf16.gmra.mxu0 %v5715_v36 }
 0x187   : > { %v2109_v42 = vpack.c.bf16 %v1985_v40, %v1984_v39  ;;  %1401 = vmatprep.mubr.bf16.mxu0 %v8273_v5  ;;  %v1767_v44 = vadd.f32 %v6361_v0, %v1153_v41  ;;  %v6458_v40 = vrot.slane %v6450_v35, %v6356_v62 }
 0x188   : > { %v6408_v43 = vpop.f32.mrf.mxu0 }
 0x189   : > { %5241 = vmatmul.mubr.bf16.gmra.mxu1 %v2109_v42  ;;  %v1986_v49 = vmul.f32 %v6369_v3, %v1767_v44 }
 0x18a   : > { %v1157_v45 = vpop.f32.mrf.mxu0 }
 0x18b   : > { %v1768_v47 = vadd.f32 %v6361_v0, %v1157_v45 }
 0x18c   : > { %v6413_v48 = vpop.f32.mrf.mxu0 }
 0x18d   : > { %v1987_v50 = vmul.f32 %v6369_v3, %v1768_v47  ;;  %v5065_v47 = vld [vmem:[#allocation5] ss:$0 sm:$0xff] }
 0x18e   : > { %v1163_v51 = vpop.f32.mrf.mxu0  ;;  %1402 = vmatmul.mubr.bf16.gmra.mxu0 %v5716_v46  ;;  %3396 = vperm.xlu1 %5653, %v5065_v47   ;;  %v5724_v47 = vld [vmem:[%s6272_s23 + $0x128] sm:$0xff]  }
 0x18f   : > { %v2110_v52 = vpack.c.bf16 %v1987_v50, %v1986_v49  ;;  %1411 = vmatprep.mubr.bf16.mxu0 %v8273_v5  ;;  %v1769_v56 = vadd.f32 %v6361_v0, %v1163_v51 }
 0x190   : > { %v6418_v54 = vpop.f32.mrf.mxu0 }
 0x191   : > { %5244 = vmatprep.mubr.bf16.mxu1 %v2110_v52  ;;  %v1988_v6 = vmul.f32 %v6369_v3, %v1769_v56 }
 0x192   : > { %v1167_v60 = vpop.f32.mrf.mxu0 }
 0x193   : > { %v1770_v2 = vadd.f32 %v6361_v0, %v1167_v60  ;;  %v5721_v60 = vld [vmem:[%s6272_s23 + $0x110] sm:$0xff]  }
 0x194   : > { %v6423_v4 = vpop.f32.mrf.mxu0 }
 0x195   : > { %v1989_v7 = vmul.f32 %v6369_v3, %v1770_v2 }
 0x196   : > { %v1173_v9 = vpop.f32.mrf.mxu0  ;;  %1412 = vmatmul.mubr.bf16.gmra.mxu0 %v5717_v63 }
 0x197   : > { %v2111_v10 = vpack.c.bf16 %v1989_v7, %v1988_v6  ;;  %1421 = vmatprep.mubr.bf16.mxu0 %v8273_v5  ;;  %v1771_v12 = vadd.f32 %v6361_v0, %v1173_v9 }
 0x198   : > { %v6428_v11 = vpop.f32.mrf.mxu0 }
 0x199   : > { %5245 = vmatmul.mubr.bf16.gmra.mxu1 %v2111_v10  ;;  %v1990_v19 = vmul.f32 %v6369_v3, %v1771_v12 }
 0x19a   : > { %v1177_v14 = vpop.f32.mrf.mxu0 }
 0x19b   : > { %v1772_v16 = vadd.f32 %v6361_v0, %v1177_v14 }
 0x19c   : > { %v6433_v17 = vpop.f32.mrf.mxu0 }
 0x19d   : > { %v1991_v20 = vmul.f32 %v6369_v3, %v1772_v16  ;;  %v5722_v16 = vld [vmem:[%s6272_s23 + $0x118] sm:$0xff]  }
 0x19e   : > { %v1183_v21 = vpop.f32.mrf.mxu0  ;;  %1422 = vmatmul.mubr.bf16.gmra.mxu0 %v5718_v15 }
 0x19f   : > { %v2112_v22 = vpack.c.bf16 %v1991_v20, %v1990_v19  ;;  %1431 = vmatprep.mubr.bf16.mxu0 %v8273_v5  ;;  %v1773_v25 = vadd.f32 %v6361_v0, %v1183_v21 }
 0x1a0   : > { %v6438_v24 = vpop.f32.mrf.mxu0 }
 0x1a1   : > { %5248 = vmatprep.mubr.bf16.mxu1 %v2112_v22  ;;  %v1992_v32 = vmul.f32 %v6369_v3, %v1773_v25 }
 0x1a2   : > { %v1187_v27 = vpop.f32.mrf.mxu0 }
 0x1a3   : > { %v1774_v30 = vadd.f32 %v6361_v0, %v1187_v27 }
 0x1a4   : > { %v6445_v31 = vpop.f32.mrf.mxu0 }
 0x1a5   : > { %v1993_v34 = vmul.f32 %v6369_v3, %v1774_v30  ;;  %v5720_v3 = vld [vmem:[%s6272_s23 + $0x108] sm:$0xff]  }
 0x1a6   : > { %v1193_v36 = vpop.f32.mrf.mxu0  ;;  %1432 = vmatmul.mubr.bf16.gmra.mxu0 %v5719_v29 }
 0x1a7   : > { %v2113_v37 = vpack.c.bf16 %v1993_v34, %v1992_v32  ;;  %1441 = vmatprep.mubr.bf16.mxu0 %v8273_v5  ;;  %v1775_v39 = vadd.f32 %v6361_v0, %v1193_v36  ;;  %v5723_v32 = vld [vmem:[%s6272_s23 + $0x120] sm:$0xff]  }
 0x1a8   : > { %v6453_v59 = vpop.f32.mrf.mxu0 }
 0x1a9   : > { %5249 = vmatmul.mubr.bf16.gmra.mxu1 %v2113_v37  ;;  %v1994_v45 = vmul.f32 %v6458_v40, %v1775_v39 }
 0x1aa   : > { %v1197_v41 = vpop.f32.mrf.mxu0 }
 0x1ab   : > { %v1776_v42 = vadd.f32 %v6361_v0, %v1197_v41 }
 0x1ac   : > { %v6462_v44 = vpop.f32.mrf.mxu0 }
 0x1ad   : > { %v1995_v46 = vmul.f32 %v6458_v40, %v1776_v42 }
 0x1ae   : > { %v1203_v49 = vpop.f32.mrf.mxu0  ;;  %1442 = vmatmul.mubr.bf16.gmra.mxu0 %v5720_v3 }
 0x1af   : > { %v2114_v50 = vpack.c.bf16 %v1995_v46, %v1994_v45  ;;  %1451 = vmatprep.mubr.bf16.mxu0 %v8273_v5  ;;  %v1777_v52 = vadd.f32 %v6361_v0, %v1203_v49 }
 0x1b0   : > { %v6467_v51 = vpop.f32.mrf.mxu0 }
 0x1b1   : > { %5252 = vmatprep.mubr.bf16.mxu1 %v2114_v50  ;;  %v1996_v6 = vmul.f32 %v6458_v40, %v1777_v52 }
 0x1b2   : > { %v1207_v56 = vpop.f32.mrf.mxu0 }
 0x1b3   : > { %v1778_v63 = vadd.f32 %v6361_v0, %v1207_v56 }
 0x1b4   : > { %v6472_v2 = vpop.f32.mrf.mxu0 }
 0x1b5   : > { %v1997_v7 = vmul.f32 %v6458_v40, %v1778_v63 }
 0x1b6   : > { %v1213_v9 = vpop.f32.mrf.mxu0  ;;  %1452 = vmatmul.mubr.bf16.gmra.mxu0 %v5721_v60 }
 0x1b7   : > { %v2115_v10 = vpack.c.bf16 %v1997_v7, %v1996_v6  ;;  %1461 = vmatprep.mubr.bf16.mxu0 %v8273_v5  ;;  %v1779_v14 = vadd.f32 %v6361_v0, %v1213_v9 }
 0x1b8   : > { %v6477_v12 = vpop.f32.mrf.mxu0 }
 0x1b9   : > { %5253 = vmatmul.mubr.bf16.gmra.mxu1 %v2115_v10  ;;  %v1998_v21 = vmul.f32 %v6458_v40, %v1779_v14  ;;  %v5725_v10 = vld [vmem:[%s6272_s23 + $0x130] sm:$0xff]  }
 0x1ba   : > { %v1217_v15 = vpop.f32.mrf.mxu0 }
 0x1bb   : > { %v1780_v19 = vadd.f32 %v6361_v0, %v1217_v15 }
 0x1bc   : > { %v6482_v20 = vpop.f32.mrf.mxu0 }
 0x1bd   : > { %v1999_v22 = vmul.f32 %v6458_v40, %v1780_v19 }
 0x1be   : > { %v1223_v25 = vpop.f32.mrf.mxu0  ;;  %1462 = vmatmul.mubr.bf16.gmra.mxu0 %v5722_v16 }
 0x1bf   : > { %v2116_v26 = vpack.c.bf16 %v1999_v22, %v1998_v21  ;;  %1471 = vmatprep.mubr.bf16.mxu0 %v8273_v5  ;;  %v1781_v29 = vadd.f32 %v6361_v0, %v1223_v25 }
 0x1c0   : > { %v6487_v27 = vpop.f32.mrf.mxu0 }
 0x1c1   : > { %5256 = vmatprep.mubr.bf16.mxu1 %v2116_v26  ;;  %v2000_v37 = vmul.f32 %v6458_v40, %v1781_v29 }
 0x1c2   : > { %v1227_v30 = vpop.f32.mrf.mxu0 }
 0x1c3   : > { %v1782_v34 = vadd.f32 %v6361_v0, %v1227_v30  ;;  %v5726_v30 = vld [vmem:[%s6272_s23 + $0x138] sm:$0xff]  }
 0x1c4   : > { %v6492_v36 = vpop.f32.mrf.mxu0 }
 0x1c5   : > { %v2001_v39 = vmul.f32 %v6458_v40, %v1782_v34 }
 0x1c6   : > { %v1233_v41 = vpop.f32.mrf.mxu0  ;;  %1472 = vmatmul.mubr.bf16.gmra.mxu0 %v5723_v32 }
 0x1c7   : > { %v2117_v3 = vpack.c.bf16 %v2001_v39, %v2000_v37  ;;  %1481 = vmatprep.mubr.bf16.mxu0 %v8273_v5  ;;  %v1783_v45 = vadd.f32 %v6361_v0, %v1233_v41 }
 0x1c8   : > { %v6497_v42 = vpop.f32.mrf.mxu0 }
 0x1c9   : > { %5257 = vmatmul.mubr.bf16.gmra.mxu1 %v2117_v3  ;;  %v2002_v52 = vmul.f32 %v6458_v40, %v1783_v45 }
 0x1ca   : > { %v1237_v46 = vpop.f32.mrf.mxu0 }
 0x1cb   : > { %v1784_v49 = vadd.f32 %v6361_v0, %v1237_v46 }
 0x1cc   : > { %v6502_v50 = vpop.f32.mrf.mxu0 }
 0x1cd   : > { %v2003_v56 = vmul.f32 %v6458_v40, %v1784_v49  ;;  %v5727_v49 = vld [vmem:[%s6272_s23 + $0x140] sm:$0xff]  }
 0x1ce   : > { %v1243_v60 = vpop.f32.mrf.mxu0  ;;  %1482 = vmatmul.mubr.bf16.gmra.mxu0 %v5724_v47 }
 0x1cf   : > { %v2118_v63 = vpack.c.bf16 %v2003_v56, %v2002_v52  ;;  %1491 = vmatprep.mubr.bf16.mxu0 %v8273_v5  ;;  %v1785_v7 = vadd.f32 %v6361_v0, %v1243_v60 }
 0x1d0   : > { %v6507_v6 = vpop.f32.mrf.mxu0 }
 0x1d1   : > { %5260 = vmatprep.mubr.bf16.mxu1 %v2118_v63  ;;  %v2004_v16 = vmul.f32 %v6458_v40, %v1785_v7  ;;  %v1934_v7 = vcombine.high %v6353_v61, %v6353_v61 }
 0x1d2   : > { %v1247_v9 = vpop.f32.mrf.mxu0 }
 0x1d3   : > { %v1786_v14 = vadd.f32 %v6361_v0, %v1247_v9 }
 0x1d4   : > { %v6512_v15 = vpop.f32.mrf.mxu0 }
 0x1d5   : > { %v2005_v19 = vmul.f32 %v6458_v40, %v1786_v14 }
 0x1d6   : > { %v1253_v21 = vpop.f32.mrf.mxu0  ;;  %1492 = vmatmul.mubr.bf16.gmra.mxu0 %v5725_v10 }
 0x1d7   : > { %v2119_v22 = vpack.c.bf16 %v2005_v19, %v2004_v16  ;;  %1501 = vmatprep.mubr.bf16.mxu0 %v8273_v5  ;;  %v1787_v26 = vadd.f32 %v6361_v0, %v1253_v21  ;;  %v6543_v19 = vrot.slane %v1934_v7, %v6356_v62 }
 0x1d8   : > { %v6517_v25 = vpop.f32.mrf.mxu0 }
 0x1d9   : > { %5261 = vmatmul.mubr.bf16.gmra.mxu1 %v2119_v22  ;;  %v2006_v37 = vmul.f32 %v6458_v40, %v1787_v26  ;;  %v5728_v22 = vld [vmem:[%s6272_s23 + $0x148] sm:$0xff]  }
 0x1da   : > { %v1257_v29 = vpop.f32.mrf.mxu0 }
 0x1db   : > { %v1788_v32 = vadd.f32 %v6361_v0, %v1257_v29 }
 0x1dc   : > { %v6522_v34 = vpop.f32.mrf.mxu0 }
 0x1dd   : > { %v2007_v39 = vmul.f32 %v6458_v40, %v1788_v32 }
 0x1de   : > { %v1263_v41 = vpop.f32.mrf.mxu0  ;;  %1502 = vmatmul.mubr.bf16.gmra.mxu0 %v5726_v30 }
 0x1df   : > { %v2120_v3 = vpack.c.bf16 %v2007_v39, %v2006_v37  ;;  %1511 = vmatprep.mubr.bf16.mxu0 %v8273_v5  ;;  %v1789_v46 = vadd.f32 %v6361_v0, %v1263_v41 }
 0x1e0   : > { %v6527_v45 = vpop.f32.mrf.mxu0 }
 0x1e1   : > { %5264 = vmatprep.mubr.bf16.mxu1 %v2120_v3  ;;  %v2008_v60 = vmul.f32 %v6458_v40, %v1789_v46  ;;  %v5729_v3 = vld [vmem:[%s6272_s23 + $0x150] sm:$0xff]  }
 0x1e2   : > { %v1267_v47 = vpop.f32.mrf.mxu0 }
 0x1e3   : > { %v1790_v52 = vadd.f32 %v6361_v0, %v1267_v47 }
 0x1e4   : > { %v6532_v56 = vpop.f32.mrf.mxu0 }
 0x1e5   : > { %v2009_v63 = vmul.f32 %v6458_v40, %v1790_v52 }
 0x1e6   : > { %v1273_v9 = vpop.f32.mrf.mxu0  ;;  %1512 = vmatmul.mubr.bf16.gmra.mxu0 %v5727_v49 }
 0x1e7   : > { %v2121_v10 = vpack.c.bf16 %v2009_v63, %v2008_v60  ;;  %1521 = vmatprep.mubr.bf16.mxu0 %v8273_v5  ;;  %v1791_v16 = vadd.f32 %v6361_v0, %v1273_v9 }
 0x1e8   : > { %v6539_v14 = vpop.f32.mrf.mxu0 }
 0x1e9   : > { %5265 = vmatmul.mubr.bf16.gmra.mxu1 %v2121_v10  ;;  %v2010_v61 = vmul.f32 %v6543_v19, %v1791_v16  ;;  %v5730_v16 = vld [vmem:[%s6272_s23 + $0x158] sm:$0xff]  }
 0x1ea   : > { %v1277_v21 = vpop.f32.mrf.mxu0 }
 0x1eb   : > { %v1792_v40 = vadd.f32 %v6361_v0, %v1277_v21 }
 0x1ec   : > { %v6547_v26 = vpop.f32.mrf.mxu0 }
 0x1ed   : > { %v2011_v29 = vmul.f32 %v6543_v19, %v1792_v40 }
 0x1ee   : > { %v1283_v30 = vpop.f32.mrf.mxu0  ;;  %1522 = vmatmul.mubr.bf16.gmra.mxu0 %v5728_v22 }
 0x1ef   : > { %v2122_v32 = vpack.c.bf16 %v2011_v29, %v2010_v61  ;;  %1531 = vmatprep.mubr.bf16.mxu0 %v8273_v5  ;;  %v1793_v39 = vadd.f32 %v6361_v0, %v1283_v30 }
 0x1f0   : > { %v6552_v37 = vpop.f32.mrf.mxu0 }
 0x1f1   : > { %5268 = vmatprep.mubr.bf16.mxu1 %v2122_v32  ;;  %v2012_v49 = vmul.f32 %v6543_v19, %v1793_v39 }
 0x1f2   : > { %v1287_v41 = vpop.f32.mrf.mxu0 }
 0x1f3   : > { %v1794_v46 = vadd.f32 %v6361_v0, %v1287_v41 }
 0x1f4   : > { %v6557_v47 = vpop.f32.mrf.mxu0 }
 0x1f5   : > { %v2013_v52 = vmul.f32 %v6543_v19, %v1794_v46 }
 0x1f6   : > { %v1293_v60 = vpop.f32.mrf.mxu0  ;;  %1532 = vmatmul.mubr.bf16.gmra.mxu0 %v5729_v3  ;;  %v5731_v3 = vld [vmem:[%s6272_s23 + $0x160] sm:$0xff]  }
 0x1f7   : > { %v2123_v63 = vpack.c.bf16 %v2013_v52, %v2012_v49  ;;  %1541 = vmatprep.mubr.bf16.mxu0 %v8273_v5  ;;  %v1795_v9 = vadd.f32 %v6361_v0, %v1293_v60 }
 0x1f8   : > { %v6562_v7 = vpop.f32.mrf.mxu0 }
 0x1f9   : > { %5269 = vmatmul.mubr.bf16.gmra.mxu1 %v2123_v63  ;;  %v2014_v40 = vmul.f32 %v6543_v19, %v1795_v9 }
 0x1fa   : > { %v1297_v10 = vpop.f32.mrf.mxu0 }
 0x1fb   : > { %v1796_v21 = vadd.f32 %v6361_v0, %v1297_v10 }
 0x1fc   : > { %v6567_v22 = vpop.f32.mrf.mxu0 }
 0x1fd   : > { %8302 = vst [vmem:[#allocation29_spill] sm:$0xff] %v6567_v22  ;;  %v2015_v61 = vmul.f32 %v6543_v19, %v1796_v21 }
 0x1fe   : > { %v1303_v29 = vpop.f32.mrf.mxu0  ;;  %1542 = vmatmul.mubr.bf16.gmra.mxu0 %v5730_v16 }
 0x1ff   : > { %v2124_v30 = vpack.c.bf16 %v2015_v61, %v2014_v40  ;;  %1551 = vmatprep.mubr.bf16.mxu0 %v8273_v5  ;;  %v1797_v39 = vadd.f32 %v6361_v0, %v1303_v29  ;;  %v5732_v40 = vld [vmem:[%s6272_s23 + $0x168] sm:$0xff]  }
 0x200   : > { %v6572_v32 = vpop.f32.mrf.mxu0 }
 0x201   : > { %5272 = vmatprep.mubr.bf16.mxu1 %v2124_v30  ;;  %v2016_v52 = vmul.f32 %v6543_v19, %v1797_v39 }
 0x202   : > { %v1307_v41 = vpop.f32.mrf.mxu0 }
 0x203   : > { %v1798_v46 = vadd.f32 %v6361_v0, %v1307_v41 }
 0x204   : > { %v6577_v49 = vpop.f32.mrf.mxu0 }
 0x205   : > { %v2017_v60 = vmul.f32 %v6543_v19, %v1798_v46 }
 0x206   : > { %v1313_v63 = vpop.f32.mrf.mxu0  ;;  %1552 = vmatmul.mubr.bf16.gmra.mxu0 %v5731_v3 }
 0x207   : > { %v2125_v9 = vpack.c.bf16 %v2017_v60, %v2016_v52  ;;  %1561 = vmatprep.mubr.bf16.mxu0 %v8273_v5  ;;  %v1799_v16 = vadd.f32 %v6361_v0, %v1313_v63  ;;  %v5733_v63 = vld [vmem:[%s6272_s23 + $0x170] sm:$0xff]  }
 0x208   : > { %v6582_v10 = vpop.f32.mrf.mxu0 }
 0x209   : > { %8303 = vst [vmem:[#allocation30_spill] sm:$0xff] %v6582_v10  ;;  %5273 = vmatmul.mubr.bf16.gmra.mxu1 %v2125_v9  ;;  %v2018_v30 = vmul.f32 %v6543_v19, %v1799_v16 }
 0x20a   : > { %v1317_v21 = vpop.f32.mrf.mxu0 }
 0x20b   : > { %v1800_v61 = vadd.f32 %v6361_v0, %v1317_v21 }
 0x20c   : > { %v6587_v29 = vpop.f32.mrf.mxu0 }
 0x20d   : > { %8304 = vst [vmem:[#allocation31_spill] sm:$0xff] %v6587_v29  ;;  %v2019_v39 = vmul.f32 %v6543_v19, %v1800_v61 }
 0x20e   : > { %v1323_v41 = vpop.f32.mrf.mxu0  ;;  %1562 = vmatmul.mubr.bf16.gmra.mxu0 %v5732_v40 }
 0x20f   : > { %v2126_v3 = vpack.c.bf16 %v2019_v39, %v2018_v30  ;;  %1571 = vmatprep.mubr.bf16.mxu0 %v8273_v5  ;;  %v1801_v52 = vadd.f32 %v6361_v0, %v1323_v41 }
 0x210   : > { %v6592_v46 = vpop.f32.mrf.mxu0 }
 0x211   : > { %8305 = vst [vmem:[#allocation32_spill] sm:$0xff] %v6592_v46  ;;  %5276 = vmatprep.mubr.bf16.mxu1 %v2126_v3  ;;  %v2020_v16 = vmul.f32 %v6543_v19, %v1801_v52 }
 0x212   : > { %v1327_v60 = vpop.f32.mrf.mxu0 }
 0x213   : > { %v1802_v9 = vadd.f32 %v6361_v0, %v1327_v60 }
 0x214   : > { %v6597_v21 = vpop.f32.mrf.mxu0 }
 0x215   : > { %8306 = vst [vmem:[#allocation33_spill] sm:$0xff] %v6597_v21  ;;  %v2021_v61 = vmul.f32 %v6543_v19, %v1802_v9 }
 0x216   : > { %v1333_v40 = vpop.f32.mrf.mxu0  ;;  %1572 = vmatmul.mubr.bf16.gmra.mxu0 %v5733_v63 }
 0x217   : > { %v2127_v30 = vpack.c.bf16 %v2021_v61, %v2020_v16  ;;  %1581 = vmatprep.mubr.bf16.mxu0 %v8273_v5  ;;  %v1803_v41 = vadd.f32 %v6361_v0, %v1333_v40 }
 0x218   : > { %v6602_v39 = vpop.f32.mrf.mxu0 }
 0x219   : > { %8307 = vst [vmem:[#allocation34_spill] sm:$0xff] %v6602_v39  ;;  %5277 = vmatmul.mubr.bf16.gmra.mxu1 %v2127_v30  ;;  %v2022_v52 = vmul.f32 %v6543_v19, %v1803_v41  ;;  %v5735_v39 = vld [vmem:[%s6272_s23 + $0x180] sm:$0xff]  }
 0x21a   : > { %v1337_v3 = vpop.f32.mrf.mxu0 }
 0x21b   : > { %v1804_v60 = vadd.f32 %v6361_v0, %v1337_v3 }
 0x21c   : > { %v6607_v55 = vpop.f32.mrf.mxu0 }
 0x21d   : > { %8308 = vst [vmem:[#allocation35_spill] sm:$0xff] %v6607_v55  ;;  %v2023_v9 = vmul.f32 %v6543_v19, %v1804_v60 }
 0x21e   : > { %v1343_v63 = vpop.f32.mrf.mxu0  ;;  %1582 = vmatmul.mubr.bf16.gmra.mxu0 %v5734_v53  ;;  %v1936_v53 = vcombine.high %v6450_v35, %v6450_v35 }
 0x21f   : > { %v2128_v16 = vpack.c.bf16 %v2023_v9, %v2022_v52  ;;  %1591 = vmatprep.mubr.bf16.mxu0 %v8273_v5  ;;  %v1805_v40 = vadd.f32 %v6361_v0, %v1343_v63 }
 0x220   : > { %v6612_v61 = vpop.f32.mrf.mxu0 }
 0x221   : > { %8309 = vst [vmem:[#allocation36_spill] sm:$0xff] %v6612_v61  ;;  %5280 = vmatprep.mubr.bf16.mxu1 %v2128_v16  ;;  %v2024_v41 = vmul.f32 %v6543_v19, %v1805_v40 }
 0x222   : > { %v1347_v30 = vpop.f32.mrf.mxu0 }
 0x223   : > { %v1806_v3 = vadd.f32 %v6361_v0, %v1347_v30  ;;  %v6628_v30 = vrot.slane %v1936_v53, %v6356_v62 }
 0x224   : > { %v6617_v55 = vpop.f32.mrf.mxu0 }
 0x225   : > { %8310 = vst [vmem:[#allocation37_spill] sm:$0xff] %v6617_v55  ;;  %v2025_v60 = vmul.f32 %v6543_v19, %v1806_v3  ;;  %v5736_v55 = vld [vmem:[%s6272_s23 + $0x188] sm:$0xff]  }
 0x226   : > { %v1353_v52 = vpop.f32.mrf.mxu0  ;;  %1592 = vmatmul.mubr.bf16.gmra.mxu0 %v5735_v39 }
 0x227   : > { %v2129_v9 = vpack.c.bf16 %v2025_v60, %v2024_v41  ;;  %1601 = vmatprep.mubr.bf16.mxu0 %v8273_v5  ;;  %v1807_v16 = vadd.f32 %v6361_v0, %v1353_v52  ;;  %v6637_v52 = vld.sshfl [vmem:[#allocation9] sm:$0xff pattern:$0x75316420] }
 0x228   : > { %v6624_v63 = vpop.f32.mrf.mxu0 }
 0x229   : > { %8311 = vst [vmem:[#allocation38_spill] sm:$0xff] %v6624_v63  ;;  %5281 = vmatmul.mubr.bf16.gmra.mxu1 %v2129_v9  ;;  %v2026_v35 = vmul.f32 %v6628_v30, %v1807_v16 }
 0x22a   : > { %v1357_v40 = vpop.f32.mrf.mxu0 }
 0x22b   : > { %v1808_v19 = vadd.f32 %v6361_v0, %v1357_v40  ;;  %v5737_v40 = vld [vmem:[%s6272_s23 + $0x190] sm:$0xff]  }
 0x22c   : > { %v6632_v3 = vpop.f32.mrf.mxu0 }
 0x22d   : > { %8312 = vst [vmem:[#allocation39_spill] sm:$0xff] %v6632_v3  ;;  %v2027_v39 = vmul.f32 %v6628_v30, %v1808_v19 }
 0x22e   : > { %v1363_v41 = vpop.f32.mrf.mxu0  ;;  %1602 = vmatmul.mubr.bf16.gmra.mxu0 %v5736_v55 }
 0x22f   : > { %v2130_v60 = vpack.c.bf16 %v2027_v39, %v2026_v35  ;;  %1611 = vmatprep.mubr.bf16.mxu0 %v8273_v5  ;;  %v1809_v9 = vadd.f32 %v6361_v0, %v1363_v41  ;;  %v6650_v39 = vrot.slane %v6637_v52, %v6341_v57  ;;  %v8315_v41 = vmov 0  }
 0x230   : > { %v6639_v53 = vpop.f32.mrf.mxu0 }
 0x231   : > { %8313 = vst [vmem:[#allocation40_spill] sm:$0xff] %v6639_v53  ;;  %5284 = vmatprep.mubr.bf16.mxu1 %v2130_v60  ;;  %v2028_v19 = vmul.f32 %v6628_v30, %v1809_v9  ;;  %v6659_v9 = vld [vmem:[%s8263_s7] ss:$0 sm:$0xff] }
 0x232   : > { %v1367_v63 = vpop.f32.mrf.mxu0 }
 0x233   : > { %v1810_v3 = vadd.f32 %v6361_v0, %v1367_v63 }
 0x234   : > { %v6644_v16 = vpop.f32.mrf.mxu0 }
 0x235   : > { %8314 = vst [vmem:[#allocation41_spill] sm:$0xff] %v6644_v16  ;;  %v2029_v55 = vmul.f32 %v6628_v30, %v1810_v3  ;;  %v5738_v16 = vld [vmem:[%s6272_s23 + $0x198] sm:$0xff]  }
 0x236   : > { %v1373_v35 = vpop.f32.mrf.mxu0  ;;  %1612 = vmatmul.mubr.bf16.gmra.mxu0 %v5737_v40 }
 0x237   : > { %v2131_v5 = vpack.c.bf16 %v2029_v55, %v2028_v19  ;;  %1621 = vmatprep.mubr.bf16.mxu0 %v8315_v41  ;;  %v1811_v63 = vadd.f32 %v6361_v0, %v1373_v35  ;;  %v6665_v19 = vrot.slane %v6650_v39, %v6356_v62 }
 0x238   : > { %v6653_v60 = vpop.f32.mrf.mxu0 }
 0x239   : > { %8316 = vst [vmem:[#allocation42_spill] sm:$0xff] %v6653_v60  ;;  %v5238_v53 = vpop.f32.mrf.mxu1  ;;  %5285 = vmatmul.mubr.bf16.gmra.mxu1 %v2131_v5  ;;  %v2030_v29 = vmul.f32 %v6628_v30, %v1811_v63 }
 0x23a   : > { %v2277_v3 = vadd.f32 %v5238_v53, %v6378_v13  ;;  %v1377_v40 = vpop.f32.mrf.mxu0 }
 0x23b   : > { %v1812_v55 = vadd.f32 %v6361_v0, %v1377_v40  ;;  %v2268_v60 = vpop.f32.mrf.mxu1 }
 0x23c   : > { %v2269_v35 = vadd.f32 %v2268_v60, %v6364_v1  ;;  %v6669_v61 = vpop.f32.mrf.mxu0  ;;  %v2788_v5 = vadd.f32 %v6659_v9, %v2277_v3 }
 0x23d   : > { %v2031_v21 = vmul.f32 %v6628_v30, %v1812_v55  ;;  %v5239_v13 = vpop.f32.mrf.mxu1 }
 0x23e   : > { %v2786_v53 = vadd.f32 %v6659_v9, %v2269_v35  ;;  %v2280_v10 = vadd.f32 %v5239_v13, %v6383_v18  ;;  %v1383_v46 = vpop.f32.mrf.mxu0  ;;  %1622 = vmatmul.mubr.bf16.gmra.mxu0 %v5738_v16  ;;  %v3007_v40 = vmul.f32 %v6665_v19, %v2788_v5  ;;  %v5740_v16 = vld [vmem:[%s6272_s23 + $0x1a0] sm:$0xff]  }
 0x23f   : > { %v2271_v22 = vpop.f32.mrf.mxu1  ;;  %v2132_v1 = vpack.c.bf16 %v2031_v21, %v2030_v29  ;;  %1631 = vmatprep.mubr.bf16.mxu0 %v8315_v41  ;;  %v1813_v63 = vadd.f32 %v6361_v0, %v1383_v46 }
 0x240   : > { %3137 = vadd.xlane.f32.xlu0 %v3007_v40  ;;  %v6678_v60 = vpop.f32.mrf.mxu0  ;;  %v2789_v3 = vadd.f32 %v6659_v9, %v2280_v10  ;;  %v2272_v55 = vadd.f32 %v2271_v22, %v6373_v8  ;;  %v3005_v18 = vmul.f32 %v6665_v19, %v2786_v53 }
 0x241   : > { %5288 = vmatprep.mubr.bf16.mxu1 %v2132_v1  ;;  %v2032_v21 = vmul.f32 %v6628_v30, %v1813_v63 }
 0x242   : > { %v1387_v35 = vpop.f32.mrf.mxu0  ;;  %v3008_v10 = vmul.f32 %v6665_v19, %v2789_v3  ;;  %v2787_v8 = vadd.f32 %v6659_v9, %v2272_v55 }
 0x243   : > { %v1814_v5 = vadd.f32 %v6361_v0, %v1387_v35 }
 0x244   : > { %3133 = vadd.xlane.f32.xlu0 %v3005_v18  ;;  %v6686_v29 = vpop.f32.mrf.mxu0  ;;  %v3006_v18 = vmul.f32 %v6665_v19, %v2787_v8 }
 0x245   : > { %v2033_v13 = vmul.f32 %v6628_v30, %v1814_v5 }
 0x246   : > { %v1393_v46 = vpop.f32.mrf.mxu0  ;;  %1632 = vmatmul.mubr.bf16.gmra.mxu0 %v5740_v16  ;;  %v5741_v16 = vld [vmem:[%s6272_s23 + $0x1a8] sm:$0xff]  }
 0x247   : > { %v2133_v22 = vpack.c.bf16 %v2033_v13, %v2032_v21  ;;  %1641 = vmatprep.mubr.bf16.mxu0 %v8315_v41  ;;  %v1815_v40 = vadd.f32 %v6361_v0, %v1393_v46 }
 0x248   : > { %3139 = vadd.xlane.f32.xlu0 %v3008_v10  ;;  %v6693_v53 = vpop.f32.mrf.mxu0 }
 0x249   : > { %8317 = vst [vmem:[#allocation43_spill] sm:$0xff] %v6693_v53  ;;  %v5242_v1 = vpop.f32.mrf.mxu1  ;;  %5289 = vmatmul.mubr.bf16.gmra.mxu1 %v2133_v22  ;;  %v2034_v46 = vmul.f32 %v6628_v30, %v1815_v40 }
 0x24a   : > { %v2293_v63 = vadd.f32 %v5242_v1, %v6398_v33  ;;  %v1397_v35 = vpop.f32.mrf.mxu0 }
 0x24b   : > { %v1816_v3 = vadd.f32 %v6361_v0, %v1397_v35  ;;  %v2284_v5 = vpop.f32.mrf.mxu1 }
 0x24c   : > { %v2792_v55 = vadd.f32 %v6659_v9, %v2293_v63  ;;  %v2285_v21 = vadd.f32 %v2284_v5, %v6388_v23  ;;  %3135 = vadd.xlane.f32.xlu0 %v3006_v18  ;;  %v6702_v13 = vpop.f32.mrf.mxu0 }
 0x24d   : > { %v2035_v10 = vmul.f32 %v6628_v30, %v1816_v3  ;;  %v5243_v22 = vpop.f32.mrf.mxu1 }
 0x24e   : > { %v2790_v33 = vadd.f32 %v6659_v9, %v2285_v21  ;;  %v2296_v8 = vadd.f32 %v5243_v22, %v6403_v38  ;;  %v1403_v1 = vpop.f32.mrf.mxu0  ;;  %1642 = vmatmul.mubr.bf16.gmra.mxu0 %v5741_v16  ;;  %v3011_v35 = vmul.f32 %v6665_v19, %v2792_v55  ;;  %v5742_v21 = vld [vmem:[%s6272_s23 + $0x1b0] sm:$0xff]  }
 0x24f   : > { %v2287_v63 = vpop.f32.mrf.mxu1  ;;  %v2134_v53 = vpack.c.bf16 %v2035_v10, %v2034_v46  ;;  %1651 = vmatprep.mubr.bf16.mxu0 %v8315_v41  ;;  %v1817_v38 = vadd.f32 %v6361_v0, %v1403_v1 }
 0x250   : > { %v2793_v23 = vadd.f32 %v6659_v9, %v2296_v8  ;;  %v2288_v40 = vadd.f32 %v2287_v63, %v6393_v28  ;;  %3145 = vadd.xlane.f32.xlu0 %v3011_v35  ;;  %v6712_v18 = vpop.f32.mrf.mxu0  ;;  %v3009_v3 = vmul.f32 %v6665_v19, %v2790_v33 }
 0x251   : > { %5292 = vmatprep.mubr.bf16.mxu1 %v2134_v53  ;;  %v2036_v22 = vmul.f32 %v6628_v30, %v1817_v38 }
 0x252   : > { %3141 = vadd.xlane.f32.xlu1 %v3009_v3  ;;  %v1407_v16 = vpop.f32.mrf.mxu0  ;;  %v3012_v5 = vmul.f32 %v6665_v19, %v2793_v23  ;;  %v2791_v55 = vadd.f32 %v6659_v9, %v2288_v40  ;;  %v5743_v3 = vld [vmem:[%s6272_s23 + $0x1b8] sm:$0xff]  }
 0x253   : > { %v1818_v46 = vadd.f32 %v6361_v0, %v1407_v16 }
 0x254   : > { %3147 = vadd.xlane.f32.xlu0 %v3012_v5  ;;  %v6720_v28 = vpop.f32.mrf.mxu0  ;;  %v3010_v10 = vmul.f32 %v6665_v19, %v2791_v55 }
 0x255   : > { %v2037_v33 = vmul.f32 %v6628_v30, %v1818_v46 }
 0x256   : > { %3143 = vadd.xlane.f32.xlu1 %v3010_v10  ;;  %v1413_v53 = vpop.f32.mrf.mxu0  ;;  %1652 = vmatmul.mubr.bf16.gmra.mxu0 %v5742_v21 }
 0x257   : > { %v2135_v8 = vpack.c.bf16 %v2037_v33, %v2036_v22  ;;  %1661 = vmatprep.mubr.bf16.mxu0 %v8315_v41  ;;  %v1819_v35 = vadd.f32 %v6361_v0, %v1413_v53  ;;  %v1889_v33 = vcombine.high %v6343_v58, %v6343_v58 }
 0x258   : > { %v6726_v1 = vpop.f32.mrf.mxu0 }
 0x259   : > { %v5246_v63 = vpop.f32.mrf.mxu1  ;;  %5293 = vmatmul.mubr.bf16.gmra.mxu1 %v2135_v8  ;;  %v2038_v46 = vmul.f32 %v6628_v30, %v1819_v35 }
 0x25a   : > { %v2309_v23 = vadd.f32 %v5246_v63, %v6418_v54  ;;  %v1417_v40 = vpop.f32.mrf.mxu0 }
 0x25b   : > { %v1820_v38 = vadd.f32 %v6361_v0, %v1417_v40  ;;  %v2300_v16 = vpop.f32.mrf.mxu1 }
 0x25c   : > { %v2796_v5 = vadd.f32 %v6659_v9, %v2309_v23  ;;  %v2301_v55 = vadd.f32 %v2300_v16, %v6408_v43  ;;  %v6734_v21 = vpop.f32.mrf.mxu0 }
 0x25d   : > { %v2039_v10 = vmul.f32 %v6628_v30, %v1820_v38  ;;  %v5247_v22 = vpop.f32.mrf.mxu1 }
 0x25e   : > { %v2794_v54 = vadd.f32 %v6659_v9, %v2301_v55  ;;  %v2312_v53 = vadd.f32 %v5247_v22, %v6423_v4  ;;  %v1423_v8 = vpop.f32.mrf.mxu0  ;;  %1662 = vmatmul.mubr.bf16.gmra.mxu0 %v5743_v3  ;;  %v3015_v63 = vmul.f32 %v6665_v19, %v2796_v5  ;;  %v6751_v3 = vrot.slane %v1889_v33, %v6341_v57 }
 0x25f   : > { %v2303_v43 = vpop.f32.mrf.mxu1  ;;  %v2136_v23 = vpack.c.bf16 %v2039_v10, %v2038_v46  ;;  %1671 = vmatprep.mubr.bf16.mxu0 %v8315_v41  ;;  %v1821_v4 = vadd.f32 %v6361_v0, %v1423_v8  ;;  %v5745_v46 = vld [vmem:[%s6272_s23 + $0x1c0] sm:$0xff]  }
 0x260   : > { %v2797_v35 = vadd.f32 %v6659_v9, %v2312_v53  ;;  %v2304_v40 = vadd.f32 %v2303_v43, %v6413_v48  ;;  %3153 = vadd.xlane.f32.xlu0 %v3015_v63  ;;  %v6746_v38 = vpop.f32.mrf.mxu0  ;;  %v3013_v58 = vmul.f32 %v6665_v19, %v2794_v54  ;;  %v6764_v33 = vrot.slane %v6751_v3, %v6341_v57 }
 0x261   : > { %5296 = vmatprep.mubr.bf16.mxu1 %v2136_v23  ;;  %v2040_v54 = vmul.f32 %v6628_v30, %v1821_v4 }
 0x262   : > { %3149 = vadd.xlane.f32.xlu1 %v3013_v58  ;;  %v1427_v16 = vpop.f32.mrf.mxu0  ;;  %v2795_v5 = vadd.f32 %v6659_v9, %v2304_v40  ;;  %v3016_v22 = vmul.f32 %v6665_v19, %v2797_v35  ;;  %v6772_v35 = vrot.slane %v6764_v33, %v6356_v62 }
 0x263   : > { %v1822_v55 = vadd.f32 %v6361_v0, %v1427_v16 }
 0x264   : > { %v6756_v10 = vpop.f32.mrf.mxu0  ;;  %v3014_v48 = vmul.f32 %v6665_v19, %v2795_v5  ;;  %v5746_v5 = vld [vmem:[%s6272_s23 + $0x1c8] sm:$0xff]  }
 0x265   : > { %v2041_v53 = vmul.f32 %v6628_v30, %v1822_v55 }
 0x266   : > { %3151 = vadd.xlane.f32.xlu0 %v3014_v48  ;;  %3155 = vadd.xlane.f32.xlu1 %v3016_v22  ;;  %v1433_v8 = vpop.f32.mrf.mxu0 }
 0x267   : > { %1672 = vmatmul.mubr.bf16.gmra.mxu0 %v5745_v46  ;;  %v2137_v63 = vpack.c.bf16 %v2041_v53, %v2040_v54  ;;  %v1823_v23 = vadd.f32 %v6361_v0, %v1433_v8 }
 0x268   : > { %v6766_v43 = vpop.f32.mrf.mxu0  ;;  %1681 = vmatprep.mubr.bf16.mxu0 %v8315_v41 }
 0x269   : > { %v5250_v30 = vpop.f32.mrf.mxu1  ;;  %5297 = vmatmul.mubr.bf16.gmra.mxu1 %v2137_v63  ;;  %v2042_v22 = vmul.f32 %v6772_v35, %v1823_v23  ;;  %v6792_v23 = vld [vmem:[%s8262_s6] ss:$0 sm:$0xff] }
 0x26a   : > { %v2325_v40 = vadd.f32 %v5250_v30, %v6438_v24  ;;  %v1437_v58 = vpop.f32.mrf.mxu0 }
 0x26b   : > { %v1824_v4 = vadd.f32 %v6361_v0, %v1437_v58  ;;  %v2316_v16 = vpop.f32.mrf.mxu1 }
 0x26c   : > { %v2800_v55 = vadd.f32 %v6659_v9, %v2325_v40  ;;  %v2317_v46 = vadd.f32 %v2316_v16, %v6428_v11  ;;  %v6779_v48 = vpop.f32.mrf.mxu0 }
 0x26d   : > { %v2043_v54 = vmul.f32 %v6772_v35, %v1824_v4  ;;  %v5251_v53 = vpop.f32.mrf.mxu1 }
 0x26e   : > { %v2798_v8 = vadd.f32 %v6659_v9, %v2317_v46  ;;  %v2328_v24 = vadd.f32 %v5251_v53, %v6445_v31  ;;  %v1443_v63 = vpop.f32.mrf.mxu0  ;;  %v3019_v0 = vmul.f32 %v6665_v19, %v2800_v55  ;;  %v2931_v55 = vcombine.high %v6637_v52, %v6637_v52 }
 0x26f   : > { %1682 = vmatmul.mubr.bf16.gmra.mxu0 %v5746_v5  ;;  %v2319_v30 = vpop.f32.mrf.mxu1  ;;  %v2138_v40 = vpack.c.bf16 %v2043_v54, %v2042_v22  ;;  %v1825_v58 = vadd.f32 %v6792_v23, %v1443_v63  ;;  %v5747_v22 = vld [vmem:[%s6272_s23 + $0x1d0] sm:$0xff]  }
 0x270   : > { %3161 = vadd.xlane.f32.xlu1 %v3019_v0  ;;  %v6786_v11 = vpop.f32.mrf.mxu0  ;;  %1691 = vmatprep.mubr.bf16.mxu0 %v8315_v41  ;;  %v2801_v31 = vadd.f32 %v6659_v9, %v2328_v24  ;;  %v2320_v4 = vadd.f32 %v2319_v30, %v6433_v17  ;;  %v3017_v5 = vmul.f32 %v6665_v19, %v2798_v8 }
 0x271   : > { %5300 = vmatprep.mubr.bf16.mxu1 %v2138_v40  ;;  %v2044_v53 = vmul.f32 %v6772_v35, %v1825_v58  ;;  %v6809_v8 = vrot.slane %v2931_v55, %v6341_v57 }
 0x272   : > { %v1447_v16 = vpop.f32.mrf.mxu0  ;;  %v3020_v24 = vmul.f32 %v6665_v19, %v2801_v31  ;;  %v2799_v17 = vadd.f32 %v6659_v9, %v2320_v4 }
 0x273   : > { %v1826_v46 = vadd.f32 %v6792_v23, %v1447_v16 }
 0x274   : > { %3157 = vadd.xlane.f32.xlu1 %v3017_v5  ;;  %v6802_v54 = vpop.f32.mrf.mxu0  ;;  %v3018_v4 = vmul.f32 %v6665_v19, %v2799_v17  ;;  %v6819_v5 = vrot.slane %v6809_v8, %v6356_v62 }
 0x275   : > { %v2045_v63 = vmul.f32 %v6772_v35, %v1826_v46 }
 0x276   : > { %v1453_v0 = vpop.f32.mrf.mxu0 }
 0x277   : > { %1692 = vmatmul.mubr.bf16.gmra.mxu0 %v5747_v22  ;;  %v2139_v52 = vpack.c.bf16 %v2045_v63, %v2044_v53  ;;  %v1827_v40 = vadd.f32 %v6792_v23, %v1453_v0  ;;  %v5748_v22 = vld [vmem:[%s6272_s23 + $0x1d8] sm:$0xff]  }
 0x278   : > { %3163 = vadd.xlane.f32.xlu1 %v3020_v24  ;;  %v6811_v30 = vpop.f32.mrf.mxu0  ;;  %1701 = vmatprep.mubr.bf16.mxu0 %v8315_v41 }
 0x279   : > { %8318 = vst [vmem:[#allocation44_spill] sm:$0xff] %v6811_v30  ;;  %v5254_v58 = vpop.f32.mrf.mxu1  ;;  %5301 = vmatmul.mubr.bf16.gmra.mxu1 %v2139_v52 }
 0x27a   : > { %v2341_v16 = vadd.f32 %v5254_v58, %v6467_v51  ;;  %v1457_v31 = vpop.f32.mrf.mxu0  ;;  %v2046_v51 = vmul.f32 %v6772_v35, %v1827_v40 }
 0x27b   : > { %v1828_v55 = vadd.f32 %v6792_v23, %v1457_v31  ;;  %v2332_v46 = vpop.f32.mrf.mxu1 }
 0x27c   : > { %v2804_v53 = vadd.f32 %v6659_v9, %v2341_v16  ;;  %v2333_v63 = vadd.f32 %v2332_v46, %v6453_v59  ;;  %3159 = vadd.xlane.f32.xlu1 %v3018_v4  ;;  %v6825_v0 = vpop.f32.mrf.mxu0 }
 0x27d   : > { %v2047_v24 = vmul.f32 %v6772_v35, %v1828_v55  ;;  %v5255_v19 = vpop.f32.mrf.mxu1 }
 0x27e   : > { %v2802_v17 = vadd.f32 %v6659_v9, %v2333_v63  ;;  %v2344_v52 = vadd.f32 %v5255_v19, %v6472_v2  ;;  %v1463_v58 = vpop.f32.mrf.mxu0  ;;  %v3023_v31 = vmul.f32 %v6819_v5, %v2804_v53 }
 0x27f   : > { %1702 = vmatmul.mubr.bf16.gmra.mxu0 %v5748_v22  ;;  %v2335_v16 = vpop.f32.mrf.mxu1  ;;  %v2140_v30 = vpack.c.bf16 %v2047_v24, %v2046_v51  ;;  %v1829_v40 = vadd.f32 %v6792_v23, %v1463_v58  ;;  %v5749_v22 = vld [vmem:[%s6272_s23 + $0x1e0] sm:$0xff]  }
 0x280   : > { %3169 = vadd.xlane.f32.xlu1 %v3023_v31  ;;  %v6832_v59 = vpop.f32.mrf.mxu0  ;;  %1711 = vmatprep.mubr.bf16.mxu0 %v8315_v41  ;;  %v2805_v4 = vadd.f32 %v6659_v9, %v2344_v52  ;;  %v2336_v55 = vadd.f32 %v2335_v16, %v6462_v44  ;;  %v3021_v46 = vmul.f32 %v6819_v5, %v2802_v17 }
 0x281   : > { %5304 = vmatprep.mubr.bf16.mxu1 %v2140_v30  ;;  %v2048_v51 = vmul.f32 %v6772_v35, %v1829_v40 }
 0x282   : > { %v1467_v2 = vpop.f32.mrf.mxu0  ;;  %v3024_v30 = vmul.f32 %v6819_v5, %v2805_v4  ;;  %v2803_v52 = vadd.f32 %v6659_v9, %v2336_v55  ;;  %v5750_v55 = vld [vmem:[%s6272_s23 + $0x1e8] sm:$0xff]  }
 0x283   : > { %v1830_v53 = vadd.f32 %v6792_v23, %v1467_v2 }
 0x284   : > { %3165 = vadd.xlane.f32.xlu1 %v3021_v46  ;;  %v6841_v63 = vpop.f32.mrf.mxu0  ;;  %v3022_v2 = vmul.f32 %v6819_v5, %v2803_v52 }
 0x285   : > { %v2049_v24 = vmul.f32 %v6772_v35, %v1830_v53 }
 0x286   : > { %v1473_v19 = vpop.f32.mrf.mxu0 }
 0x287   : > { %1712 = vmatmul.mubr.bf16.gmra.mxu0 %v5749_v22  ;;  %v2141_v44 = vpack.c.bf16 %v2049_v24, %v2048_v51  ;;  %v1831_v58 = vadd.f32 %v6792_v23, %v1473_v19 }
 0x288   : > { %3171 = vadd.xlane.f32.xlu1 %v3024_v30  ;;  %v6847_v17 = vpop.f32.mrf.mxu0  ;;  %1721 = vmatprep.mubr.bf16.mxu0 %v8315_v41 }
 0x289   : > { %v5258_v31 = vpop.f32.mrf.mxu1  ;;  %5305 = vmatmul.mubr.bf16.gmra.mxu1 %v2141_v44  ;;  %v2050_v24 = vmul.f32 %v6772_v35, %v1831_v58 }
 0x28a   : > { %v2357_v16 = vadd.f32 %v5258_v31, %v6487_v27  ;;  %v1477_v40 = vpop.f32.mrf.mxu0 }
 0x28b   : > { %v1832_v4 = vadd.f32 %v6792_v23, %v1477_v40  ;;  %v2348_v46 = vpop.f32.mrf.mxu1 }
 0x28c   : > { %v2808_v53 = vadd.f32 %v6659_v9, %v2357_v16  ;;  %v2349_v22 = vadd.f32 %v2348_v46, %v6477_v12  ;;  %3167 = vadd.xlane.f32.xlu1 %v3022_v2  ;;  %v6857_v51 = vpop.f32.mrf.mxu0 }
 0x28d   : > { %v2051_v19 = vmul.f32 %v6772_v35, %v1832_v4  ;;  %v5259_v30 = vpop.f32.mrf.mxu1 }
 0x28e   : > { %v2806_v27 = vadd.f32 %v6659_v9, %v2349_v22  ;;  %v2360_v52 = vadd.f32 %v5259_v30, %v6492_v36  ;;  %v1483_v44 = vpop.f32.mrf.mxu0  ;;  %v3027_v31 = vmul.f32 %v6819_v5, %v2808_v53 }
 0x28f   : > { %1722 = vmatmul.mubr.bf16.gmra.mxu0 %v5750_v55  ;;  %v2351_v16 = vpop.f32.mrf.mxu1  ;;  %v2142_v40 = vpack.c.bf16 %v2051_v19, %v2050_v24  ;;  %v1833_v36 = vadd.f32 %v6792_v23, %v1483_v44  ;;  %v5751_v24 = vld [vmem:[%s6272_s23 + $0x1f0] sm:$0xff]  }
 0x290   : > { %v2809_v12 = vadd.f32 %v6659_v9, %v2360_v52  ;;  %v2352_v2 = vadd.f32 %v2351_v16, %v6482_v20  ;;  %3177 = vadd.xlane.f32.xlu1 %v3027_v31  ;;  %v6866_v58 = vpop.f32.mrf.mxu0  ;;  %v3025_v4 = vmul.f32 %v6819_v5, %v2806_v27  ;;  %1731 = vmatprep.mubr.bf16.mxu0 %v8315_v41 }
 0x291   : > { %5308 = vmatprep.mubr.bf16.mxu1 %v2142_v40  ;;  %v2052_v30 = vmul.f32 %v6772_v35, %v1833_v36 }
 0x292   : > { %3173 = vadd.xlane.f32.xlu0 %v3025_v4  ;;  %v1487_v46 = vpop.f32.mrf.mxu0  ;;  %v3028_v55 = vmul.f32 %v6819_v5, %v2809_v12  ;;  %v2807_v53 = vadd.f32 %v6659_v9, %v2352_v2 }
 0x293   : > { %v1834_v22 = vadd.f32 %v6792_v23, %v1487_v46  ;;  %v5752_v46 = vld [vmem:[%s6272_s23 + $0x1f8] sm:$0xff]  }
 0x294   : > { %3179 = vadd.xlane.f32.xlu1 %v3028_v55  ;;  %v6875_v20 = vpop.f32.mrf.mxu0  ;;  %v3026_v19 = vmul.f32 %v6819_v5, %v2807_v53 }
 0x295   : > { %v2053_v27 = vmul.f32 %v6772_v35, %v1834_v22 }
 0x296   : > { %3175 = vadd.xlane.f32.xlu0 %v3026_v19  ;;  %v1493_v52 = vpop.f32.mrf.mxu0 }
 0x297   : > { %1732 = vmatmul.mubr.bf16.gmra.mxu0 %v5751_v24  ;;  %v2143_v44 = vpack.c.bf16 %v2053_v27, %v2052_v30  ;;  %v1835_v16 = vadd.f32 %v6792_v23, %v1493_v52 }
 0x298   : > { %v6880_v31 = vpop.f32.mrf.mxu0  ;;  %1741 = vmatprep.mubr.bf16.mxu0 %v8315_v41 }
 0x299   : > { %v5262_v40 = vpop.f32.mrf.mxu1  ;;  %5309 = vmatmul.mubr.bf16.gmra.mxu1 %v2143_v44  ;;  %v2054_v24 = vmul.f32 %v6772_v35, %v1835_v16  ;;  %v1905_v16 = vcombine.high %v6751_v3, %v6751_v3 }
 0x29a   : > { %v2373_v12 = vadd.f32 %v5262_v40, %v6507_v6  ;;  %v1497_v2 = vpop.f32.mrf.mxu0 }
 0x29b   : > { %v1836_v4 = vadd.f32 %v6792_v23, %v1497_v2  ;;  %v2364_v36 = vpop.f32.mrf.mxu1 }
 0x29c   : > { %v2812_v55 = vadd.f32 %v6659_v9, %v2373_v12  ;;  %v2365_v53 = vadd.f32 %v2364_v36, %v6497_v42  ;;  %v6889_v22 = vpop.f32.mrf.mxu0 }
 0x29d   : > { %8319 = vst [vmem:[#allocation45_spill] sm:$0xff] %v6889_v22  ;;  %v2055_v41 = vmul.f32 %v6772_v35, %v1836_v4  ;;  %v5263_v19 = vpop.f32.mrf.mxu1 }
 0x29e   : > { %v2810_v30 = vadd.f32 %v6659_v9, %v2365_v53  ;;  %v2376_v6 = vadd.f32 %v5263_v19, %v6512_v15  ;;  %v1503_v27 = vpop.f32.mrf.mxu0  ;;  %v3031_v52 = vmul.f32 %v6819_v5, %v2812_v55 }
 0x29f   : > { %1742 = vmatmul.mubr.bf16.gmra.mxu0 %v5752_v46  ;;  %v2367_v44 = vpop.f32.mrf.mxu1  ;;  %v2144_v40 = vpack.c.bf16 %v2055_v41, %v2054_v24  ;;  %v1837_v42 = vadd.f32 %v6792_v23, %v1503_v27  ;;  %v6910_v41 = vrot.slane %v1905_v16, %v6341_v57 }
 0x2a0   : > { %3185 = vadd.xlane.f32.xlu0 %v3031_v52  ;;  %v6896_v12 = vpop.f32.mrf.mxu0  ;;  %v2813_v2 = vadd.f32 %v6659_v9, %v2376_v6  ;;  %v2368_v4 = vadd.f32 %v2367_v44, %v6502_v50  ;;  %v3029_v36 = vmul.f32 %v6819_v5, %v2810_v30 }
 0x2a1   : > { %5312 = vmatprep.mubr.bf16.mxu1 %v2144_v40  ;;  %v2056_v53 = vmul.f32 %v6772_v35, %v1837_v42  ;;  %v6919_v52 = vrot.slane %v6910_v41, %v6356_v62 }
 0x2a2   : > { %v1507_v15 = vpop.f32.mrf.mxu0  ;;  %v3032_v19 = vmul.f32 %v6819_v5, %v2813_v2  ;;  %v2811_v50 = vadd.f32 %v6659_v9, %v2368_v4 }
 0x2a3   : > { %v1838_v46 = vadd.f32 %v6792_v23, %v1507_v15 }
 0x2a4   : > { %3181 = vadd.xlane.f32.xlu0 %v3029_v36  ;;  %v6905_v55 = vpop.f32.mrf.mxu0  ;;  %v3030_v42 = vmul.f32 %v6819_v5, %v2811_v50 }
 0x2a5   : > { %8320 = vst [vmem:[#allocation46_spill] sm:$0xff] %v6905_v55  ;;  %v2057_v24 = vmul.f32 %v6772_v35, %v1838_v46 }
 0x2a6   : > { %v1513_v3 = vpop.f32.mrf.mxu0 }
 0x2a7   : > { %v2145_v6 = vpack.c.bf16 %v2057_v24, %v2056_v53  ;;  %v1839_v27 = vadd.f32 %v6792_v23, %v1513_v3 }
 0x2a8   : > { %3187 = vadd.xlane.f32.xlu0 %v3032_v19  ;;  %v6914_v30 = vpop.f32.mrf.mxu0 }
 0x2a9   : > { %8321 = vst [vmem:[#allocation47_spill] sm:$0xff] %v6914_v30  ;;  %v5266_v44 = vpop.f32.mrf.mxu1  ;;  %5313 = vmatmul.mubr.bf16.gmra.mxu1 %v2145_v6  ;;  %v2058_v46 = vmul.f32 %v6919_v52, %v1839_v27 }
 0x2aa   : > { %v2389_v35 = vadd.f32 %v5266_v44, %v6527_v45  ;;  %v1517_v40 = vpop.f32.mrf.mxu0 }
 0x2ab   : > { %v1840_v16 = vadd.f32 %v6792_v23, %v1517_v40  ;;  %v2380_v2 = vpop.f32.mrf.mxu1 }
 0x2ac   : > { %v2816_v4 = vadd.f32 %v6659_v9, %v2389_v35  ;;  %v2381_v15 = vadd.f32 %v2380_v2, %v6517_v25  ;;  %3183 = vadd.xlane.f32.xlu0 %v3030_v42  ;;  %v6926_v36 = vpop.f32.mrf.mxu0 }
 0x2ad   : > { %8322 = vst [vmem:[#allocation48_spill] sm:$0xff] %v6926_v36  ;;  %v2059_v53 = vmul.f32 %v6919_v52, %v1840_v16  ;;  %v5267_v24 = vpop.f32.mrf.mxu1  ;;  %v8367_v36 = vlaneseq }
 0x2ae   : > { %v2814_v45 = vadd.f32 %v6659_v9, %v2381_v15  ;;  %v2392_v3 = vadd.f32 %v5267_v24, %v6532_v56  ;;  %v1523_v19 = vpop.f32.mrf.mxu0  ;;  %v3035_v50 = vmul.f32 %v6819_v5, %v2816_v4 }
 0x2af   : > { %v2383_v6 = vpop.f32.mrf.mxu1  ;;  %v2146_v44 = vpack.c.bf16 %v2059_v53, %v2058_v46  ;;  %v1841_v25 = vadd.f32 %v6792_v23, %v1523_v19 }
 0x2b0   : > { %3193 = vadd.xlane.f32.xlu0 %v3035_v50  ;;  %v6933_v35 = vpop.f32.mrf.mxu0  ;;  %v2817_v27 = vadd.f32 %v6659_v9, %v2392_v3  ;;  %v2384_v40 = vadd.f32 %v2383_v6, %v6522_v34  ;;  %v3033_v16 = vmul.f32 %v6819_v5, %v2814_v45  ;;  %v2961_v34 = vcombine.high %v6650_v39, %v6650_v39 }
 0x2b1   : > { %8323 = vst [vmem:[#allocation49_spill] sm:$0xff] %v6933_v35  ;;  %5316 = vmatprep.mubr.bf16.mxu1 %v2146_v44  ;;  %v2060_v4 = vmul.f32 %v6919_v52, %v1841_v25 }
 0x2b2   : > { %v1527_v42 = vpop.f32.mrf.mxu0  ;;  %v3036_v53 = vmul.f32 %v6819_v5, %v2817_v27  ;;  %v2815_v24 = vadd.f32 %v6659_v9, %v2384_v40  ;;  %v6954_v27 = vrot.slane %v2961_v34, %v6356_v62 }
 0x2b3   : > { %v1842_v56 = vadd.f32 %v6792_v23, %v1527_v42 }
 0x2b4   : > { %3189 = vadd.xlane.f32.xlu0 %v3033_v16  ;;  %v6940_v2 = vpop.f32.mrf.mxu0  ;;  %v3034_v25 = vmul.f32 %v6819_v5, %v2815_v24 }
 0x2b5   : > { %8324 = vst [vmem:[#allocation50_spill] sm:$0xff] %v6940_v2  ;;  %v2061_v15 = vmul.f32 %v6919_v52, %v1842_v56  ;;  %v7150_v2 = vand.u32 127, %v8367_v36 }
 0x2b6   : > { %v1533_v46 = vpop.f32.mrf.mxu0 }
 0x2b7   : > { %v2147_v3 = vpack.c.bf16 %v2061_v15, %v2060_v4  ;;  %v1843_v19 = vadd.f32 %v6792_v23, %v1533_v46  ;;  %v3665_v36 = vadd.s32 4294967288, %v7150_v2 }
 0x2b8   : > { %3195 = vadd.xlane.f32.xlu0 %v3036_v53  ;;  %v6948_v45 = vpop.f32.mrf.mxu0 }
 0x2b9   : > { %8325 = vst [vmem:[#allocation51_spill] sm:$0xff] %v6948_v45  ;;  %v5270_v50 = vpop.f32.mrf.mxu1  ;;  %5317 = vmatmul.mubr.bf16.gmra.mxu1 %v2147_v3  ;;  %v2062_v4 = vmul.f32 %v6919_v52, %v1843_v19 }
 0x2ba   : > { %v2405_v6 = vadd.f32 %v5270_v50, %v6552_v37  ;;  %v1537_v44 = vpop.f32.mrf.mxu0 }
 0x2bb   : > { %v1844_v40 = vadd.f32 %v6792_v23, %v1537_v44  ;;  %v2396_v42 = vpop.f32.mrf.mxu1 }
 0x2bc   : > { %v2820_v39 = vadd.f32 %v6659_v9, %v2405_v6  ;;  %v2397_v16 = vadd.f32 %v2396_v42, %v6539_v14  ;;  %3191 = vadd.xlane.f32.xlu0 %v3034_v25  ;;  %v6959_v56 = vpop.f32.mrf.mxu0 }
 0x2bd   : > { %8326 = vst [vmem:[#allocation52_spill] sm:$0xff] %v6959_v56  ;;  %v2063_v37 = vmul.f32 %v6919_v52, %v1844_v40  ;;  %v5271_v15 = vpop.f32.mrf.mxu1 }
 0x2be   : > { %v2818_v5 = vadd.f32 %v6659_v9, %v2397_v16  ;;  %v2408_v46 = vadd.f32 %v5271_v15, %v6557_v47  ;;  %v1543_v53 = vpop.f32.mrf.mxu0  ;;  %v3039_v24 = vmul.f32 %v6954_v27, %v2820_v39 }
 0x2bf   : > { %v2399_v34 = vpop.f32.mrf.mxu1  ;;  %v2148_v3 = vpack.c.bf16 %v2063_v37, %v2062_v4  ;;  %v1845_v19 = vadd.f32 %v6792_v23, %v1543_v53 }
 0x2c0   : > { %v2821_v50 = vadd.f32 %v6659_v9, %v2408_v46  ;;  %v2400_v14 = vadd.f32 %v2399_v34, %v6547_v26  ;;  %3201 = vadd.xlane.f32.xlu0 %v3039_v24  ;;  %v6968_v6 = vpop.f32.mrf.mxu0  ;;  %v3037_v25 = vmul.f32 %v6954_v27, %v2818_v5 }
 0x2c1   : > { %8327 = vst [vmem:[#allocation53_spill] sm:$0xff] %v6968_v6  ;;  %5320 = vmatprep.mubr.bf16.mxu1 %v2148_v3  ;;  %v2064_v26 = vmul.f32 %v6919_v52, %v1845_v19 }
 0x2c2   : > { %v1547_v44 = vpop.f32.mrf.mxu0  ;;  %v3040_v47 = vmul.f32 %v6954_v27, %v2821_v50  ;;  %v2819_v40 = vadd.f32 %v6659_v9, %v2400_v14 }
 0x2c3   : > { %v1846_v42 = vadd.f32 %v6792_v23, %v1547_v44 }
 0x2c4   : > { %3197 = vadd.xlane.f32.xlu0 %v3037_v25  ;;  %3203 = vadd.xlane.f32.xlu1 %v3040_v47  ;;  %v6975_v39 = vpop.f32.mrf.mxu0  ;;  %v3038_v37 = vmul.f32 %v6954_v27, %v2819_v40 }
 0x2c5   : > { %8328 = vst [vmem:[#allocation54_spill] sm:$0xff] %v6975_v39  ;;  %v2065_v16 = vmul.f32 %v6919_v52, %v1846_v42 }
 0x2c6   : > { %v1553_v4 = vpop.f32.mrf.mxu0 }
 0x2c7   : > { %v2149_v15 = vpack.c.bf16 %v2065_v16, %v2064_v26  ;;  %v1847_v46 = vadd.f32 %v6792_v23, %v1553_v4 }
 0x2c8   : > { %3199 = vadd.xlane.f32.xlu1 %v3038_v37  ;;  %v6980_v5 = vpop.f32.mrf.mxu0 }
 0x2c9   : > { %8329 = vst [vmem:[#allocation55_spill] sm:$0xff] %v6980_v5  ;;  %v5274_v53 = vpop.f32.mrf.mxu1  ;;  %5321 = vmatmul.mubr.bf16.gmra.mxu1 %v2149_v15  ;;  %v2066_v25 = vmul.f32 %v6919_v52, %v1847_v46 }
 0x2ca   : > { %v2421_v24 = vadd.f32 %v5274_v53, %v6572_v32  ;;  %v1557_v34 = vpop.f32.mrf.mxu0  ;;  %v8331_v53 = vld [vmem:[#allocation29_spill] sm:$0xff] }
 0x2cb   : > { %v1848_v3 = vadd.f32 %v6792_v23, %v1557_v34  ;;  %v2412_v50 = vpop.f32.mrf.mxu1 }
 0x2cc   : > { %v2824_v14 = vadd.f32 %v6659_v9, %v2421_v24  ;;  %v2413_v19 = vadd.f32 %v2412_v50, %v6562_v7  ;;  %v6987_v44 = vpop.f32.mrf.mxu0 }
 0x2cd   : > { %8330 = vst [vmem:[#allocation56_spill] sm:$0xff] %v6987_v44  ;;  %v2067_v47 = vmul.f32 %v6919_v52, %v1848_v3  ;;  %v5275_v40 = vpop.f32.mrf.mxu1 }
 0x2ce   : > { %v2822_v42 = vadd.f32 %v6659_v9, %v2413_v19  ;;  %v2424_v26 = vadd.f32 %v5275_v40, %v6577_v49  ;;  %v1563_v32 = vpop.f32.mrf.mxu0  ;;  %v3043_v16 = vmul.f32 %v6954_v27, %v2824_v14 }
 0x2cf   : > { %v2415_v4 = vpop.f32.mrf.mxu1  ;;  %v2150_v37 = vpack.c.bf16 %v2067_v47, %v2066_v25  ;;  %v1849_v34 = vadd.f32 %v6792_v23, %v1563_v32 }
 0x2d0   : > { %v2825_v15 = vadd.f32 %v6659_v9, %v2424_v26  ;;  %v2416_v7 = vadd.f32 %v2415_v4, %v8331_v53  ;;  %3209 = vadd.xlane.f32.xlu0 %v3043_v16  ;;  %v6996_v24 = vpop.f32.mrf.mxu0  ;;  %v3041_v46 = vmul.f32 %v6954_v27, %v2822_v42 }
 0x2d1   : > { %8332 = vst [vmem:[#allocation29_spill] sm:$0xff] %v6996_v24  ;;  %5324 = vmatprep.mubr.bf16.mxu1 %v2150_v37  ;;  %v2068_v47 = vmul.f32 %v6919_v52, %v1849_v34  ;;  %v8335_v37 = vld [vmem:[#allocation32_spill] sm:$0xff] }
 0x2d2   : > { %3205 = vadd.xlane.f32.xlu1 %v3041_v46  ;;  %v1567_v3 = vpop.f32.mrf.mxu0  ;;  %v2823_v49 = vadd.f32 %v6659_v9, %v2416_v7  ;;  %v3044_v25 = vmul.f32 %v6954_v27, %v2825_v15 }
 0x2d3   : > { %v1850_v50 = vadd.f32 %v6792_v23, %v1567_v3 }
 0x2d4   : > { %v7002_v14 = vpop.f32.mrf.mxu0  ;;  %v3042_v19 = vmul.f32 %v6954_v27, %v2823_v49 }
 0x2d5   : > { %8333 = vst [vmem:[#allocation57_spill] sm:$0xff] %v7002_v14  ;;  %v2069_v40 = vmul.f32 %v6919_v52, %v1850_v50 }
 0x2d6   : > { %3207 = vadd.xlane.f32.xlu0 %v3042_v19  ;;  %3211 = vadd.xlane.f32.xlu1 %v3044_v25  ;;  %v1573_v42 = vpop.f32.mrf.mxu0  ;;  %v8337_v19 = vld [vmem:[#allocation30_spill] sm:$0xff] }
 0x2d7   : > { %v2151_v26 = vpack.c.bf16 %v2069_v40, %v2068_v47  ;;  %v1851_v16 = vadd.f32 %v6792_v23, %v1573_v42  ;;  %v8338_v40 = vld [vmem:[#allocation33_spill] sm:$0xff] }
 0x2d8   : > { %v7008_v32 = vpop.f32.mrf.mxu0 }
 0x2d9   : > { %8334 = vst [vmem:[#allocation58_spill] sm:$0xff] %v7008_v32  ;;  %v5278_v4 = vpop.f32.mrf.mxu1  ;;  %5325 = vmatmul.mubr.bf16.gmra.mxu1 %v2151_v26  ;;  %v2070_v49 = vmul.f32 %v6919_v52, %v1851_v16  ;;  %v7025_v16 = vpop.permute.xlu1 %3396 }
 0x2da   : > { %v2437_v53 = vadd.f32 %v5278_v4, %v8335_v37  ;;  %v1577_v7 = vpop.f32.mrf.mxu0 }
 0x2db   : > { %v1852_v46 = vadd.f32 %v6792_v23, %v1577_v7  ;;  %v2428_v15 = vpop.f32.mrf.mxu1 }
 0x2dc   : > { %v2828_v34 = vadd.f32 %v6659_v9, %v2437_v53  ;;  %v7014_v3 = vpop.f32.mrf.mxu0  ;;  %v2429_v25 = vadd.f32 %v2428_v15, %v8337_v19  ;;  %v8340_v15 = vld [vmem:[#allocation31_spill] sm:$0xff] }
 0x2dd   : > { %8336 = vst [vmem:[#allocation32_spill] sm:$0xff] %v7014_v3  ;;  %v2071_v50 = vmul.f32 %v6919_v52, %v1852_v46  ;;  %v5279_v47 = vpop.f32.mrf.mxu1 }
 0x2de   : > { %v2440_v42 = vadd.f32 %v5279_v47, %v8338_v40  ;;  %v1583_v26 = vpop.f32.mrf.mxu0  ;;  %v3047_v4 = vmul.f32 %v6954_v27, %v2828_v34  ;;  %v2826_v37 = vadd.f32 %v6659_v9, %v2429_v25 }
 0x2df   : > { %v2431_v7 = vpop.f32.mrf.mxu1  ;;  %v2152_v32 = vpack.c.bf16 %v2071_v50, %v2070_v49  ;;  %v1853_v46 = vadd.f32 %v6792_v23, %v1583_v26 }
 0x2e0   : > { %v2829_v53 = vadd.f32 %v6659_v9, %v2440_v42  ;;  %3217 = vadd.xlane.f32.xlu1 %v3047_v4  ;;  %v7023_v3 = vpop.f32.mrf.mxu0  ;;  %v2432_v19 = vadd.f32 %v2431_v7, %v8340_v15  ;;  %v3045_v47 = vmul.f32 %v6954_v27, %v2826_v37  ;;  %v7035_v42 = vpop.xlane.xlu1 %3141  ;;  %v1935_v37 = vcombine.high %v6764_v33, %v6764_v33 }
 0x2e1   : > { %8339 = vst [vmem:[#allocation30_spill] sm:$0xff] %v7023_v3  ;;  %5328 = vmatprep.mubr.bf16.mxu1 %v2152_v32  ;;  %v2072_v26 = vmul.f32 %v6919_v52, %v1853_v46  ;;  %v8343_v46 = vld [vmem:[#allocation36_spill] sm:$0xff] }
 0x2e2   : > { %v1587_v40 = vpop.f32.mrf.mxu0  ;;  %v3048_v34 = vmul.f32 %v6954_v27, %v2829_v53  ;;  %3213 = vadd.xlane.f32.xlu0 %v3045_v47  ;;  %v2827_v50 = vadd.f32 %v6659_v9, %v2432_v19  ;;  %v7046_v47 = vrot.slane %v1935_v37, %v6356_v62 }
 0x2e3   : > { %v1854_v49 = vadd.f32 %v6792_v23, %v1587_v40 }
 0x2e4   : > { %3219 = vadd.xlane.f32.xlu1 %v3048_v34  ;;  %v7033_v25 = vpop.f32.mrf.mxu0  ;;  %v3046_v32 = vmul.f32 %v6954_v27, %v2827_v50 }
 0x2e5   : > { %8341 = vst [vmem:[#allocation33_spill] sm:$0xff] %v7033_v25  ;;  %v2073_v4 = vmul.f32 %v6919_v52, %v1854_v49  ;;  %v7049_v49 = vpop.xlane.xlu1 %3143 }
 0x2e6   : > { %v1593_v7 = vpop.f32.mrf.mxu0  ;;  %3215 = vadd.xlane.f32.xlu0 %v3046_v32 }
 0x2e7   : > { %v2153_v53 = vpack.c.bf16 %v2073_v4, %v2072_v26  ;;  %v1855_v19 = vadd.f32 %v6792_v23, %v1593_v7  ;;  %v8344_v26 = vld [vmem:[#allocation34_spill] sm:$0xff] }
 0x2e8   : > { %v7042_v15 = vpop.f32.mrf.mxu0 }
 0x2e9   : > { %8342 = vst [vmem:[#allocation31_spill] sm:$0xff] %v7042_v15  ;;  %v5282_v40 = vpop.f32.mrf.mxu1  ;;  %5329 = vmatmul.mubr.bf16.gmra.mxu1 %v2153_v53  ;;  %v2074_v7 = vmul.f32 %v7046_v47, %v1855_v19 }
 0x2ea   : > { %v2453_v34 = vadd.f32 %v5282_v40, %v8343_v46  ;;  %v1597_v52 = vpop.f32.mrf.mxu0  ;;  %v8346_v40 = vld [vmem:[#allocation37_spill] sm:$0xff] }
 0x2eb   : > { %v1856_v50 = vadd.f32 %v6792_v23, %v1597_v52  ;;  %v2444_v33 = vpop.f32.mrf.mxu1  ;;  %v7061_v52 = vpop.xlane.xlu0 %3137 }
 0x2ec   : > { %v2832_v32 = vadd.f32 %v6659_v9, %v2453_v34  ;;  %v2445_v4 = vadd.f32 %v2444_v33, %v8344_v26  ;;  %v7054_v15 = vpop.f32.mrf.mxu0  ;;  %v7063_v14 = vpop.xlane.xlu1 %3149 }
 0x2ed   : > { %8345 = vst [vmem:[#allocation36_spill] sm:$0xff] %v7054_v15  ;;  %v2075_v37 = vmul.f32 %v7046_v47, %v1856_v50  ;;  %v5283_v25 = vpop.f32.mrf.mxu1  ;;  %8347 = vst [vmem:[#allocation34_spill] sm:$0xff] %v7063_v14  ;;  %v8349_v50 = vld [vmem:[#allocation35_spill] sm:$0xff] }
 0x2ee   : > { %v2830_v53 = vadd.f32 %v6659_v9, %v2445_v4  ;;  %v2456_v46 = vadd.f32 %v5283_v25, %v8346_v40  ;;  %v1603_v3 = vpop.f32.mrf.mxu0  ;;  %v3051_v44 = vmul.f32 %v6954_v27, %v2832_v32  ;;  %v7071_v9 = vld [vmem:[%s8263_s7] ss:$0 sm:$0xff] }
 0x2ef   : > { %v2154_v34 = vpack.c.bf16 %v2075_v37, %v2074_v7  ;;  %v2447_v33 = vpop.f32.mrf.mxu1  ;;  %v1857_v19 = vadd.f32 %v6792_v23, %v1603_v3  ;;  %v7083_v15 = vpop.xlane.xlu0 %3133 }
 0x2f0   : > { %3225 = vadd.xlane.f32.xlu1 %v3051_v44  ;;  %v7065_v26 = vpop.f32.mrf.mxu0  ;;  %v2833_v25 = vadd.f32 %v7071_v9, %v2456_v46  ;;  %v2448_v32 = vadd.f32 %v2447_v33, %v8349_v50  ;;  %v3049_v40 = vmul.f32 %v6954_v27, %v2830_v53  ;;  %v7080_v37 = vpop.xlane.xlu1 %3155  ;;  %v2963_v53 = vcombine.high %v6809_v8, %v6809_v8 }
 0x2f1   : > { %8348 = vst [vmem:[#allocation37_spill] sm:$0xff] %v7065_v26  ;;  %5332 = vmatprep.mubr.bf16.mxu1 %v2154_v34  ;;  %v2076_v3 = vmul.f32 %v7046_v47, %v1857_v19  ;;  %8351 = vst [vmem:[#allocation59_spill] sm:$0xff] %v7080_v37 }
 0x2f2   : > { %v1607_v4 = vpop.f32.mrf.mxu0  ;;  %v3052_v46 = vmul.f32 %v6954_v27, %v2833_v25  ;;  %v2831_v33 = vadd.f32 %v7071_v9, %v2448_v32  ;;  %v7097_v32 = vrot.slane %v2963_v53, %v6356_v62 }
 0x2f3   : > { %v1858_v7 = vadd.f32 %v6792_v23, %v1607_v4 }
 0x2f4   : > { %3221 = vadd.xlane.f32.xlu1 %v3049_v40  ;;  %v7077_v44 = vpop.f32.mrf.mxu0  ;;  %v3050_v25 = vmul.f32 %v6954_v27, %v2831_v33 }
 0x2f5   : > { %8350 = vst [vmem:[#allocation35_spill] sm:$0xff] %v7077_v44  ;;  %v2077_v34 = vmul.f32 %v7046_v47, %v1858_v7  ;;  %v8354_v7 = vld [vmem:[#allocation40_spill] sm:$0xff] }
 0x2f6   : > { %v1613_v26 = vpop.f32.mrf.mxu0 }
 0x2f7   : > { %v2155_v50 = vpack.c.bf16 %v2077_v34, %v2076_v3  ;;  %v1859_v19 = vadd.f32 %v6792_v23, %v1613_v26  ;;  %v7100_v34 = vpop.xlane.xlu0 %3139  ;;  %v8355_v26 = vld [vmem:[#allocation38_spill] sm:$0xff] }
 0x2f8   : > { %3227 = vadd.xlane.f32.xlu1 %v3052_v46  ;;  %v7089_v4 = vpop.f32.mrf.mxu0 }
 0x2f9   : > { %8352 = vst [vmem:[#allocation60_spill] sm:$0xff] %v7089_v4  ;;  %v7092_v40 = vpop.xlane.xlu1 %3161  ;;  %v5286_v44 = vpop.f32.mrf.mxu1  ;;  %5333 = vmatmul.mubr.bf16.gmra.mxu1 %v2155_v50 }
 0x2fa   : > { %8353 = vst [vmem:[#allocation61_spill] sm:$0xff] %v7092_v40  ;;  %v2469_v5 = vadd.f32 %v5286_v44, %v8354_v7  ;;  %v1617_v24 = vpop.f32.mrf.mxu0  ;;  %v2078_v44 = vmul.f32 %v7046_v47, %v1859_v19 }
 0x2fb   : > { %v1860_v8 = vadd.f32 %v6792_v23, %v1617_v24  ;;  %v2460_v3 = vpop.f32.mrf.mxu1  ;;  %v8358_v24 = vld [vmem:[#allocation41_spill] sm:$0xff] }
 0x2fc   : > { %v2836_v46 = vadd.f32 %v7071_v9, %v2469_v5  ;;  %v2461_v4 = vadd.f32 %v2460_v3, %v8355_v26  ;;  %3223 = vadd.xlane.f32.xlu1 %v3050_v25  ;;  %v7104_v56 = vpop.f32.mrf.mxu0  ;;  %v8359_v3 = vld [vmem:[#allocation39_spill] sm:$0xff] }
 0x2fd   : > { %8356 = vst [vmem:[#allocation40_spill] sm:$0xff] %v7104_v56  ;;  %v2079_v50 = vmul.f32 %v7046_v47, %v1860_v8  ;;  %v7108_v27 = vpop.xlane.xlu1 %3157  ;;  %v5287_v33 = vpop.f32.mrf.mxu1 }
 0x2fe   : > { %8357 = vst [vmem:[#allocation38_spill] sm:$0xff] %v7108_v27  ;;  %v2834_v53 = vadd.f32 %v7071_v9, %v2461_v4  ;;  %v2472_v7 = vadd.f32 %v5287_v33, %v8358_v24  ;;  %v1623_v39 = vpop.f32.mrf.mxu0  ;;  %v3055_v45 = vmul.f32 %v7097_v32, %v2836_v46  ;;  %v7121_v4 = vpop.xlane.xlu0 %3135 }
 0x2ff   : > { %v2463_v5 = vpop.f32.mrf.mxu1  ;;  %v2156_v6 = vpack.c.bf16 %v2079_v50, %v2078_v44  ;;  %v1861_v56 = vadd.f32 %v6792_v23, %v1623_v39 }
 0x300   : > { %v2837_v25 = vadd.f32 %v7071_v9, %v2472_v7  ;;  %v2464_v26 = vadd.f32 %v2463_v5, %v8359_v3  ;;  %3233 = vadd.xlane.f32.xlu0 %v3055_v45  ;;  %v7115_v19 = vpop.f32.mrf.mxu0  ;;  %v3053_v8 = vmul.f32 %v7097_v32, %v2834_v53 }
 0x301   : > { %8360 = vst [vmem:[#allocation41_spill] sm:$0xff] %v7115_v19  ;;  %v7119_v40 = vpop.xlane.xlu1 %3163  ;;  %5336 = vmatprep.mubr.bf16.mxu1 %v2156_v6  ;;  %v2080_v53 = vmul.f32 %v7046_v47, %v1861_v56 }
 0x302   : > { %8361 = vst [vmem:[#allocation39_spill] sm:$0xff] %v7119_v40  ;;  %v2835_v46 = vadd.f32 %v7071_v9, %v2464_v26  ;;  %3229 = vadd.xlane.f32.xlu1 %v3053_v8  ;;  %v1627_v44 = vpop.f32.mrf.mxu0  ;;  %v3056_v50 = vmul.f32 %v7097_v32, %v2837_v25  ;;  %v7133_v3 = vpop.xlane.xlu0 %3145 }
 0x303   : > { %v1862_v33 = vadd.f32 %v6792_v23, %v1627_v44 }
 0x304   : > { %3235 = vadd.xlane.f32.xlu0 %v3056_v50  ;;  %v7126_v45 = vpop.f32.mrf.mxu0  ;;  %v3054_v7 = vmul.f32 %v7097_v32, %v2835_v46  ;;  %v8365_v46 = vld [vmem:[#allocation42_spill] sm:$0xff] }
 0x305   : > { %8362 = vst [vmem:[#allocation62_spill] sm:$0xff] %v7126_v45  ;;  %v2081_v39 = vmul.f32 %v7046_v47, %v1862_v33  ;;  %v7130_v24 = vpop.xlane.xlu1 %3159 }
 0x306   : > { %8363 = vst [vmem:[#allocation63_spill] sm:$0xff] %v7130_v24  ;;  %v1633_v6 = vpop.f32.mrf.mxu0 }
 0x307   : > { %v2157_v5 = vpack.c.bf16 %v2081_v39, %v2080_v53  ;;  %v1863_v25 = vadd.f32 %v6792_v23, %v1633_v6 }
 0x308   : > { %3231 = vadd.xlane.f32.xlu0 %v3054_v7  ;;  %v7135_v26 = vpop.f32.mrf.mxu0 }
 0x309   : > { %8364 = vst [vmem:[#allocation64_spill] sm:$0xff] %v7135_v26  ;;  %v3170_v8 = vpop.xlane.xlu1 %3169  ;;  %v5290_v44 = vpop.f32.mrf.mxu1  ;;  %5337 = vmatmul.mubr.bf16.gmra.mxu1 %v2157_v5  ;;  %v2082_v7 = vmul.f32 %v7046_v47, %v1863_v25 }
 0x30a   : > { %v2485_v56 = vadd.f32 %v5290_v44, %v6678_v60  ;;  %v1637_v50 = vpop.f32.mrf.mxu0 }
 0x30b   : > { %v1864_v33 = vadd.f32 %v6792_v23, %v1637_v50  ;;  %v2476_v45 = vpop.f32.mrf.mxu1 }
 0x30c   : > { %v2840_v19 = vadd.f32 %v7071_v9, %v2485_v56  ;;  %v2477_v53 = vadd.f32 %v2476_v45, %v8365_v46  ;;  %v7142_v39 = vpop.f32.mrf.mxu0  ;;  %v7152_v56 = vpop.xlane.xlu0 %3147 }
 0x30d   : > { %8366 = vst [vmem:[#allocation42_spill] sm:$0xff] %v7142_v39  ;;  %v2083_v26 = vmul.f32 %v7046_v47, %v1864_v33  ;;  %v3166_v6 = vpop.xlane.xlu1 %3165  ;;  %v5291_v40 = vpop.f32.mrf.mxu1  ;;  %8368 = vst [vmem:[#allocation65_spill] sm:$0xff] %v7152_v56 }
 0x30e   : > { %v2838_v5 = vadd.f32 %v7071_v9, %v2477_v53  ;;  %v2488_v60 = vadd.f32 %v5291_v40, %v6686_v29  ;;  %v1643_v44 = vpop.f32.mrf.mxu0  ;;  %v3059_v50 = vmul.f32 %v7097_v32, %v2840_v19 }
 0x30f   : > { %v2479_v45 = vpop.f32.mrf.mxu1  ;;  %v2158_v46 = vpack.c.bf16 %v2083_v26, %v2082_v7  ;;  %v1865_v29 = vadd.f32 %v6792_v23, %v1643_v44  ;;  %v3672_v7 = vadd.s32 4294967280, %v7150_v2  ;;  %v3415_v44 = vadd.f32 %v7025_v16, %v3166_v6 }
 0x310   : > { %v2841_v25 = vadd.f32 %v7071_v9, %v2488_v60  ;;  %v2480_v33 = vadd.f32 %v2479_v45, %v6669_v61  ;;  %3241 = vadd.xlane.f32.xlu0 %v3059_v50  ;;  %v7156_v39 = vpop.f32.mrf.mxu0  ;;  %v3057_v53 = vmul.f32 %v7097_v32, %v2838_v5  ;;  %v7164_v61 = vpop.xlane.xlu0 %3153  ;;  %v3679_v5 = vadd.s32 4294967272, %v7150_v2 }
 0x311   : > { %8369 = vst [vmem:[#allocation66_spill] sm:$0xff] %v7156_v39  ;;  %v3172_v40 = vpop.xlane.xlu1 %3171  ;;  %5340 = vmatprep.mubr.bf16.mxu1 %v2158_v46  ;;  %8370 = vst [vmem:[#allocation67_spill] sm:$0xff] %v7164_v61  ;;  %v3417_v46 = vadd.f32 %v7025_v16, %v3170_v8  ;;  %v8372_v39 = vld [vmem:[#allocation28_spill] sm:$0xff] }
 0x312   : > { %v2839_v19 = vadd.f32 %v7071_v9, %v2480_v33  ;;  %3237 = vadd.xlane.f32.xlu1 %v3057_v53  ;;  %v1647_v24 = vpop.f32.mrf.mxu0  ;;  %v3060_v26 = vmul.f32 %v7097_v32, %v2841_v25  ;;  %v2084_v33 = vmul.f32 %v7046_v47, %v1865_v29  ;;  %v7177_v30 = vsub.s32 %v7150_v2, %v8372_v39 }
 0x313   : > { %v1866_v60 = vadd.f32 %v6792_v23, %v1647_v24  ;;  %v7180_v24 = vsub.s32 %v3665_v36, %v8372_v39  ;;  %v3418_v6 = vadd.f32 %v7025_v16, %v3172_v40  ;;  %v7185_v8 = vsub.s32 %v3672_v7, %v8372_v39 }
 0x314   : > { %3243 = vadd.xlane.f32.xlu0 %v3060_v26  ;;  %v7169_v50 = vpop.f32.mrf.mxu0  ;;  %v3058_v45 = vmul.f32 %v7097_v32, %v2839_v19  ;;  %v3686_v29 = vadd.s32 4294967264, %v7150_v2  ;;  %v7191_v37 = vsub.s32 %v3679_v5, %v8372_v39  ;;  %v3773_v36 = vrot.slane %v3415_v44, %v7177_v30 }
 0x315   : > { %8371 = vst [vmem:[#allocation68_spill] sm:$0xff] %v7169_v50  ;;  %v2085_v25 = vmul.f32 %v7046_v47, %v1866_v60  ;;  %v3168_v53 = vpop.xlane.xlu1 %3167  ;;  %v7188_v60 = vpop.xlane.xlu0 %3151 }
 0x316   : > { %v3416_v26 = vadd.f32 %v7025_v16, %v3168_v53  ;;  %3239 = vadd.xlane.f32.xlu1 %v3058_v45  ;;  %v1653_v19 = vpop.f32.mrf.mxu0  ;;  %8373 = vst [vmem:[#allocation28_spill] sm:$0xff] %v7188_v60  ;;  %v3782_v45 = vrot.slane %v3417_v46, %v7185_v8  ;;  %v3787_v5 = vrot.slane %v3418_v6, %v7191_v37 }
 0x317   : > { %v2159_v50 = vpack.c.bf16 %v2085_v25, %v2084_v33  ;;  %v1867_v7 = vadd.f32 %v6792_v23, %v1653_v19  ;;  %v3700_v33 = vadd.s32 4294967248, %v7150_v2 }
 0x318   : > { %v3777_v27 = vrot.slane %v3416_v26, %v7180_v24  ;;  %v7195_v40 = vpop.f32.mrf.mxu0 }
 0x319   : > { %8374 = vst [vmem:[#allocation69_spill] sm:$0xff] %v7195_v40  ;;  %v3178_v53 = vpop.xlane.xlu1 %3177  ;;  %v5294_v35 = vpop.f32.mrf.mxu1  ;;  %5341 = vmatmul.mubr.bf16.gmra.mxu1 %v2159_v50  ;;  %v7204_v40 = vsub.s32 %v3686_v29, %v8372_v39  ;;  %v3693_v50 = vadd.s32 4294967256, %v7150_v2  ;;  %v2086_v29 = vmul.f32 %v7046_v47, %v1867_v7 }
 0x31a   : > { %v3778_v25 = vsel %vm3670_vm1, %v3777_v27, %v3773_v36  ;;  %v2501_v44 = vadd.f32 %v5294_v35, %v6712_v18  ;;  %v1657_v26 = vpop.f32.mrf.mxu0  ;;  %v3707_v35 = vadd.s32 4294967240, %v7150_v2 }
 0x31b   : > { %v3783_v46 = vsel %vm3677_vm2, %v3782_v45, %v3778_v25  ;;  %v1868_v19 = vadd.f32 %v6792_v23, %v1657_v26  ;;  %v3174_v61 = vpop.xlane.xlu0 %3173  ;;  %v2492_v60 = vpop.f32.mrf.mxu1  ;;  %v8376_v45 = vld [vmem:[#allocation43_spill] sm:$0xff] }
 0x31c   : > { %v2844_v22 = vadd.f32 %v7071_v9, %v2501_v44  ;;  %v3788_v6 = vsel %vm3684_vm3, %v3787_v5, %v3783_v46  ;;  %v3419_v27 = vadd.f32 %v7025_v16, %v3174_v61  ;;  %v7212_v18 = vpop.f32.mrf.mxu0  ;;  %v2493_v23 = vadd.f32 %v2492_v60, %v8376_v45 }
 0x31d   : > { %8375 = vst [vmem:[#allocation70_spill] sm:$0xff] %v7212_v18  ;;  %v2087_v36 = vmul.f32 %v7046_v47, %v1868_v19  ;;  %v3180_v25 = vpop.xlane.xlu1 %3179  ;;  %v5295_v26 = vpop.f32.mrf.mxu1  ;;  %v3421_v5 = vadd.f32 %v7025_v16, %v3178_v53  ;;  %v7224_v19 = vsub.s32 %v3693_v50, %v8372_v39  ;;  %v7234_v53 = vsub.s32 %v3707_v35, %v8372_v39 }
 0x31e   : > { %v2504_v14 = vadd.f32 %v5295_v26, %v6720_v28  ;;  %v1663_v56 = vpop.f32.mrf.mxu0  ;;  %v3063_v44 = vmul.f32 %v7097_v32, %v2844_v22  ;;  %v3792_v61 = vrot.slane %v3419_v27, %v7204_v40  ;;  %v2842_v46 = vadd.f32 %v7071_v9, %v2493_v23  ;;  %v7239_v27 = vld [vmem:[%s8262_s6] ss:$0 sm:$0xff] }
 0x31f   : > { %v3176_v18 = vpop.xlane.xlu0 %3175  ;;  %v2495_v55 = vpop.f32.mrf.mxu1  ;;  %v2160_v7 = vpack.c.bf16 %v2087_v36, %v2086_v29  ;;  %v3422_v60 = vadd.f32 %v7025_v16, %v3180_v25  ;;  %v7231_v22 = vsub.s32 %v3700_v33, %v8372_v39  ;;  %v1869_v50 = vadd.f32 %v7239_v27, %v1663_v56 }
 0x320   : > { %v3420_v45 = vadd.f32 %v7025_v16, %v3176_v18  ;;  %3249 = vadd.xlane.f32.xlu0 %v3063_v44  ;;  %v7228_v28 = vpop.f32.mrf.mxu0  ;;  %v2845_v18 = vadd.f32 %v7071_v9, %v2504_v14  ;;  %v2496_v36 = vadd.f32 %v2495_v55, %v6702_v13  ;;  %v3061_v23 = vmul.f32 %v7097_v32, %v2842_v46 }
 0x321   : > { %5344 = vmatprep.mubr.bf16.mxu1 %v2160_v7  ;;  %v3802_v35 = vrot.slane %v3421_v5, %v7231_v22  ;;  %v3793_v25 = vsel %vm3691_vm4, %v3792_v61, %v3788_v6  ;;  %v3807_v56 = vrot.slane %v3422_v60, %v7234_v53  ;;  %v2088_v13 = vmul.f32 %v7046_v47, %v1869_v50 }
 0x322   : > { %v3797_v29 = vrot.slane %v3420_v45, %v7224_v19  ;;  %v1667_v33 = vpop.f32.mrf.mxu0  ;;  %v2843_v5 = vadd.f32 %v7071_v9, %v2496_v36  ;;  %v1937_v6 = vcombine.high %v6910_v41, %v6910_v41  ;;  %v3064_v61 = vmul.f32 %v7097_v32, %v2845_v18 }
 0x323   : > { %v1870_v26 = vadd.f32 %v7239_v27, %v1667_v33 }
 0x324   : > { %v3798_v44 = vsel %vm3698_vm5, %v3797_v29, %v3793_v25  ;;  %3245 = vadd.xlane.f32.xlu0 %v3061_v23  ;;  %v7251_v14 = vpop.f32.mrf.mxu0  ;;  %v7269_v36 = vrot.slane %v1937_v6, %v6356_v62  ;;  %v3062_v41 = vmul.f32 %v7097_v32, %v2843_v5  ;;  %v5760_v6 = vld [vmem:[#allocation9] sm:$0xff] }
 0x325   : > { %8377 = vst [vmem:[#allocation43_spill] sm:$0xff] %v7251_v14  ;;  %v3803_v55 = vsel %vm3705_vm6, %v3802_v35, %v3798_v44  ;;  %v2089_v46 = vmul.f32 %v7046_v47, %v1870_v26 }
 0x326   : > { %v7261_v7 = vsel %vm3712_vm7, %v3807_v56, %v3803_v55 }
 0x327   : > { %v1673_v60 = vpop.f32.mrf.mxu0  ;;  %v2161_v45 = vpack.c.bf16 %v2089_v46, %v2088_v13 }
 0x328   : > { %3251 = vadd.xlane.f32.xlu0 %v3064_v61  ;;  %v1871_v47 = vadd.f32 %v7239_v27, %v1673_v60 }
 0x329   : > { %v7263_v29 = vpop.f32.mrf.mxu0  ;;  %v7265_v50 = vpop.xlane.xlu0 %3185  ;;  %5345 = vmatmul.mubr.bf16.gmra.mxu1 %v2161_v45 }
 0x32a   : > { %8378 = vst [vmem:[#allocation71_spill] sm:$0xff] %v7263_v29  ;;  %v5298_v33 = vpop.f32.mrf.mxu1  ;;  %v2090_v55 = vmul.f32 %v7269_v36, %v1871_v47 }
 0x32b   : > { %v2517_v18 = vadd.f32 %v5298_v33, %v6746_v38  ;;  %v1677_v23 = vpop.f32.mrf.mxu0  ;;  %v2916_v38 = vcombine.high %v5760_v6, %v5760_v6 }
 0x32c   : > { %v1872_v35 = vadd.f32 %v7239_v27, %v1677_v23  ;;  %v2508_v25 = vpop.f32.mrf.mxu1  ;;  %3247 = vadd.xlane.f32.xlu0 %v3062_v41 }
 0x32d   : > { %v2848_v26 = vadd.f32 %v7071_v9, %v2517_v18  ;;  %v2509_v56 = vadd.f32 %v2508_v25, %v6726_v1  ;;  %v7276_v44 = vpop.f32.mrf.mxu0  ;;  %v7278_v13 = vpop.xlane.xlu0 %3181 }
 0x32e   : > { %8379 = vst [vmem:[#allocation72_spill] sm:$0xff] %v7276_v44  ;;  %v2091_v46 = vmul.f32 %v7269_v36, %v1872_v35  ;;  %v5299_v5 = vpop.f32.mrf.mxu1 }
 0x32f   : > { %v2846_v61 = vadd.f32 %v7071_v9, %v2509_v56  ;;  %v2520_v60 = vadd.f32 %v5299_v5, %v6756_v10  ;;  %v1683_v45 = vpop.f32.mrf.mxu0  ;;  %v3067_v33 = vmul.f32 %v7097_v32, %v2848_v26 }
 0x330   : > { %v2511_v41 = vpop.f32.mrf.mxu1  ;;  %v2162_v1 = vpack.c.bf16 %v2091_v46, %v2090_v55  ;;  %v1873_v25 = vadd.f32 %v7239_v27, %v1683_v45  ;;  %v7296_v55 = vrot.slane %v2916_v38, %v6341_v57 }
 0x331   : > { %v2849_v18 = vadd.f32 %v7071_v9, %v2520_v60  ;;  %v2512_v23 = vadd.f32 %v2511_v41, %v6734_v21  ;;  %3257 = vadd.xlane.f32.xlu0 %v3067_v33  ;;  %v7287_v47 = vpop.f32.mrf.mxu0  ;;  %v7289_v35 = vpop.xlane.xlu0 %3187  ;;  %v3065_v5 = vmul.f32 %v7097_v32, %v2846_v61 }
 0x332   : > { %5348 = vmatprep.mubr.bf16.mxu1 %v2162_v1  ;;  %v2092_v60 = vmul.f32 %v7269_v36, %v1873_v25  ;;  %v7308_v41 = vrot.slane %v7296_v55, %v6341_v57 }
 0x333   : > { %v2847_v56 = vadd.f32 %v7071_v9, %v2512_v23  ;;  %v1687_v10 = vpop.f32.mrf.mxu0  ;;  %v3068_v26 = vmul.f32 %v7097_v32, %v2849_v18 }
 0x334   : > { %v1874_v21 = vadd.f32 %v7239_v27, %v1687_v10 }
 0x335   : > { %3253 = vadd.xlane.f32.xlu0 %v3065_v5  ;;  %3259 = vadd.xlane.f32.xlu1 %v3068_v26  ;;  %v7299_v46 = vpop.f32.mrf.mxu0  ;;  %v7301_v6 = vpop.xlane.xlu0 %3183  ;;  %v3066_v61 = vmul.f32 %v7097_v32, %v2847_v56  ;;  %v7318_v32 = vrot.slane %v7308_v41, %v6356_v62 }
 0x336   : > { %8380 = vst [vmem:[#allocation73_spill] sm:$0xff] %v7299_v46  ;;  %v2093_v45 = vmul.f32 %v7269_v36, %v1874_v21 }
 0x337   : > { %v1693_v33 = vpop.f32.mrf.mxu0 }
 0x338   : > { %v2163_v38 = vpack.c.bf16 %v2093_v45, %v2092_v60  ;;  %v1875_v23 = vadd.f32 %v7239_v27, %v1693_v33 }
 0x339   : > { %3255 = vadd.xlane.f32.xlu0 %v3066_v61  ;;  %v7310_v1 = vpop.f32.mrf.mxu0  ;;  %v7312_v18 = vpop.xlane.xlu0 %3193 }
 0x33a   : > { %8381 = vst [vmem:[#allocation74_spill] sm:$0xff] %v7310_v1  ;;  %v5302_v10 = vpop.f32.mrf.mxu1  ;;  %5349 = vmatmul.mubr.bf16.gmra.mxu1 %v2163_v38  ;;  %v2094_v33 = vmul.f32 %v7269_v36, %v1875_v23 }
 0x33b   : > { %v2533_v25 = vadd.f32 %v5302_v10, %v6786_v11  ;;  %v1697_v5 = vpop.f32.mrf.mxu0 }
 0x33c   : > { %v1876_v56 = vadd.f32 %v7239_v27, %v1697_v5  ;;  %v2524_v26 = vpop.f32.mrf.mxu1 }
 0x33d   : > { %v2852_v21 = vadd.f32 %v7071_v9, %v2533_v25  ;;  %v2525_v60 = vadd.f32 %v2524_v26, %v6766_v43  ;;  %v7323_v45 = vpop.f32.mrf.mxu0  ;;  %v7325_v61 = vpop.xlane.xlu0 %3189 }
 0x33e   : > { %8382 = vst [vmem:[#allocation75_spill] sm:$0xff] %v7323_v45  ;;  %v2095_v11 = vmul.f32 %v7269_v36, %v1876_v56  ;;  %v5303_v38 = vpop.f32.mrf.mxu1 }
 0x33f   : > { %v2850_v10 = vadd.f32 %v7071_v9, %v2525_v60  ;;  %v2536_v1 = vadd.f32 %v5303_v38, %v6802_v54  ;;  %v1703_v44 = vpop.f32.mrf.mxu0  ;;  %v3071_v5 = vmul.f32 %v7318_v32, %v2852_v21 }
 0x340   : > { %v2527_v46 = vpop.f32.mrf.mxu1  ;;  %v2164_v25 = vpack.c.bf16 %v2095_v11, %v2094_v33  ;;  %v1877_v56 = vadd.f32 %v7239_v27, %v1703_v44 }
 0x341   : > { %v2853_v43 = vadd.f32 %v7071_v9, %v2536_v1  ;;  %v2528_v26 = vadd.f32 %v2527_v46, %v6779_v48  ;;  %3265 = vadd.xlane.f32.xlu1 %v3071_v5  ;;  %v7334_v45 = vpop.f32.mrf.mxu0  ;;  %v7336_v23 = vpop.xlane.xlu0 %3195  ;;  %v3069_v38 = vmul.f32 %v7318_v32, %v2850_v10 }
 0x342   : > { %8383 = vst [vmem:[#allocation76_spill] sm:$0xff] %v7334_v45  ;;  %5352 = vmatprep.mubr.bf16.mxu1 %v2164_v25  ;;  %v2096_v1 = vmul.f32 %v7269_v36, %v1877_v56  ;;  %v8386_v45 = vld [vmem:[#allocation44_spill] sm:$0xff] }
 0x343   : > { %v2851_v60 = vadd.f32 %v7071_v9, %v2528_v26  ;;  %v1707_v54 = vpop.f32.mrf.mxu0  ;;  %v3072_v21 = vmul.f32 %v7318_v32, %v2853_v43 }
 0x344   : > { %v1878_v33 = vadd.f32 %v7239_v27, %v1707_v54 }
 0x345   : > { %3261 = vadd.xlane.f32.xlu1 %v3069_v38  ;;  %3267 = vadd.xlane.f32.xlu0 %v3072_v21  ;;  %v7343_v48 = vpop.f32.mrf.mxu0  ;;  %v7345_v46 = vpop.xlane.xlu0 %3191  ;;  %v3070_v5 = vmul.f32 %v7318_v32, %v2851_v60 }
 0x346   : > { %8384 = vst [vmem:[#allocation77_spill] sm:$0xff] %v7343_v48  ;;  %v2097_v44 = vmul.f32 %v7269_v36, %v1878_v33 }
 0x347   : > { %v1713_v11 = vpop.f32.mrf.mxu0 }
 0x348   : > { %v2165_v25 = vpack.c.bf16 %v2097_v44, %v2096_v1  ;;  %v1879_v26 = vadd.f32 %v7239_v27, %v1713_v11 }
 0x349   : > { %3263 = vadd.xlane.f32.xlu0 %v3070_v5  ;;  %v7350_v10 = vpop.f32.mrf.mxu0  ;;  %v3202_v43 = vpop.xlane.xlu0 %3201 }
 0x34a   : > { %8385 = vst [vmem:[#allocation78_spill] sm:$0xff] %v7350_v10  ;;  %v5306_v54 = vpop.f32.mrf.mxu1  ;;  %5353 = vmatmul.mubr.bf16.gmra.mxu1 %v2165_v25  ;;  %v2098_v44 = vmul.f32 %v7269_v36, %v1879_v26 }
 0x34b   : > { %v2549_v38 = vadd.f32 %v5306_v54, %v6832_v59  ;;  %v1717_v21 = vpop.f32.mrf.mxu0 }
 0x34c   : > { %v1880_v48 = vadd.f32 %v7239_v27, %v1717_v21  ;;  %v2540_v56 = vpop.f32.mrf.mxu1 }
 0x34d   : > { %v2856_v33 = vadd.f32 %v7071_v9, %v2549_v38  ;;  %v2541_v29 = vadd.f32 %v2540_v56, %v8386_v45  ;;  %v7357_v60 = vpop.f32.mrf.mxu0  ;;  %v3198_v1 = vpop.xlane.xlu0 %3197 }
 0x34e   : > { %8387 = vst [vmem:[#allocation44_spill] sm:$0xff] %v7357_v60  ;;  %v2099_v5 = vmul.f32 %v7269_v36, %v1880_v48  ;;  %v3204_v11 = vpop.xlane.xlu1 %3203  ;;  %v5307_v10 = vpop.f32.mrf.mxu1  ;;  %v3431_v45 = vadd.f32 %v7025_v16, %v3198_v1 }
 0x34f   : > { %v2854_v25 = vadd.f32 %v7071_v9, %v2541_v29  ;;  %v2552_v59 = vadd.f32 %v5307_v10, %v6841_v63  ;;  %v1723_v54 = vpop.f32.mrf.mxu0  ;;  %v3075_v21 = vmul.f32 %v7318_v32, %v2856_v33  ;;  %v3433_v29 = vadd.f32 %v7025_v16, %v3202_v43 }
 0x350   : > { %v2543_v14 = vpop.f32.mrf.mxu1  ;;  %v2166_v38 = vpack.c.bf16 %v2099_v5, %v2098_v44  ;;  %v1881_v63 = vadd.f32 %v7239_v27, %v1723_v54  ;;  %v3434_v33 = vadd.f32 %v7025_v16, %v3204_v11 }
 0x351   : > { %v2857_v56 = vadd.f32 %v7071_v9, %v2552_v59  ;;  %v2544_v60 = vadd.f32 %v2543_v14, %v6825_v0  ;;  %3273 = vadd.xlane.f32.xlu1 %v3075_v21  ;;  %v7367_v26 = vpop.f32.mrf.mxu0  ;;  %v3073_v48 = vmul.f32 %v7318_v32, %v2854_v25  ;;  %v3852_v14 = vrot.slane %v3431_v45, %v7177_v30 }
 0x352   : > { %v3200_v10 = vpop.xlane.xlu1 %3199  ;;  %5356 = vmatprep.mubr.bf16.mxu1 %v2166_v38  ;;  %v3861_v11 = vrot.slane %v3433_v29, %v7185_v8  ;;  %v3866_v38 = vrot.slane %v3434_v33, %v7191_v37 }
 0x353   : > { %v2855_v44 = vadd.f32 %v7071_v9, %v2544_v60  ;;  %v3432_v1 = vadd.f32 %v7025_v16, %v3200_v10  ;;  %3269 = vadd.xlane.f32.xlu0 %v3073_v48  ;;  %v1727_v5 = vpop.f32.mrf.mxu0  ;;  %v3076_v54 = vmul.f32 %v7318_v32, %v2857_v56  ;;  %v2100_v60 = vmul.f32 %v7269_v36, %v1881_v63 }
 0x354   : > { %v1882_v0 = vadd.f32 %v7239_v27, %v1727_v5 }
 0x355   : > { %v3856_v25 = vrot.slane %v3432_v1, %v7180_v24  ;;  %v7378_v59 = vpop.f32.mrf.mxu0  ;;  %v3074_v43 = vmul.f32 %v7318_v32, %v2855_v44 }
 0x356   : > { %8388 = vst [vmem:[#allocation79_spill] sm:$0xff] %v7378_v59  ;;  %v2101_v21 = vmul.f32 %v7269_v36, %v1882_v0 }
 0x357   : > { %v3857_v48 = vsel %vm3670_vm1, %v3856_v25, %v3852_v14  ;;  %3271 = vadd.xlane.f32.xlu1 %v3074_v43  ;;  %3275 = vadd.xlane.f32.xlu0 %v3076_v54  ;;  %v1733_v45 = vpop.f32.mrf.mxu0 }
 0x358   : > { %v3862_v10 = vsel %vm3677_vm2, %v3861_v11, %v3857_v48  ;;  %v2167_v1 = vpack.c.bf16 %v2101_v21, %v2100_v60  ;;  %v1883_v29 = vadd.f32 %v7239_v27, %v1733_v45  ;;  %v3400_v21 = vadd.f32 %v7025_v16, %v7121_v4 }
 0x359   : > { %v7388_v5 = vpop.f32.mrf.mxu0  ;;  %v3867_v56 = vsel %vm3684_vm3, %v3866_v38, %v3862_v10  ;;  %v3210_v44 = vpop.xlane.xlu0 %3209 }
 0x35a   : > { %v5310_v63 = vpop.f32.mrf.mxu1  ;;  %5357 = vmatmul.mubr.bf16.gmra.mxu1 %v2167_v1  ;;  %v2102_v38 = vmul.f32 %v7269_v36, %v1883_v29  ;;  %v3437_v10 = vadd.f32 %v7025_v16, %v3210_v44  ;;  %v3728_v44 = vadd.s32 4294967216, %v7150_v2 }
 0x35b   : > { %v2565_v0 = vadd.f32 %v5310_v63, %v6866_v58  ;;  %v1737_v33 = vpop.f32.mrf.mxu0  ;;  %v3206_v59 = vpop.xlane.xlu1 %3205 }
 0x35c   : > { %v1884_v14 = vadd.f32 %v7239_v27, %v1737_v33  ;;  %v3435_v25 = vadd.f32 %v7025_v16, %v3206_v59  ;;  %v2556_v43 = vpop.f32.mrf.mxu1 }
 0x35d   : > { %v2860_v54 = vadd.f32 %v7071_v9, %v2565_v0  ;;  %v2557_v11 = vadd.f32 %v2556_v43, %v6847_v17  ;;  %v7397_v60 = vpop.f32.mrf.mxu0 }
 0x35e   : > { %8389 = vst [vmem:[#allocation80_spill] sm:$0xff] %v7397_v60  ;;  %v2103_v58 = vmul.f32 %v7269_v36, %v1884_v14  ;;  %v3871_v48 = vrot.slane %v3435_v25, %v7204_v40  ;;  %v5311_v45 = vpop.f32.mrf.mxu1  ;;  %v3399_v25 = vadd.f32 %v7025_v16, %v7083_v15 }
 0x35f   : > { %v2858_v59 = vadd.f32 %v7071_v9, %v2557_v11  ;;  %v2568_v1 = vadd.f32 %v5311_v45, %v6875_v20  ;;  %v1743_v63 = vpop.f32.mrf.mxu0  ;;  %v3208_v17 = vpop.xlane.xlu0 %3207  ;;  %v3079_v0 = vmul.f32 %v7318_v32, %v2860_v54  ;;  %v3669_v45 = vrot.slane %v3400_v21, %v7180_v24 }
 0x360   : > { %v3872_v33 = vsel %vm3691_vm4, %v3871_v48, %v3867_v56  ;;  %v3436_v4 = vadd.f32 %v7025_v16, %v3208_v17  ;;  %v3212_v29 = vpop.xlane.xlu1 %3211  ;;  %v2559_v43 = vpop.f32.mrf.mxu1  ;;  %v2168_v14 = vpack.c.bf16 %v2103_v58, %v2102_v38  ;;  %v3714_v54 = vadd.s32 4294967232, %v7150_v2 }
 0x361   : > { %v3438_v11 = vadd.f32 %v7025_v16, %v3212_v29  ;;  %3281 = vadd.xlane.f32.xlu1 %v3079_v0  ;;  %v7414_v20 = vpop.f32.mrf.mxu0  ;;  %v1885_v56 = vadd.f32 %v7239_v27, %v1743_v63  ;;  %v3881_v38 = vrot.slane %v3437_v10, %v7231_v22  ;;  %v2861_v15 = vadd.f32 %v7071_v9, %v2568_v1 }
 0x362   : > { %v3876_v48 = vrot.slane %v3436_v4, %v7224_v19  ;;  %5360 = vmatprep.mubr.bf16.mxu1 %v2168_v14  ;;  %v2560_v58 = vadd.f32 %v2559_v43, %v6857_v51  ;;  %v3077_v0 = vmul.f32 %v7318_v32, %v2858_v59  ;;  %v3401_v29 = vadd.f32 %v7025_v16, %v7061_v52 }
 0x363   : > { %v1747_v17 = vpop.f32.mrf.mxu0  ;;  %v3886_v60 = vrot.slane %v3438_v11, %v7234_v53  ;;  %v3664_v4 = vrot.slane %v3399_v25, %v7177_v30  ;;  %v3402_v10 = vadd.f32 %v7025_v16, %v7100_v34  ;;  %v3721_v1 = vadd.s32 4294967224, %v7150_v2 }
 0x364   : > { %v3877_v21 = vsel %vm3698_vm5, %v3876_v48, %v3872_v33  ;;  %v1886_v63 = vadd.f32 %v7239_v27, %v1747_v17  ;;  %v3403_v59 = vadd.f32 %v7025_v16, %v7035_v42  ;;  %v2104_v52 = vmul.f32 %v7269_v36, %v1885_v56 }
 0x365   : > { %v3882_v51 = vsel %vm3705_vm6, %v3881_v38, %v3877_v21  ;;  %3277 = vadd.xlane.f32.xlu1 %v3077_v0  ;;  %v3671_v43 = vsel %vm3670_vm1, %v3669_v45, %v3664_v4  ;;  %v3404_v34 = vadd.f32 %v7025_v16, %v7049_v49  ;;  %v2859_v14 = vadd.f32 %v7071_v9, %v2560_v58 }
 0x366   : > { %v7438_v33 = vsel %vm3712_vm7, %v3886_v60, %v3882_v51  ;;  %v2105_v27 = vmul.f32 %v7269_v36, %v1886_v63  ;;  %v3080_v25 = vmul.f32 %v7318_v32, %v2861_v15  ;;  %v3676_v11 = vrot.slane %v3401_v29, %v7185_v8 }
 0x367   : > { %v3735_v42 = vadd.s32 4294967208, %v7150_v2  ;;  %v3405_v60 = vadd.f32 %v7025_v16, %v7133_v3  ;;  %v7451_v56 = vsub.s32 %v3728_v44, %v8372_v39  ;;  %v3690_v38 = vrot.slane %v3403_v59, %v7204_v40 }
 0x368   : > { %v2169_v48 = vpack.c.bf16 %v2105_v27, %v2104_v52  ;;  %v3678_v49 = vsel %vm3677_vm2, %v3676_v11, %v3671_v43  ;;  %v7456_v15 = vsub.s32 %v3714_v54, %v8372_v39  ;;  %v3683_v17 = vrot.slane %v3402_v10, %v7191_v37 }
 0x369   : > { %3283 = vadd.xlane.f32.xlu1 %v3080_v25  ;;  %v3218_v36 = vpop.xlane.xlu1 %3217  ;;  %v5314_v45 = vpop.f32.mrf.mxu1  ;;  %v3697_v3 = vrot.slane %v3404_v34, %v7224_v19  ;;  %v7462_v44 = vsub.s32 %v3721_v1, %v8372_v39  ;;  %v3078_v29 = vmul.f32 %v7318_v32, %v2859_v14  ;;  %v7466_v21 = vsub.s32 %v3735_v42, %v8372_v39  ;;  %v8390_v34 = vld [vmem:[#allocation46_spill] sm:$0xff]  ;;  %v8391_v25 = vld [vmem:[#allocation65_spill] sm:$0xff] }
 0x36a   : > { %v2581_v58 = vadd.f32 %v5314_v45, %v6896_v12  ;;  %5361 = vmatmul.mubr.bf16.gmra.mxu1 %v2169_v48  ;;  %v3704_v4 = vrot.slane %v3405_v60, %v7231_v22  ;;  %v3685_v10 = vsel %vm3684_vm3, %v3683_v17, %v3678_v49  ;;  %v3756_v1 = vadd.s32 4294967184, %v7150_v2  ;;  %v8392_v48 = vld [vmem:[#allocation34_spill] sm:$0xff] }
 0x36b   : > { %v2572_v0 = vpop.f32.mrf.mxu1  ;;  %v3214_v63 = vpop.xlane.xlu0 %3213  ;;  %v3692_v52 = vsel %vm3691_vm4, %v3690_v38, %v3685_v10  ;;  %v3406_v11 = vadd.f32 %v7025_v16, %v8391_v25  ;;  %v3407_v60 = vadd.f32 %v7025_v16, %v8392_v48  ;;  %v3441_v45 = vadd.f32 %v7025_v16, %v3218_v36 }
 0x36c   : > { %v2864_v54 = vadd.f32 %v7071_v9, %v2581_v58  ;;  %v2573_v12 = vadd.f32 %v2572_v0, %v6880_v31  ;;  %v3439_v51 = vadd.f32 %v7025_v16, %v3214_v63  ;;  %v3699_v42 = vsel %vm3698_vm5, %v3697_v3, %v3692_v52  ;;  %v8393_v0 = vld [vmem:[#allocation45_spill] sm:$0xff]  ;;  %v8394_v63 = vld [vmem:[#allocation28_spill] sm:$0xff] }
 0x36d   : > { %3279 = vadd.xlane.f32.xlu1 %v3078_v29  ;;  %v5315_v59 = vpop.f32.mrf.mxu1  ;;  %v3220_v43 = vpop.xlane.xlu1 %3219  ;;  %v3423_v3 = vadd.f32 %v7025_v16, %v7278_v13  ;;  %v3742_v13 = vadd.s32 4294967200, %v7150_v2 }
 0x36e   : > { %v2862_v27 = vadd.f32 %v7071_v9, %v2573_v12  ;;  %v2584_v14 = vadd.f32 %v5315_v59, %v8390_v34  ;;  %v3083_v31 = vmul.f32 %v7318_v32, %v2864_v54  ;;  %v3891_v38 = vrot.slane %v3439_v51, %v7456_v15 }
 0x36f   : > { %v2575_v49 = vpop.f32.mrf.mxu1  ;;  %v3216_v17 = vpop.xlane.xlu0 %3215  ;;  %v3408_v12 = vadd.f32 %v7025_v16, %v8394_v63  ;;  %v3442_v10 = vadd.f32 %v7025_v16, %v3220_v43  ;;  %v3424_v51 = vadd.f32 %v7025_v16, %v7301_v6  ;;  %v3711_v34 = vrot.slane %v3406_v11, %v7234_v53 }
 0x370   : > { %v2865_v58 = vadd.f32 %v7071_v9, %v2584_v14  ;;  %v2576_v29 = vadd.f32 %v2575_v49, %v8393_v0  ;;  %3289 = vadd.xlane.f32.xlu0 %v3083_v31  ;;  %v3081_v54 = vmul.f32 %v7318_v32, %v2862_v27  ;;  %v3440_v36 = vadd.f32 %v7025_v16, %v3216_v17  ;;  %v8395_v31 = vld [vmem:[#allocation67_spill] sm:$0xff] }
 0x371   : > { %v2932_v27 = vcombine.high %v7296_v55, %v7296_v55  ;;  %v3706_v14 = vsel %vm3705_vm6, %v3704_v4, %v3699_v42  ;;  %v3409_v25 = vadd.f32 %v7025_v16, %v8395_v31  ;;  %v3901_v6 = vrot.slane %v3441_v45, %v7451_v56  ;;  %v8398_v31 = vld [vmem:[#allocation59_spill] sm:$0xff] }
 0x372   : > { %v2863_v59 = vadd.f32 %v7071_v9, %v2576_v29  ;;  %3285 = vadd.xlane.f32.xlu1 %v3081_v54  ;;  %v3084_v52 = vmul.f32 %v7318_v32, %v2865_v58  ;;  %v3896_v43 = vrot.slane %v3440_v36, %v7462_v44  ;;  %v3892_v9 = vsel %vm3719_vm8, %v3891_v38, %v7438_v33 }
 0x373   : > { %v3718_v55 = vrot.slane %v3407_v60, %v7456_v15  ;;  %v3812_v11 = vrot.slane %v3423_v3, %v7456_v15  ;;  %v3906_v4 = vrot.slane %v3442_v10, %v7466_v21  ;;  %v3725_v49 = vrot.slane %v3408_v12, %v7462_v44 }
 0x374   : > { %3291 = vadd.xlane.f32.xlu0 %v3084_v52  ;;  %v3082_v48 = vmul.f32 %v7318_v32, %v2863_v59  ;;  %v3897_v42 = vsel %vm3726_vm9, %v3896_v43, %v3892_v9  ;;  %v3817_v58 = vrot.slane %v3424_v51, %v7462_v44  ;;  %v7518_v33 = vrot.slane %v2932_v27, %v6341_v57  ;;  %v8396_v59 = vld [vmem:[#allocation49_spill] sm:$0xff]  ;;  %v7560_v9 = vld [vmem:[%s8263_s7] ss:$0 sm:$0xff] }
 0x375   : > { %v3902_v45 = vsel %vm3733_vm10, %v3901_v6, %v3897_v42  ;;  %v7521_v32 = vsub.s32 %v3756_v1, %v8372_v39  ;;  %v3425_v60 = vadd.f32 %v7025_v16, %v7265_v50  ;;  %v3713_v17 = vsel %vm3712_vm7, %v3711_v34, %v3706_v14  ;;  %v8397_v34 = vld [vmem:[#allocation38_spill] sm:$0xff] }
 0x376   : > { %3287 = vadd.xlane.f32.xlu1 %v3082_v48  ;;  %v3907_v38 = vsel %vm3740_vm11, %v3906_v4, %v3902_v45  ;;  %v7528_v0 = vsub.s32 %v3742_v13, %v8372_v39  ;;  %v3763_v29 = vadd.s32 4294967176, %v7150_v2  ;;  %v3749_v54 = vadd.s32 4294967192, %v7150_v2  ;;  %v8400_v4 = vld [vmem:[#allocation63_spill] sm:$0xff] }
 0x377   : > { %v3732_v63 = vrot.slane %v3409_v25, %v7451_v56  ;;  %v3720_v12 = vsel %vm3719_vm8, %v3718_v55, %v3713_v17  ;;  %v3813_v1 = vsel %vm3719_vm8, %v3812_v11, %v7261_v7  ;;  %v3427_v50 = vadd.f32 %v7025_v16, %v7325_v61  ;;  %v8399_v55 = vld [vmem:[#allocation47_spill] sm:$0xff] }
 0x378   : > { %v3727_v36 = vsel %vm3726_vm9, %v3725_v49, %v3720_v12  ;;  %v3818_v51 = vsel %vm3726_vm9, %v3817_v58, %v3813_v1  ;;  %v7543_v27 = vrot.slane %v7518_v33, %v6356_v62  ;;  %v3411_v14 = vadd.f32 %v7025_v16, %v8397_v34  ;;  %v8402_v34 = vld [vmem:[#allocation48_spill] sm:$0xff] }
 0x379   : > { %v3226_v3 = vpop.xlane.xlu1 %3225  ;;  %v5318_v10 = vpop.f32.mrf.mxu1  ;;  %v3822_v7 = vrot.slane %v3425_v60, %v7451_v56  ;;  %v3426_v61 = vadd.f32 %v7025_v16, %v7289_v35  ;;  %v3428_v13 = vadd.f32 %v7025_v16, %v7345_v46  ;;  %v3410_v25 = vadd.f32 %v7025_v16, %v8398_v31 }
 0x37a   : > { %v2597_v52 = vadd.f32 %v5318_v10, %v8396_v59  ;;  %v7555_v6 = vsub.s32 %v3749_v54, %v8372_v39  ;;  %v3734_v35 = vsel %vm3733_vm10, %v3732_v63, %v3727_v36  ;;  %v3412_v46 = vadd.f32 %v7025_v16, %v8400_v4  ;;  %v8401_v54 = vld [vmem:[#allocation50_spill] sm:$0xff] }
 0x37b   : > { %v2588_v43 = vpop.f32.mrf.mxu1  ;;  %v3823_v42 = vsel %vm3733_vm10, %v3822_v7, %v3818_v51  ;;  %v3832_v49 = vrot.slane %v3427_v50, %v7528_v0  ;;  %v3746_v10 = vrot.slane %v3411_v14, %v7528_v0  ;;  %v3827_v63 = vrot.slane %v3426_v61, %v7466_v21  ;;  %v8403_v14 = vld [vmem:[#allocation61_spill] sm:$0xff] }
 0x37c   : > { %v2868_v48 = vadd.f32 %v7560_v9, %v2597_v52  ;;  %v2589_v11 = vadd.f32 %v2588_v43, %v8399_v55  ;;  %v3429_v36 = vadd.f32 %v7025_v16, %v7312_v18  ;;  %v3837_v51 = vrot.slane %v3428_v13, %v7555_v6 }
 0x37d   : > { %v3222_v58 = vpop.xlane.xlu1 %3221  ;;  %v5319_v45 = vpop.f32.mrf.mxu1  ;;  %v3739_v31 = vrot.slane %v3410_v25, %v7466_v21  ;;  %v3413_v61 = vadd.f32 %v7025_v16, %v8403_v14  ;;  %v3828_v18 = vsel %vm3740_vm11, %v3827_v63, %v3823_v42  ;;  %v3430_v25 = vadd.f32 %v7025_v16, %v7336_v23 }
 0x37e   : > { %v2866_v60 = vadd.f32 %v7560_v9, %v2589_v11  ;;  %v3443_v17 = vadd.f32 %v7025_v16, %v3222_v58  ;;  %v2600_v12 = vadd.f32 %v5319_v45, %v8401_v54  ;;  %v3087_v1 = vmul.f32 %v7543_v27, %v2868_v48 }
 0x37f   : > { %v2591_v50 = vpop.f32.mrf.mxu1  ;;  %v3753_v48 = vrot.slane %v3412_v46, %v7555_v6  ;;  %v3833_v55 = vsel %vm8275_vm12, %v3832_v49, %v3828_v18  ;;  %v3741_v45 = vsel %vm3740_vm11, %v3739_v31, %v3734_v35  ;;  %v7597_v42 = vsub.s32 %v3763_v29, %v8372_v39  ;;  %v8405_v31 = vld [vmem:[#allocation53_spill] sm:$0xff] }
 0x380   : > { %v3911_v59 = vrot.slane %v3443_v17, %v7528_v0  ;;  %v2869_v52 = vadd.f32 %v7560_v9, %v2600_v12  ;;  %v2592_v7 = vadd.f32 %v2591_v50, %v8402_v34  ;;  %3297 = vadd.xlane.f32.xlu1 %v3087_v1  ;;  %v3085_v43 = vmul.f32 %v7543_v27, %v2866_v60  ;;  %v8404_v17 = vld [vmem:[#allocation39_spill] sm:$0xff] }
 0x381   : > { %v3228_v13 = vpop.xlane.xlu1 %3227  ;;  %v3838_v60 = vsel %vm3754_vm13, %v3837_v51, %v3833_v55  ;;  %v3748_v46 = vsel %vm8275_vm12, %v3746_v10, %v3741_v45  ;;  %v3760_v49 = vrot.slane %v3413_v61, %v7521_v32  ;;  %v3414_v54 = vadd.f32 %v7025_v16, %v8404_v17 }
 0x382   : > { %v3912_v11 = vsel %vm8275_vm12, %v3911_v59, %v3907_v38  ;;  %v2867_v4 = vadd.f32 %v7560_v9, %v2592_v7  ;;  %3293 = vadd.xlane.f32.xlu0 %v3085_v43  ;;  %v3088_v58 = vmul.f32 %v7543_v27, %v2869_v52  ;;  %v3842_v38 = vrot.slane %v3429_v36, %v7521_v32 }
 0x383   : > { %v3755_v35 = vsel %vm3754_vm13, %v3753_v48, %v3748_v46  ;;  %v3445_v23 = vadd.f32 %v7025_v16, %v3226_v3  ;;  %v3446_v10 = vadd.f32 %v7025_v16, %v3228_v13  ;;  %v3847_v63 = vrot.slane %v3430_v25, %v7597_v42  ;;  %v8406_v25 = vld [vmem:[#allocation51_spill] sm:$0xff] }
 0x384   : > { %3299 = vadd.xlane.f32.xlu1 %v3088_v58  ;;  %v3843_v1 = vsel %vm3761_vm14, %v3842_v38, %v3838_v60  ;;  %v3086_v29 = vmul.f32 %v7543_v27, %v2867_v4  ;;  %v3762_v36 = vsel %vm3761_vm14, %v3760_v49, %v3755_v35  ;;  %v3767_v50 = vrot.slane %v3414_v54, %v7597_v42  ;;  %v8407_v38 = vld [vmem:[#allocation54_spill] sm:$0xff] }
 0x385   : > { %v3224_v12 = vpop.xlane.xlu1 %3223  ;;  %v3848_v3 = vsel %vm3768_vm15, %v3847_v63, %v3843_v1  ;;  %v3921_v59 = vrot.slane %v3445_v23, %v7521_v32  ;;  %v3926_v7 = vrot.slane %v3446_v10, %v7597_v42  ;;  %vm8276_vm12 = vcmask 1042434  }
 0x386   : > { %v3444_v39 = vadd.f32 %v7025_v16, %v3224_v12  ;;  %v3769_v61 = vsel %vm3768_vm15, %v3767_v50, %v3762_v36 }
 0x387   : > { %v4324_v13 = vsel %vm8277_vm0, %v3848_v3, %v3769_v61  ;;  %vm8279_vm0 = vcmask 1043459  }
 0x388   : > { %v3916_v51 = vrot.slane %v3444_v39, %v7555_v6  ;;  %3295 = vadd.xlane.f32.xlu1 %v3086_v29  ;;  %v8408_v29 = vld [vmem:[#allocation52_spill] sm:$0xff] }
 0x389   : > { %v3234_v52 = vpop.xlane.xlu0 %3233  ;;  %v5322_v34 = vpop.f32.mrf.mxu1 }
 0x38a   : > { %v3917_v43 = vsel %vm3754_vm13, %v3916_v51, %v3912_v11  ;;  %v2613_v14 = vadd.f32 %v5322_v34, %v8405_v31  ;;  %v3449_v12 = vadd.f32 %v7025_v16, %v3234_v52 }
 0x38b   : > { %v3922_v48 = vsel %vm3761_vm14, %v3921_v59, %v3917_v43  ;;  %v2604_v18 = vpop.f32.mrf.mxu1  ;;  %v3230_v58 = vpop.xlane.xlu1 %3229 }
 0x38c   : > { %v3927_v55 = vsel %vm3768_vm15, %v3926_v7, %v3922_v48  ;;  %v2872_v4 = vadd.f32 %v7560_v9, %v2613_v14  ;;  %v2605_v60 = vadd.f32 %v2604_v18, %v8406_v25  ;;  %v3447_v23 = vadd.f32 %v7025_v16, %v3230_v58  ;;  %v8409_v18 = vld [vmem:[#allocation29_spill] sm:$0xff] }
 0x38d   : > { %v7624_v45 = vsel %vm8276_vm12, %v3927_v55, %v4324_v13  ;;  %v3236_v11 = vpop.xlane.xlu0 %3235  ;;  %v5323_v46 = vpop.f32.mrf.mxu1  ;;  %v3940_v59 = vrot.slane %v3449_v12, %v7185_v8  ;;  %vm8421_vm12 = vcmask 851712  }
 0x38e   : > { %v2616_v49 = vadd.f32 %v5323_v46, %v8407_v38  ;;  %v3091_v17 = vmul.f32 %v7543_v27, %v2872_v4  ;;  %v2870_v54 = vadd.f32 %v7560_v9, %v2605_v60  ;;  %v3450_v1 = vadd.f32 %v7025_v16, %v3236_v11  ;;  %v8410_v11 = vld [vmem:[#allocation55_spill] sm:$0xff] }
 0x38f   : > { %v2607_v35 = vpop.f32.mrf.mxu1  ;;  %v3931_v50 = vrot.slane %v3447_v23, %v7177_v30  ;;  %v8411_v23 = vld [vmem:[#allocation57_spill] sm:$0xff] }
 0x390   : > { %3305 = vadd.xlane.f32.xlu0 %v3091_v17  ;;  %v2873_v39 = vadd.f32 %v7560_v9, %v2616_v49  ;;  %v2608_v63 = vadd.f32 %v2607_v35, %v8408_v29  ;;  %v3089_v51 = vmul.f32 %v7543_v27, %v2870_v54  ;;  %v3945_v52 = vrot.slane %v3450_v1, %v7191_v37 }
 0x391   : > { %v3232_v10 = vpop.xlane.xlu0 %3231 }
 0x392   : > { %v3448_v36 = vadd.f32 %v7025_v16, %v3232_v10  ;;  %v2871_v34 = vadd.f32 %v7560_v9, %v2608_v63  ;;  %v3092_v43 = vmul.f32 %v7543_v27, %v2873_v39 }
 0x394   : > { %v3935_v3 = vrot.slane %v3448_v36, %v7180_v24  ;;  %3301 = vadd.xlane.f32.xlu0 %v3089_v51  ;;  %v3090_v55 = vmul.f32 %v7543_v27, %v2871_v34 }
 0x396   : > { %v3936_v7 = vsel %vm3670_vm1, %v3935_v3, %v3931_v50 }
 0x397   : > { %v3941_v31 = vsel %vm3677_vm2, %v3940_v59, %v3936_v7  ;;  %v8412_v59 = vld [vmem:[#allocation56_spill] sm:$0xff] }
 0x398   : > { %3307 = vadd.xlane.f32.xlu0 %v3092_v43  ;;  %v3946_v14 = vsel %vm3684_vm3, %v3945_v52, %v3941_v31 }
 0x399   : > { %v3242_v61 = vpop.xlane.xlu0 %3241  ;;  %v5326_v48 = vpop.f32.mrf.mxu1 }
 0x39a   : > { %v2629_v13 = vadd.f32 %v5326_v48, %v8409_v18  ;;  %v3453_v54 = vadd.f32 %v7025_v16, %v3242_v61 }
 0x39b   : > { %v3238_v4 = vpop.xlane.xlu1 %3237  ;;  %v2620_v58 = vpop.f32.mrf.mxu1 }
 0x39c   : > { %v2876_v25 = vadd.f32 %v7560_v9, %v2629_v13  ;;  %v3451_v60 = vadd.f32 %v7025_v16, %v3238_v4  ;;  %v2621_v46 = vadd.f32 %v2620_v58, %v8410_v11  ;;  %3303 = vadd.xlane.f32.xlu0 %v3090_v55  ;;  %v3960_v50 = vrot.slane %v3453_v54, %v7231_v22  ;;  %v8413_v55 = vld [vmem:[#allocation30_spill] sm:$0xff] }
 0x39d   : > { %v3244_v38 = vpop.xlane.xlu0 %3243  ;;  %v5327_v49 = vpop.f32.mrf.mxu1  ;;  %v8414_v11 = vld [vmem:[#allocation58_spill] sm:$0xff] }
 0x39e   : > { %v3950_v17 = vrot.slane %v3451_v60, %v7204_v40  ;;  %v2874_v35 = vadd.f32 %v7560_v9, %v2621_v46  ;;  %v2632_v12 = vadd.f32 %v5327_v49, %v8411_v23  ;;  %v3095_v10 = vmul.f32 %v7543_v27, %v2876_v25 }
 0x39f   : > { %v3240_v1 = vpop.xlane.xlu1 %3239  ;;  %v3454_v29 = vadd.f32 %v7025_v16, %v3244_v38  ;;  %v2623_v36 = vpop.f32.mrf.mxu1 }
 0x3a0   : > { %v3951_v39 = vsel %vm3691_vm4, %v3950_v17, %v3946_v14  ;;  %v3452_v63 = vadd.f32 %v7025_v16, %v3240_v1  ;;  %3313 = vadd.xlane.f32.xlu0 %v3095_v10  ;;  %v2877_v3 = vadd.f32 %v7560_v9, %v2632_v12  ;;  %v2624_v52 = vadd.f32 %v2623_v36, %v8412_v59 }
 0x3a1   : > { %v3093_v34 = vmul.f32 %v7543_v27, %v2874_v35  ;;  %v3965_v7 = vrot.slane %v3454_v29, %v7234_v53  ;;  %v8415_v35 = vld [vmem:[#allocation33_spill] sm:$0xff]  ;;  %v8416_v29 = vld [vmem:[#allocation32_spill] sm:$0xff] }
 0x3a2   : > { %v3955_v51 = vrot.slane %v3452_v63, %v7224_v19  ;;  %v2875_v61 = vadd.f32 %v7560_v9, %v2624_v52  ;;  %v3096_v48 = vmul.f32 %v7543_v27, %v2877_v3 }
 0x3a4   : > { %v3956_v43 = vsel %vm3698_vm5, %v3955_v51, %v3951_v39  ;;  %3309 = vadd.xlane.f32.xlu0 %v3093_v34  ;;  %v3094_v25 = vmul.f32 %v7543_v27, %v2875_v61 }
 0x3a5   : > { %v3961_v31 = vsel %vm3705_vm6, %v3960_v50, %v3956_v43  ;;  %v2962_v43 = vcombine.high %v7308_v41, %v7308_v41 }
 0x3a6   : > { %v3966_v14 = vsel %vm3712_vm7, %v3965_v7, %v3961_v31 }
 0x3a7   : > { %v7697_v41 = vrot.slane %v2962_v43, %v6356_v62 }
 0x3a8   : > { %3315 = vadd.xlane.f32.xlu0 %v3096_v48 }
 0x3a9   : > { %v3250_v18 = vpop.xlane.xlu0 %3249  ;;  %v5330_v13 = vpop.f32.mrf.mxu1 }
 0x3aa   : > { %v2645_v4 = vadd.f32 %v5330_v13, %v8413_v55  ;;  %v3457_v34 = vadd.f32 %v7025_v16, %v3250_v18 }
 0x3ab   : > { %v2636_v58 = vpop.f32.mrf.mxu1 }
 0x3ac   : > { %v2880_v60 = vadd.f32 %v7560_v9, %v2645_v4  ;;  %v2637_v46 = vadd.f32 %v2636_v58, %v8414_v11  ;;  %3311 = vadd.xlane.f32.xlu0 %v3094_v25  ;;  %v3980_v48 = vrot.slane %v3457_v34, %v7451_v56  ;;  %v8417_v4 = vld [vmem:[#allocation37_spill] sm:$0xff] }
 0x3ad   : > { %v3246_v38 = vpop.xlane.xlu0 %3245  ;;  %v5331_v49 = vpop.f32.mrf.mxu1 }
 0x3ae   : > { %v2878_v17 = vadd.f32 %v7560_v9, %v2637_v46  ;;  %v3455_v54 = vadd.f32 %v7025_v16, %v3246_v38  ;;  %v2648_v23 = vadd.f32 %v5331_v49, %v8415_v35  ;;  %v3099_v12 = vmul.f32 %v7543_v27, %v2880_v60  ;;  %v8418_v46 = vld [vmem:[#allocation31_spill] sm:$0xff] }
 0x3af   : > { %v2639_v1 = vpop.f32.mrf.mxu1 }
 0x3b0   : > { %v3970_v10 = vrot.slane %v3455_v54, %v7456_v15  ;;  %v2881_v39 = vadd.f32 %v7560_v9, %v2648_v23  ;;  %v2640_v63 = vadd.f32 %v2639_v1, %v8416_v29  ;;  %3321 = vadd.xlane.f32.xlu1 %v3099_v12  ;;  %v3097_v36 = vmul.f32 %v7543_v27, %v2878_v17  ;;  %v8419_v23 = vld [vmem:[#allocation35_spill] sm:$0xff] }
 0x3b1   : > { %v3252_v51 = vpop.xlane.xlu0 %3251 }
 0x3b2   : > { %v3971_v50 = vsel %vm3719_vm8, %v3970_v10, %v3966_v14  ;;  %v2879_v3 = vadd.f32 %v7560_v9, %v2640_v63  ;;  %3317 = vadd.xlane.f32.xlu0 %v3097_v36  ;;  %v3100_v52 = vmul.f32 %v7543_v27, %v2881_v39  ;;  %v3458_v31 = vadd.f32 %v7025_v16, %v3252_v51  ;;  %v8420_v36 = vld [vmem:[#allocation36_spill] sm:$0xff] }
 0x3b4   : > { %v3098_v59 = vmul.f32 %v7543_v27, %v2879_v3  ;;  %v3985_v55 = vrot.slane %v3458_v31, %v7466_v21 }
 0x3b5   : > { %v3248_v7 = vpop.xlane.xlu0 %3247 }
 0x3b6   : > { %v3456_v61 = vadd.f32 %v7025_v16, %v3248_v7  ;;  %3319 = vadd.xlane.f32.xlu1 %v3098_v59  ;;  %3323 = vadd.xlane.f32.xlu0 %v3100_v52 }
 0x3b8   : > { %v3975_v14 = vrot.slane %v3456_v61, %v7462_v44 }
 0x3b9   : > { %v5334_v13 = vpop.f32.mrf.mxu1 }
 0x3ba   : > { %v3976_v27 = vsel %vm3726_vm9, %v3975_v14, %v3971_v50  ;;  %v3258_v18 = vpop.xlane.xlu0 %3257  ;;  %v2661_v58 = vadd.f32 %v5334_v13, %v8417_v4 }
 0x3bb   : > { %v3981_v25 = vsel %vm3733_vm10, %v3980_v48, %v3976_v27  ;;  %v2652_v60 = vpop.f32.mrf.mxu1  ;;  %v3461_v3 = vadd.f32 %v7025_v16, %v3258_v18 }
 0x3bc   : > { %v2884_v11 = vadd.f32 %v7560_v9, %v2661_v58  ;;  %v2653_v38 = vadd.f32 %v2652_v60, %v8418_v46  ;;  %v3986_v49 = vsel %vm3740_vm11, %v3985_v55, %v3981_v25  ;;  %v8422_v60 = vld [vmem:[#allocation41_spill] sm:$0xff] }
 0x3bd   : > { %v5335_v17 = vpop.f32.mrf.mxu1  ;;  %v4000_v48 = vrot.slane %v3461_v3, %v7521_v32 }
 0x3be   : > { %v2882_v54 = vadd.f32 %v7560_v9, %v2653_v38  ;;  %v3254_v35 = vpop.xlane.xlu0 %3253  ;;  %v2664_v12 = vadd.f32 %v5335_v17, %v8419_v23  ;;  %v3103_v1 = vmul.f32 %v7697_v41, %v2884_v11  ;;  %v3260_v29 = vpop.xlane.xlu1 %3259  ;;  %v8423_v17 = vld [vmem:[#allocation60_spill] sm:$0xff] }
 0x3bf   : > { %v3459_v10 = vadd.f32 %v7025_v16, %v3254_v35  ;;  %v2655_v39 = vpop.f32.mrf.mxu1  ;;  %v3462_v31 = vadd.f32 %v7025_v16, %v3260_v29 }
 0x3c0   : > { %v2885_v63 = vadd.f32 %v7560_v9, %v2664_v12  ;;  %v2656_v51 = vadd.f32 %v2655_v39, %v8420_v36  ;;  %3329 = vadd.xlane.f32.xlu0 %v3103_v1  ;;  %v3101_v34 = vmul.f32 %v7697_v41, %v2882_v54 }
 0x3c1   : > { %v3990_v50 = vrot.slane %v3459_v10, %v7528_v0  ;;  %v4005_v55 = vrot.slane %v3462_v31, %v7597_v42  ;;  %v8424_v10 = vld [vmem:[#allocation62_spill] sm:$0xff] }
 0x3c2   : > { %v2883_v59 = vadd.f32 %v7560_v9, %v2656_v51  ;;  %v3256_v52 = vpop.xlane.xlu0 %3255  ;;  %v3104_v7 = vmul.f32 %v7697_v41, %v2885_v63  ;;  %v8425_v51 = vld [vmem:[#allocation40_spill] sm:$0xff] }
 0x3c3   : > { %v3991_v43 = vsel %vm8421_vm12, %v3990_v50, %v3986_v49  ;;  %v3460_v61 = vadd.f32 %v7025_v16, %v3256_v52 }
 0x3c4   : > { %3325 = vadd.xlane.f32.xlu0 %v3101_v34  ;;  %3331 = vadd.xlane.f32.xlu1 %v3104_v7  ;;  %v3102_v13 = vmul.f32 %v7697_v41, %v2883_v59 }
 0x3c5   : > { %v3995_v14 = vrot.slane %v3460_v61, %v7555_v6 }
 0x3c7   : > { %v3996_v27 = vsel %vm3754_vm13, %v3995_v14, %v3991_v43 }
 0x3c8   : > { %v4001_v18 = vsel %vm3761_vm14, %v4000_v48, %v3996_v27  ;;  %3327 = vadd.xlane.f32.xlu1 %v3102_v13 }
 0x3c9   : > { %v4006_v4 = vsel %vm3768_vm15, %v4005_v55, %v4001_v18  ;;  %v5338_v58 = vpop.f32.mrf.mxu1 }
 0x3ca   : > { %v3266_v25 = vpop.xlane.xlu1 %3265  ;;  %v2677_v11 = vadd.f32 %v5338_v58, %v8422_v60  ;;  %v7727_v46 = vsel %vm8279_vm0, %v4006_v4, %v7624_v45  ;;  %vm4331_vm0 = vcmask 1045509  }
 0x3cb   : > { %v2668_v38 = vpop.f32.mrf.mxu1  ;;  %v3465_v59 = vadd.f32 %v7025_v16, %v3266_v25  ;;  %v8426_v25 = vld [vmem:[#allocation66_spill] sm:$0xff] }
 0x3cc   : > { %v2888_v49 = vadd.f32 %v7560_v9, %v2677_v11  ;;  %v2669_v54 = vadd.f32 %v2668_v38, %v8423_v17 }
 0x3cd   : > { %v5339_v35 = vpop.f32.mrf.mxu1  ;;  %v4019_v48 = vrot.slane %v3465_v59, %v7185_v8 }
 0x3ce   : > { %v2886_v23 = vadd.f32 %v7560_v9, %v2669_v54  ;;  %v3262_v12 = vpop.xlane.xlu1 %3261  ;;  %v3268_v1 = vpop.xlane.xlu0 %3267  ;;  %v2680_v39 = vadd.f32 %v5339_v35, %v8424_v10  ;;  %v3107_v29 = vmul.f32 %v7697_v41, %v2888_v49  ;;  %v8427_v54 = vld [vmem:[#allocation64_spill] sm:$0xff] }
 0x3cf   : > { %v2671_v63 = vpop.f32.mrf.mxu1  ;;  %v3463_v3 = vadd.f32 %v7025_v16, %v3262_v12  ;;  %v3466_v43 = vadd.f32 %v7025_v16, %v3268_v1  ;;  %v8428_v10 = vld [vmem:[#allocation68_spill] sm:$0xff] }
 0x3d0   : > { %v2889_v36 = vadd.f32 %v7560_v9, %v2680_v39  ;;  %v2672_v45 = vadd.f32 %v2671_v63, %v8425_v51  ;;  %3337 = vadd.xlane.f32.xlu1 %v3107_v29  ;;  %v3105_v50 = vmul.f32 %v7697_v41, %v2886_v23 }
 0x3d1   : > { %v4010_v61 = vrot.slane %v3463_v3, %v7177_v30  ;;  %v4024_v55 = vrot.slane %v3466_v43, %v7191_v37 }
 0x3d2   : > { %v2887_v52 = vadd.f32 %v7560_v9, %v2672_v45  ;;  %v3264_v34 = vpop.xlane.xlu0 %3263  ;;  %3333 = vadd.xlane.f32.xlu0 %v3105_v50  ;;  %v3108_v7 = vmul.f32 %v7697_v41, %v2889_v36 }
 0x3d3   : > { %v3464_v31 = vadd.f32 %v7025_v16, %v3264_v34 }
 0x3d4   : > { %3339 = vadd.xlane.f32.xlu1 %v3108_v7  ;;  %v3106_v13 = vmul.f32 %v7697_v41, %v2887_v52  ;;  %v8429_v7 = vld [vmem:[#allocation42_spill] sm:$0xff] }
 0x3d5   : > { %v4014_v14 = vrot.slane %v3464_v31, %v7180_v24 }
 0x3d7   : > { %v4015_v27 = vsel %vm3670_vm1, %v4014_v14, %v4010_v61 }
 0x3d8   : > { %v4020_v18 = vsel %vm3677_vm2, %v4019_v48, %v4015_v27  ;;  %3335 = vadd.xlane.f32.xlu1 %v3106_v13 }
 0x3d9   : > { %v5342_v4 = vpop.f32.mrf.mxu1  ;;  %v4025_v58 = vsel %vm3684_vm3, %v4024_v55, %v4020_v18 }
 0x3da   : > { %v2693_v60 = vadd.f32 %v5342_v4, %v8426_v25  ;;  %v3274_v38 = vpop.xlane.xlu1 %3273 }
 0x3db   : > { %v2684_v11 = vpop.f32.mrf.mxu1  ;;  %v3469_v51 = vadd.f32 %v7025_v16, %v3274_v38 }
 0x3dc   : > { %v2892_v49 = vadd.f32 %v7560_v9, %v2693_v60  ;;  %v3270_v17 = vpop.xlane.xlu0 %3269  ;;  %v2685_v35 = vadd.f32 %v2684_v11, %v8427_v54 }
 0x3dd   : > { %v3467_v23 = vadd.f32 %v7025_v16, %v3270_v17  ;;  %v5343_v12 = vpop.f32.mrf.mxu1  ;;  %v4039_v14 = vrot.slane %v3469_v51, %v7231_v22  ;;  %v8430_v17 = vld [vmem:[#allocation69_spill] sm:$0xff] }
 0x3de   : > { %v2890_v1 = vadd.f32 %v7560_v9, %v2685_v35  ;;  %v2696_v39 = vadd.f32 %v5343_v12, %v8428_v10  ;;  %v3111_v29 = vmul.f32 %v7697_v41, %v2892_v49 }
 0x3df   : > { %v4029_v63 = vrot.slane %v3467_v23, %v7204_v40  ;;  %v2687_v36 = vpop.f32.mrf.mxu1 }
 0x3e0   : > { %v3272_v45 = vpop.xlane.xlu1 %3271  ;;  %v3276_v50 = vpop.xlane.xlu0 %3275  ;;  %3345 = vadd.xlane.f32.xlu1 %v3111_v29  ;;  %v2893_v34 = vadd.f32 %v7560_v9, %v2696_v39  ;;  %v2688_v43 = vadd.f32 %v2687_v36, %v8429_v7  ;;  %v3109_v31 = vmul.f32 %v7697_v41, %v2890_v1  ;;  %v8431_v29 = vld [vmem:[#allocation70_spill] sm:$0xff] }
 0x3e1   : > { %v4030_v3 = vsel %vm3691_vm4, %v4029_v63, %v4025_v58  ;;  %v3468_v59 = vadd.f32 %v7025_v16, %v3272_v45  ;;  %v3470_v52 = vadd.f32 %v7025_v16, %v3276_v50 }
 0x3e2   : > { %v2891_v27 = vadd.f32 %v7560_v9, %v2688_v43  ;;  %v3112_v18 = vmul.f32 %v7697_v41, %v2893_v34  ;;  %v2964_v34 = vcombine.high %v7518_v33, %v7518_v33 }
 0x3e3   : > { %v4034_v61 = vrot.slane %v3468_v59, %v7224_v19  ;;  %v4044_v13 = vrot.slane %v3470_v52, %v7234_v53 }
 0x3e4   : > { %3341 = vadd.xlane.f32.xlu1 %v3109_v31  ;;  %v3110_v11 = vmul.f32 %v7697_v41, %v2891_v27 }
 0x3e5   : > { %v4035_v48 = vsel %vm3698_vm5, %v4034_v61, %v4030_v3 }
 0x3e6   : > { %v4040_v55 = vsel %vm3705_vm6, %v4039_v14, %v4035_v48 }
 0x3e7   : > { %v4045_v4 = vsel %vm3712_vm7, %v4044_v13, %v4040_v55 }
 0x3e8   : > { %3347 = vadd.xlane.f32.xlu1 %v3112_v18 }
 0x3e9   : > { %v5346_v58 = vpop.f32.mrf.mxu1 }
 0x3ea   : > { %v3282_v25 = vpop.xlane.xlu1 %3281  ;;  %v2709_v60 = vadd.f32 %v5346_v58, %v7228_v28 }
 0x3eb   : > { %v2700_v38 = vpop.f32.mrf.mxu1  ;;  %v3473_v59 = vadd.f32 %v7025_v16, %v3282_v25 }
 0x3ec   : > { %v2896_v49 = vadd.f32 %v7560_v9, %v2709_v60  ;;  %v2701_v54 = vadd.f32 %v2700_v38, %v8430_v17  ;;  %3343 = vadd.xlane.f32.xlu1 %v3110_v11  ;;  %v8432_v60 = vld [vmem:[#allocation43_spill] sm:$0xff] }
 0x3ed   : > { %v5347_v35 = vpop.f32.mrf.mxu1  ;;  %v4059_v14 = vrot.slane %v3473_v59, %v7451_v56  ;;  %v8433_v17 = vld [vmem:[#allocation71_spill] sm:$0xff] }
 0x3ee   : > { %v2894_v23 = vadd.f32 %v7560_v9, %v2701_v54  ;;  %v3278_v12 = vpop.xlane.xlu1 %3277  ;;  %v3115_v1 = vmul.f32 %v7697_v41, %v2896_v49  ;;  %v2712_v11 = vadd.f32 %v5347_v35, %v8432_v60 }
 0x3ef   : > { %v3471_v10 = vadd.f32 %v7025_v16, %v3278_v12  ;;  %v2703_v39 = vpop.f32.mrf.mxu1 }
 0x3f0   : > { %v2704_v63 = vadd.f32 %v2703_v39, %v8431_v29  ;;  %3353 = vadd.xlane.f32.xlu1 %v3115_v1  ;;  %v3113_v28 = vmul.f32 %v7697_v41, %v2894_v23 }
 0x3f1   : > { %v4049_v36 = vrot.slane %v3471_v10, %v7456_v15  ;;  %v8434_v10 = vld [vmem:[#allocation73_spill] sm:$0xff] }
 0x3f2   : > { %v2895_v51 = vadd.f32 %v7560_v9, %v2704_v63  ;;  %v3284_v45 = vpop.xlane.xlu1 %3283  ;;  %3349 = vadd.xlane.f32.xlu0 %v3113_v28 }
 0x3f3   : > { %v4050_v50 = vsel %vm3719_vm8, %v4049_v36, %v4045_v4  ;;  %v3474_v7 = vadd.f32 %v7025_v16, %v3284_v45  ;;  %v7798_v4 = vrot.slane %v2964_v34, %v6356_v62  ;;  %v2897_v45 = vadd.f32 %v7560_v9, %v2712_v11 }
 0x3f4   : > { %v3114_v3 = vmul.f32 %v7697_v41, %v2895_v51 }
 0x3f5   : > { %v4064_v13 = vrot.slane %v3474_v7, %v7466_v21 }
 0x3f6   : > { %v3280_v52 = vpop.xlane.xlu1 %3279  ;;  %3351 = vadd.xlane.f32.xlu0 %v3114_v3  ;;  %v8435_v3 = vld [vmem:[#allocation72_spill] sm:$0xff] }
 0x3f7   : > { %v3472_v43 = vadd.f32 %v7025_v16, %v3280_v52 }
 0x3f9   : > { %v4054_v31 = vrot.slane %v3472_v43, %v7462_v44  ;;  %v3290_v61 = vpop.xlane.xlu0 %3289 }
 0x3fa   : > { %v5350_v48 = vpop.f32.mrf.mxu1  ;;  %v3477_v62 = vadd.f32 %v7025_v16, %v3290_v61 }
 0x3fb   : > { %v4055_v55 = vsel %vm3726_vm9, %v4054_v31, %v4050_v50  ;;  %v2725_v27 = vadd.f32 %v5350_v48, %v7287_v47  ;;  %v3286_v18 = vpop.xlane.xlu1 %3285 }
 0x3fc   : > { %v4060_v33 = vsel %vm3733_vm10, %v4059_v14, %v4055_v55  ;;  %v3475_v58 = vadd.f32 %v7025_v16, %v3286_v18  ;;  %v2716_v25 = vpop.f32.mrf.mxu1  ;;  %v4079_v7 = vrot.slane %v3477_v62, %v7521_v32 }
 0x3fd   : > { %v2900_v38 = vadd.f32 %v7560_v9, %v2725_v27  ;;  %v4065_v49 = vsel %vm3740_vm11, %v4064_v13, %v4060_v33  ;;  %v2717_v54 = vadd.f32 %v2716_v25, %v8433_v17  ;;  %v3292_v23 = vpop.xlane.xlu0 %3291  ;;  %v3116_v13 = vmul.f32 %v7697_v41, %v2897_v45  ;;  %v8436_v25 = vld [vmem:[#allocation76_spill] sm:$0xff] }
 0x3fe   : > { %v4069_v47 = vrot.slane %v3475_v58, %v7528_v0  ;;  %v5351_v12 = vpop.f32.mrf.mxu1  ;;  %v3478_v28 = vadd.f32 %v7025_v16, %v3292_v23 }
 0x3ff   : > { %v2898_v1 = vadd.f32 %v7560_v9, %v2717_v54  ;;  %v2728_v39 = vadd.f32 %v5351_v12, %v8434_v10  ;;  %v3288_v29 = vpop.xlane.xlu1 %3287  ;;  %v3119_v63 = vmul.f32 %v7798_v4, %v2900_v38 }
 0x400   : > { %v4070_v35 = vsel %vm8421_vm12, %v4069_v47, %v4065_v49  ;;  %v3476_v36 = vadd.f32 %v7025_v16, %v3288_v29  ;;  %v2719_v51 = vpop.f32.mrf.mxu1  ;;  %v4084_v61 = vrot.slane %v3478_v28, %v7597_v42  ;;  %vm8278_vm12 = vcmask 1044484   ;;  %v8437_v49 = vld [vmem:[#allocation74_spill] sm:$0xff]  ;;  %v8438_v47 = vld [vmem:[#allocation77_spill] sm:$0xff]  ;;  %v8439_v29 = vld [vmem:[#allocation75_spill] sm:$0xff] }
 0x401   : > { %v2901_v50 = vadd.f32 %v7560_v9, %v2728_v39  ;;  %v2720_v59 = vadd.f32 %v2719_v51, %v8435_v3  ;;  %3361 = vadd.xlane.f32.xlu0 %v3119_v63  ;;  %v3117_v52 = vmul.f32 %v7798_v4, %v2898_v1 }
 0x402   : > { %v4074_v34 = vrot.slane %v3476_v36, %v7555_v6 }
 0x403   : > { %v2899_v43 = vadd.f32 %v7560_v9, %v2720_v59  ;;  %3357 = vadd.xlane.f32.xlu1 %v3117_v52  ;;  %v3120_v31 = vmul.f32 %v7798_v4, %v2901_v50 }
 0x404   : > { %v4075_v14 = vsel %vm3754_vm13, %v4074_v34, %v4070_v35 }
 0x405   : > { %v4080_v48 = vsel %vm3761_vm14, %v4079_v7, %v4075_v14  ;;  %3363 = vadd.xlane.f32.xlu0 %v3120_v31  ;;  %v3118_v27 = vmul.f32 %v7798_v4, %v2899_v43 }
 0x406   : > { %v4085_v55 = vsel %vm3768_vm15, %v4084_v61, %v4080_v48 }
 0x407   : > { %3355 = vadd.xlane.f32.xlu1 %v3116_v13  ;;  %v7830_v18 = vsel %vm8278_vm12, %v4085_v55, %v7727_v46  ;;  %v8440_v55 = vld [vmem:[#allocation78_spill] sm:$0xff]  ;;  %vm8444_vm12 = vcmask 851712  }
 0x409   : > { %3359 = vadd.xlane.f32.xlu0 %v3118_v27  ;;  %v3298_v33 = vpop.xlane.xlu1 %3297 }
 0x40a   : > { %v5354_v58 = vpop.f32.mrf.mxu1  ;;  %v3481_v3 = vadd.f32 %v7025_v16, %v3298_v33 }
 0x40b   : > { %v2741_v60 = vadd.f32 %v5354_v58, %v8436_v25  ;;  %v3294_v10 = vpop.xlane.xlu0 %3293 }
 0x40c   : > { %v2732_v11 = vpop.f32.mrf.mxu1  ;;  %v3479_v36 = vadd.f32 %v7025_v16, %v3294_v10  ;;  %v4098_v14 = vrot.slane %v3481_v3, %v7185_v8 }
 0x40d   : > { %v2904_v38 = vadd.f32 %v7560_v9, %v2741_v60  ;;  %v2733_v17 = vadd.f32 %v2732_v11, %v8437_v49  ;;  %v3300_v41 = vpop.xlane.xlu1 %3299 }
 0x40e   : > { %v5355_v54 = vpop.f32.mrf.mxu1  ;;  %v4089_v59 = vrot.slane %v3479_v36, %v7177_v30  ;;  %v3482_v7 = vadd.f32 %v7025_v16, %v3300_v41 }
 0x40f   : > { %v2902_v23 = vadd.f32 %v7560_v9, %v2733_v17  ;;  %v2744_v12 = vadd.f32 %v5355_v54, %v8438_v47  ;;  %v3123_v62 = vmul.f32 %v7798_v4, %v2904_v38  ;;  %v8441_v38 = vld [vmem:[#allocation79_spill] sm:$0xff] }
 0x410   : > { %v2735_v46 = vpop.f32.mrf.mxu1  ;;  %v4103_v11 = vrot.slane %v3482_v7, %v7191_v37 }
 0x411   : > { %3369 = vadd.xlane.f32.xlu0 %v3123_v62  ;;  %v3296_v1 = vpop.xlane.xlu1 %3295  ;;  %v2905_v39 = vadd.f32 %v7560_v9, %v2744_v12  ;;  %v2736_v63 = vadd.f32 %v2735_v46, %v8439_v29  ;;  %v3121_v28 = vmul.f32 %v7798_v4, %v2902_v23  ;;  %v8442_v12 = vld [vmem:[#allocation44_spill] sm:$0xff] }
 0x412   : > { %v3480_v35 = vadd.f32 %v7025_v16, %v3296_v1 }
 0x413   : > { %v2903_v51 = vadd.f32 %v7560_v9, %v2736_v63  ;;  %v3124_v50 = vmul.f32 %v7798_v4, %v2905_v39 }
 0x414   : > { %v4093_v45 = vrot.slane %v3480_v35, %v7180_v24 }
 0x415   : > { %3365 = vadd.xlane.f32.xlu0 %v3121_v28  ;;  %v3122_v61 = vmul.f32 %v7798_v4, %v2903_v51 }
 0x416   : > { %v4094_v43 = vsel %vm3670_vm1, %v4093_v45, %v4089_v59 }
 0x417   : > { %v4099_v58 = vsel %vm3677_vm2, %v4098_v14, %v4094_v43 }
 0x418   : > { %v4104_v23 = vsel %vm3684_vm3, %v4103_v11, %v4099_v58 }
 0x419   : > { %3371 = vadd.xlane.f32.xlu0 %v3124_v50  ;;  %v3306_v52 = vpop.xlane.xlu0 %3305 }
 0x41a   : > { %v5358_v34 = vpop.f32.mrf.mxu1  ;;  %v3485_v63 = vadd.f32 %v7025_v16, %v3306_v52 }
 0x41b   : > { %v2757_v31 = vadd.f32 %v5358_v34, %v7367_v26 }
 0x41c   : > { %v2748_v48 = vpop.f32.mrf.mxu1  ;;  %v4118_v50 = vrot.slane %v3485_v63, %v7231_v22 }
 0x41d   : > { %v2908_v13 = vadd.f32 %v7560_v9, %v2757_v31  ;;  %v2749_v27 = vadd.f32 %v2748_v48, %v8440_v55  ;;  %3367 = vadd.xlane.f32.xlu0 %v3122_v61  ;;  %v3302_v33 = vpop.xlane.xlu0 %3301  ;;  %v1749_v61 = vpop.f32.mrf.mxu0 }
 0x41e   : > { %v3483_v25 = vadd.f32 %v7025_v16, %v3302_v33  ;;  %v5359_v60 = vpop.f32.mrf.mxu1 }
 0x41f   : > { %v2906_v26 = vadd.f32 %v7560_v9, %v2749_v27  ;;  %v2760_v49 = vadd.f32 %v5359_v60, %v8441_v38  ;;  %v3127_v17 = vmul.f32 %v7798_v4, %v2908_v13 }
 0x420   : > { %v4108_v41 = vrot.slane %v3483_v25, %v7204_v40  ;;  %v2751_v54 = vpop.f32.mrf.mxu1 }
 0x421   : > { %v2909_v47 = vadd.f32 %v7560_v9, %v2760_v49  ;;  %v2752_v62 = vadd.f32 %v2751_v54, %v8442_v12  ;;  %3377 = vadd.xlane.f32.xlu0 %v3127_v17  ;;  %v3308_v46 = vpop.xlane.xlu0 %3307  ;;  %v3125_v39 = vmul.f32 %v7798_v4, %v2906_v26  ;;  %v8443_v26 = vld [vmem:[#allocation80_spill] sm:$0xff] }
 0x422   : > { %v4109_v1 = vsel %vm3691_vm4, %v4108_v41, %v4104_v23  ;;  %v3486_v28 = vadd.f32 %v7025_v16, %v3308_v46 }
 0x423   : > { %v2907_v10 = vadd.f32 %v7560_v9, %v2752_v62  ;;  %v3128_v29 = vmul.f32 %v7798_v4, %v2909_v47 }
 0x424   : > { %v4123_v3 = vrot.slane %v3486_v28, %v7234_v53 }
 0x425   : > { %3373 = vadd.xlane.f32.xlu0 %v3125_v39  ;;  %3379 = vadd.xlane.f32.xlu1 %v3128_v29  ;;  %v3304_v35 = vpop.xlane.xlu0 %3303  ;;  %v3126_v51 = vmul.f32 %v7798_v4, %v2907_v10 }
 0x426   : > { %v3484_v36 = vadd.f32 %v7025_v16, %v3304_v35 }
 0x428   : > { %v4113_v45 = vrot.slane %v3484_v36, %v7224_v19 }
 0x429   : > { %3375 = vadd.xlane.f32.xlu0 %v3126_v51  ;;  %v3314_v34 = vpop.xlane.xlu0 %3313 }
 0x42a   : > { %v4114_v59 = vsel %vm3698_vm5, %v4113_v45, %v4109_v1  ;;  %v5362_v52 = vpop.f32.mrf.mxu1  ;;  %v3489_v47 = vadd.f32 %v7025_v16, %v3314_v34 }
 0x42b   : > { %v4119_v7 = vsel %vm3705_vm6, %v4118_v50, %v4114_v59  ;;  %v2773_v58 = vadd.f32 %v5362_v52, %v7414_v20 }
 0x42c   : > { %v2764_v43 = vpop.f32.mrf.mxu1  ;;  %v4124_v31 = vsel %vm3712_vm7, %v4123_v3, %v4119_v7  ;;  %v4138_v39 = vrot.slane %v3489_v47, %v7451_v56 }
 0x42d   : > { %v2765_v14 = vadd.f32 %v2764_v43, %v7388_v5  ;;  %v3310_v48 = vpop.xlane.xlu0 %3309  ;;  %v2912_v54 = vadd.f32 %v7560_v9, %v2773_v58  ;;  %v5764_v58 = vld [vmem:[%s6272_s23 + $0x28] sm:$0xff]  }
 0x42e   : > { %v5363_v13 = vpop.f32.mrf.mxu1  ;;  %v3487_v27 = vadd.f32 %v7025_v16, %v3310_v48 }
 0x42f   : > { %v2910_v55 = vadd.f32 %v7560_v9, %v2765_v14  ;;  %v2776_v33 = vadd.f32 %v5363_v13, %v1749_v61  ;;  %v3131_v10 = vmul.f32 %v7798_v4, %v2912_v54 }
 0x430   : > { %v2767_v25 = vpop.f32.mrf.mxu1  ;;  %v4128_v60 = vrot.slane %v3487_v27, %v7456_v15  ;;  %v5762_v27 = vld [vmem:[%s6272_s23 + $0x38] sm:$0xff]  }
 0x431   : > { %v2913_v11 = vadd.f32 %v7560_v9, %v2776_v33  ;;  %v2768_v38 = vadd.f32 %v2767_v25, %v8443_v26  ;;  %v3129_v49 = vmul.f32 %v7798_v4, %v2910_v55  ;;  %v3316_v17 = vpop.xlane.xlu0 %3315  ;;  %v6076_v55 = vmov 0.0   ;;  %v5763_v33 = vld [vmem:[%s6272_s23 + $0x30] sm:$0xff]   ;;  %v5766_v25 = vld [vmem:[%s6272_s23 + $0x18] sm:$0xff]   ;;  %v5769_v26 = vld [vmem:[%s6272_s23] sm:$0xff]  }
 0x432   : > { %v4129_v5 = vsel %vm3719_vm8, %v4128_v60, %v4124_v31  ;;  %v3490_v62 = vadd.f32 %v7025_v16, %v3316_v17  ;;  %5364 = vmatprep.subr.bf16.mxu1 %v6076_v55  ;;  %v5767_v60 = vld [vmem:[%s6272_s23 + $0x10] sm:$0xff]  }
 0x433   : > { %v2911_v41 = vadd.f32 %v7560_v9, %v2768_v38  ;;  %3381 = vadd.xlane.f32.xlu1 %v3129_v49  ;;  %v3132_v20 = vmul.f32 %v7798_v4, %v2913_v11  ;;  %5365 = vmatpush3.bf16.msra.mxu1 %v5762_v27  ;;  %v5768_v11 = vld [vmem:[%s6272_s23 + $0x8] sm:$0xff]  }
 0x434   : > { %v4143_v9 = vrot.slane %v3490_v62, %v7466_v21  ;;  %5366 = vmatprep.subr.bf16.mxu1 %v6076_v55 }
 0x435   : > { %v3130_v23 = vmul.f32 %v7798_v4, %v2911_v41  ;;  %v3312_v12 = vpop.xlane.xlu0 %3311 }
 0x436   : > { %v3488_v46 = vadd.f32 %v7025_v16, %v3312_v12 }
 0x437   : > { %3383 = vadd.xlane.f32.xlu0 %v3130_v23  ;;  %3387 = vadd.xlane.f32.xlu1 %v3132_v20 }
 0x438   : > { %v4133_v1 = vrot.slane %v3488_v46, %v7462_v44  ;;  %5367 = vmatpush3.bf16.msra.mxu1 %v5763_v33 }
 0x439   : > { %v3322_v63 = vpop.xlane.xlu1 %3321  ;;  %5368 = vmatprep.subr.bf16.mxu1 %v6076_v55 }
 0x43a   : > { %v4134_v29 = vsel %vm3726_vm9, %v4133_v1, %v4129_v5  ;;  %v3493_v50 = vadd.f32 %v7025_v16, %v3322_v63 }
 0x43b   : > { %3385 = vadd.xlane.f32.xlu0 %v3131_v10  ;;  %v3318_v35 = vpop.xlane.xlu0 %3317  ;;  %v4139_v28 = vsel %vm3733_vm10, %v4138_v39, %v4134_v29 }
 0x43c   : > { %v3491_v36 = vadd.f32 %v7025_v16, %v3318_v35  ;;  %v4144_v51 = vsel %vm3740_vm11, %v4143_v9, %v4139_v28  ;;  %v4158_v43 = vrot.slane %v3493_v50, %v7521_v32  ;;  %5369 = vmatpush3.bf16.msra.mxu1 %v5764_v58 }
 0x43d   : > { %5370 = vmatprep.subr.bf16.mxu1 %v6076_v55 }
 0x43e   : > { %v4148_v45 = vrot.slane %v3491_v36, %v7528_v0 }
 0x43f   : > { %v3320_v4 = vpop.xlane.xlu1 %3319  ;;  %v3324_v3 = vpop.xlane.xlu0 %3323 }
 0x440   : > { %v4149_v59 = vsel %vm8444_vm12, %v4148_v45, %v4144_v51  ;;  %v3492_v34 = vadd.f32 %v7025_v16, %v3320_v4  ;;  %v3494_v52 = vadd.f32 %v7025_v16, %v3324_v3 }
 0x442   : > { %v4153_v7 = vrot.slane %v3492_v34, %v7555_v6  ;;  %v4163_v61 = vrot.slane %v3494_v52, %v7597_v42 }
 0x444   : > { %v4154_v31 = vsel %vm3754_vm13, %v4153_v7, %v4149_v59 }
 0x445   : > { %v4159_v14 = vsel %vm3761_vm14, %v4158_v43, %v4154_v31 }
 0x446   : > { %v4164_v48 = vsel %vm3768_vm15, %v4163_v61, %v4159_v14 }
 0x447   : > { %v7916_v13 = vsel %vm4331_vm0, %v4164_v48, %v7830_v18  ;;  %v5765_v18 = vld [vmem:[%s6272_s23 + $0x20] sm:$0xff]  }
 0x448   : > { %5371 = vmatpush3.bf16.msra.mxu1 %v5765_v18 }
 0x449   : > { %5372 = vmatprep.subr.bf16.mxu1 %v6076_v55  ;;  %v3330_v49 = vpop.xlane.xlu0 %3329 }
 0x44a   : > { %v3497_v59 = vadd.f32 %v7025_v16, %v3330_v49 }
 0x44c   : > { %5373 = vmatpush3.bf16.msra.mxu1 %v5766_v25  ;;  %v4177_v27 = vrot.slane %v3497_v59, %v7185_v8 }
 0x44d   : > { %5374 = vmatprep.subr.bf16.mxu1 %v6076_v55  ;;  %v3332_v38 = vpop.xlane.xlu1 %3331  ;;  %v3326_v5 = vpop.xlane.xlu0 %3325 }
 0x44e   : > { %v3495_v45 = vadd.f32 %v7025_v16, %v3326_v5  ;;  %v3498_v61 = vadd.f32 %v7025_v16, %v3332_v38 }
 0x450   : > { %5375 = vmatpush3.bf16.msra.mxu1 %v5767_v60  ;;  %v4168_v52 = vrot.slane %v3495_v45, %v7177_v30 }
 0x451   : > { %5376 = vmatprep.subr.bf16.mxu1 %v6076_v55  ;;  %v3328_v17 = vpop.xlane.xlu1 %3327 }
 0x452   : > { %v3496_v36 = vadd.f32 %v7025_v16, %v3328_v17 }
 0x454   : > { %5377 = vmatpush3.bf16.msra.mxu1 %v5768_v11  ;;  %v4172_v4 = vrot.slane %v3496_v36, %v7180_v24  ;;  %v4182_v11 = vrot.slane %v3498_v61, %v7191_v37 }
 0x455   : > { %5378 = vmatprep.subr.bf16.mxu1 %v6076_v55 }
 0x456   : > { %v4173_v14 = vsel %vm3670_vm1, %v4172_v4, %v4168_v52 }
 0x457   : > { %v4178_v18 = vsel %vm3677_vm2, %v4177_v27, %v4173_v14 }
 0x458   : > { %5379 = vmatpush3.bf16.msra.mxu1 %v5769_v26 }
 0x459   : > { %5384 = vmatprep.subr.bf16.mxu1 %v6076_v55  ;;  %v3338_v41 = vpop.xlane.xlu1 %3337 }
 0x45a   : > { %v3501_v17 = vadd.f32 %v7025_v16, %v3338_v41 }
 0x45b   : > { %v3334_v54 = vpop.xlane.xlu0 %3333 }
 0x45c   : > { %v3499_v7 = vadd.f32 %v7025_v16, %v3334_v54 }
 0x45d   : > { %v3340_v20 = vpop.xlane.xlu1 %3339 }
 0x45e   : > { %v4187_v25 = vrot.slane %v3499_v7, %v7204_v40 }
 0x461   : > { %v3336_v12 = vpop.xlane.xlu1 %3335 }
 0x462   : > { %v3500_v48 = vadd.f32 %v7025_v16, %v3336_v12  ;;  %v4183_v12 = vsel %vm3684_vm3, %v4182_v11, %v4178_v18 }
 0x464   : > { %v4192_v26 = vrot.slane %v3500_v48, %v7224_v19 }
 0x469   : > { %v3346_v46 = vpop.xlane.xlu1 %3345 }
 0x46d   : > { %v3342_v10 = vpop.xlane.xlu1 %3341 }
 0x46e   : > { %v3503_v36 = vadd.f32 %v7025_v16, %v3342_v10 }
 0x471   : > { %v7939_v9 = vpop.xlane.xlu1 %3347 }
 0x475   : > { %v3344_v63 = vpop.xlane.xlu1 %3343 }
 0x476   : > { %v3504_v41 = vadd.f32 %v7025_v16, %v3344_v63 }
 0x479   : > { %v7942_v51 = vpop.xlane.xlu1 %3353 }
 0x47b   : > { %v7935_v23 = vpop.xlane.xlu0 %3349 }
 0x47c   : > { %v3507_v18 = vadd.f32 %v7025_v16, %v7935_v23 }
 0x47f   : > { %v7937_v47 = vpop.xlane.xlu0 %3351 }
 0x48a   : > { %v3362_v62 = vpop.xlane.xlu0 %3361 }
 0x48b   : > { %v3513_v58 = vadd.f32 %v7025_v16, %v3362_v62 }
 0x48c   : > { %v3358_v3 = vpop.xlane.xlu1 %3357 }
 0x48d   : > { %v3511_v43 = vadd.f32 %v7025_v16, %v3358_v3  ;;  %v4256_v62 = vrot.slane %v3513_v58, %v7185_v8  ;;  %v3506_v58 = vadd.f32 %v7025_v16, %v7939_v9 }
 0x48e   : > { %v3364_v1 = vpop.xlane.xlu0 %3363 }
 0x48f   : > { %v4247_v60 = vrot.slane %v3511_v43, %v7177_v30  ;;  %v3514_v5 = vadd.f32 %v7025_v16, %v3364_v1  ;;  %v4188_v30 = vsel %vm3691_vm4, %v4187_v25, %v4183_v12  ;;  %v3505_v43 = vadd.f32 %v7025_v16, %v3346_v46 }
 0x490   : > { %v3356_v3 = vpop.xlane.xlu1 %3355  ;;  %v4222_v23 = vrot.slane %v3506_v58, %v7466_v21 }
 0x491   : > { %v4261_v4 = vrot.slane %v3514_v5, %v7191_v37  ;;  %v3510_v5 = vadd.f32 %v7025_v16, %v3356_v3 }
 0x492   : > { %v3360_v39 = vpop.xlane.xlu0 %3359 }
 0x493   : > { %v3512_v34 = vadd.f32 %v7025_v16, %v3360_v39  ;;  %v3502_v39 = vadd.f32 %v7025_v16, %v3340_v20 }
 0x495   : > { %v4251_v33 = vrot.slane %v3512_v34, %v7180_v24  ;;  %v4207_v34 = vrot.slane %v3503_v36, %v7456_v15  ;;  %v4202_v52 = vrot.slane %v3502_v39, %v7234_v53 }
 0x497   : > { %v4252_v24 = vsel %vm3670_vm1, %v4251_v33, %v4247_v60  ;;  %vm8445_vm1 = vmmov %vm8444_vm12 }
 0x498   : > { %v4257_v1 = vsel %vm3677_vm2, %v4256_v62, %v4252_v24  ;;  %vm8446_vm2 = vmmov %vm8445_vm1 }
 0x499   : > { %v4262_v63 = vsel %vm3684_vm3, %v4261_v4, %v4257_v1  ;;  %vm4333_vm3 = vcmask 1046534  }
 0x49a   : > { %v3370_v29 = vpop.xlane.xlu0 %3369 }
 0x49b   : > { %v3517_v59 = vadd.f32 %v7025_v16, %v3370_v29 }
 0x49d   : > { %v4276_v27 = vrot.slane %v3517_v59, %v7231_v22 }
 0x49e   : > { %v3366_v35 = vpop.xlane.xlu0 %3365 }
 0x49f   : > { %v3515_v38 = vadd.f32 %v7025_v16, %v3366_v35  ;;  %v4193_v35 = vsel %vm3698_vm5, %v4192_v26, %v4188_v30 }
 0x4a1   : > { %v4266_v45 = vrot.slane %v3515_v38, %v7204_v40  ;;  %v4212_v40 = vrot.slane %v3504_v41, %v7462_v44  ;;  %v3530_v41 = vstv %s5066_s0 }
 0x4a2   : > { %v3372_v28 = vpop.xlane.xlu0 %3371 }
 0x4a3   : > { %v4267_v7 = vsel %vm3691_vm4, %v4266_v45, %v4262_v63  ;;  %vm4335_vm4 = vcmask 1047559  }
 0x4a6   : > { %v3368_v50 = vpop.xlane.xlu0 %3367 }
 0x4a7   : > { %v3516_v54 = vadd.f32 %v7025_v16, %v3368_v50  ;;  %v4197_v50 = vrot.slane %v3501_v17, %v7231_v22  ;;  %v4217_v22 = vrot.slane %v3505_v43, %v7451_v56 }
 0x4a9   : > { %v4271_v8 = vrot.slane %v3516_v54, %v7224_v19  ;;  %v4198_v10 = vsel %vm3705_vm6, %v4197_v50, %v4193_v35  ;;  %v3518_v19 = vadd.f32 %v7025_v16, %v3372_v28  ;;  %v3508_v28 = vadd.f32 %v7025_v16, %v7937_v47 }
 0x4aa   : > { %v3378_v31 = vpop.xlane.xlu0 %3377  ;;  %v4203_v48 = vsel %vm3712_vm7, %v4202_v52, %v4198_v10  ;;  %v4227_v47 = vrot.slane %v3507_v18, %v7528_v0  ;;  %v3531_v10 = vadd.s32 %v3530_v41, %v7150_v2  ;;  %v5790_v41 = vld [vmem:[%s6272_s23 + $0xd8] sm:$0xff]  }
 0x4ab   : > { %v4272_v29 = vsel %vm3698_vm5, %v4271_v8, %v4267_v7  ;;  %v4208_v33 = vsel %vm3719_vm8, %v4207_v34, %v4203_v48  ;;  %v4281_v11 = vrot.slane %v3518_v19, %v7234_v53  ;;  %v3521_v38 = vadd.f32 %v7025_v16, %v3378_v31  ;;  %v4339_v19 = vld [vmem:[#allocation2] sm:$0xff] }
 0x4ac   : > { %v4213_v46 = vsel %vm3726_vm9, %v4212_v40, %v4208_v33  ;;  %v4277_v25 = vsel %vm3705_vm6, %v4276_v27, %v4272_v29  ;;  %v3509_v31 = vadd.f32 %v7025_v16, %v7942_v51  ;;  %v4242_v51 = vrot.slane %v3510_v5, %v7597_v42  ;;  %v5780_v5 = vld [vmem:[%s6272_s23 + $0xa8] sm:$0xff]  }
 0x4ad   : > { %v4282_v17 = vsel %vm3712_vm7, %v4281_v11, %v4277_v25  ;;  %v4296_v30 = vrot.slane %v3521_v38, %v7451_v56  ;;  %vm3532_vm5 = vcmp.lt.s32.totalorder %v3531_v10, 196  ;;  %vm4375_vm6 = vcmask 7168   ;;  %v5772_v25 = vld [vmem:[%s6272_s23 + $0x68] sm:$0xff]   ;;  %v5774_v11 = vld [vmem:[%s6272_s23 + $0x58] sm:$0xff]  }
 0x4ae   : > { %v3374_v49 = vpop.xlane.xlu0 %3373  ;;  %v3380_v61 = vpop.xlane.xlu1 %3379  ;;  %v4237_v4 = vrot.slane %v3509_v31, %v7521_v32  ;;  %vm6077_vm7 = vmmov 0   ;;  %v5776_v38 = vld [vmem:[%s6272_s23 + $0x48] sm:$0xff]   ;;  %v5783_v31 = vld [vmem:[%s6272_s23 + $0x90] sm:$0xff]  }
 0x4af   : > { %v3519_v37 = vadd.f32 %v7025_v16, %v3374_v49  ;;  %v4218_v49 = vsel %vm3733_vm10, %v4217_v22, %v4213_v46  ;;  %v3522_v24 = vadd.f32 %v7025_v16, %v3380_v61  ;;  %5380 = vmatprep.mubr.msk.bf16.mxu1 %vm6077_vm7, %v6076_v55  ;;  %v5770_v46 = vld [vmem:[%s6272_s23 + $0x78] sm:$0xff]  }
 0x4b0   : > { %v4223_v62 = vsel %vm3740_vm11, %v4222_v23, %v4218_v49  ;;  %v5777_v49 = vld [vmem:[%s6272_s23 + $0x40] sm:$0xff]  }
 0x4b1   : > { %v4286_v60 = vrot.slane %v3519_v37, %v7456_v15  ;;  %v4232_v15 = vrot.slane %v3508_v28, %v7555_v6  ;;  %v4228_v35 = vsel %vm8445_vm1, %v4227_v47, %v4223_v62  ;;  %v4301_v3 = vrot.slane %v3522_v24, %v7466_v21  ;;  %v5771_v28 = vld [vmem:[%s6272_s23 + $0x70] sm:$0xff]   ;;  %v5784_v24 = vld [vmem:[%s6272_s23 + $0x88] sm:$0xff]  }
 0x4b2   : > { %v3376_v20 = vpop.xlane.xlu0 %3375 }
 0x4b3   : > { %v3520_v14 = vadd.f32 %v7025_v16, %v3376_v20  ;;  %v4287_v53 = vsel %vm3719_vm8, %v4286_v60, %v4282_v17  ;;  %v4233_v1 = vsel %vm3754_vm13, %v4232_v15, %v4228_v35  ;;  %v5773_v60 = vld [vmem:[%s6272_s23 + $0x60] sm:$0xff]   ;;  %v5778_v17 = vld [vmem:[%s6272_s23 + $0xb8] sm:$0xff]   ;;  %v5779_v15 = vld [vmem:[%s6272_s23 + $0xb0] sm:$0xff]   ;;  %vm8447_vm8 = vcmask 1041409  }
 0x4b4   : > { %v4238_v34 = vsel %vm3761_vm14, %v4237_v4, %v4233_v1  ;;  %v5789_v35 = vld [vmem:[%s6272_s23 + $0xe0] sm:$0xff]   ;;  %v5791_v1 = vld [vmem:[%s6272_s23 + $0xd0] sm:$0xff]  }
 0x4b5   : > { %v4291_v26 = vrot.slane %v3520_v14, %v7462_v44  ;;  %v4243_v52 = vsel %vm3768_vm15, %v4242_v51, %v4238_v34  ;;  %v5792_v51 = vld [vmem:[%s6272_s23 + $0xc8] sm:$0xff]   ;;  %v5799_v34 = vld [vmem:[%s6272_s23 + $0x110] sm:$0xff]  }
 0x4b6   : > { %v4334_v7 = vsel %vm4333_vm3, %v4243_v52, %v7916_v13  ;;  %v5800_v52 = vld [vmem:[%s6272_s23 + $0x108] sm:$0xff]  }
 0x4b7   : > { %v4292_v54 = vsel %vm3726_vm9, %v4291_v26, %v4287_v53  ;;  %v5775_v26 = vld [vmem:[%s6272_s23 + $0x50] sm:$0xff]   ;;  %v5781_v53 = vld [vmem:[%s6272_s23 + $0xa0] sm:$0xff]   ;;  %vm8448_vm9 = vcmask 1042434  }
 0x4b8   : > { %v4297_v45 = vsel %vm3733_vm10, %v4296_v30, %v4292_v54  ;;  %v5786_v30 = vld [vmem:[%s6272_s23 + $0xf8] sm:$0xff]   ;;  %vm8449_vm10 = vcmask 1043459  }
 0x4b9   : > { %v4302_v63 = vsel %vm3740_vm11, %v4301_v3, %v4297_v45  ;;  %v5794_v3 = vld [vmem:[%s6272_s23 + $0x138] sm:$0xff]   ;;  %vm8450_vm11 = vcmask 1044484  }
 0x4bc   : > { %v3382_v9 = vpop.xlane.xlu1 %3381 }
 0x4bd   : > { %v3523_v44 = vadd.f32 %v7025_v16, %v3382_v9 }
 0x4bf   : > { %v4306_v50 = vrot.slane %v3523_v44, %v7528_v0  ;;  %v5782_v44 = vld [vmem:[%s6272_s23 + $0x98] sm:$0xff]  }
 0x4c0   : > { %v3384_v12 = vpop.xlane.xlu0 %3383  ;;  %v3388_v36 = vpop.xlane.xlu1 %3387 }
 0x4c1   : > { %v3524_v39 = vadd.f32 %v7025_v16, %v3384_v12  ;;  %v3526_v8 = vadd.f32 %v7025_v16, %v3388_v36  ;;  %v4307_v0 = vsel %vm8446_vm2, %v4306_v50, %v4302_v63  ;;  %v5785_v12 = vld [vmem:[%s6272_s23 + $0x80] sm:$0xff]   ;;  %v5788_v36 = vld [vmem:[%s6272_s23 + $0xe8] sm:$0xff]  }
 0x4c2   : > { %v5793_v50 = vld [vmem:[%s6272_s23 + $0xc0] sm:$0xff]  }
 0x4c3   : > { %v4311_v56 = vrot.slane %v3524_v39, %v7555_v6  ;;  %v4321_v6 = vrot.slane %v3526_v8, %v7597_v42  ;;  %v5787_v39 = vld [vmem:[%s6272_s23 + $0xf0] sm:$0xff]   ;;  %v5796_v8 = vld [vmem:[%s6272_s23 + $0x128] sm:$0xff]  }
 0x4c4   : > { %v3386_v59 = vpop.xlane.xlu0 %3385 }
 0x4c5   : > { %v3525_v20 = vadd.f32 %v7025_v16, %v3386_v59  ;;  %v4312_v21 = vsel %vm3754_vm13, %v4311_v56, %v4307_v0  ;;  %v5795_v56 = vld [vmem:[%s6272_s23 + $0x130] sm:$0xff]   ;;  %v5797_v59 = vld [vmem:[%s6272_s23 + $0x120] sm:$0xff]  }
 0x4c7   : > { %v4316_v40 = vrot.slane %v3525_v20, %v7521_v32  ;;  %v5798_v20 = vld [vmem:[%s6272_s23 + $0x118] sm:$0xff]  }
 0x4c9   : > { %v4317_v16 = vsel %vm3761_vm14, %v4316_v40, %v4312_v21  ;;  %v5801_v40 = vld [vmem:[%s6272_s23 + $0x100] sm:$0xff]  }
 0x4ca   : > { %v4322_v2 = vsel %vm3768_vm15, %v4321_v6, %v4317_v16  ;;  %v4370_v6 = vld [vmem:[#allocation3] sm:$0xff] }
 0x4cb   : > { %v4336_v37 = vsel %vm4335_vm4, %v4322_v2, %v4334_v7  ;;  %v5802_v16 = vld [vmem:[%s6272_s23 + $0x178] sm:$0xff]  }
 0x4cc   : > { %v4338_v43 = vsel %vm3532_vm5, %v4336_v37, -1e+30 }
 0x4cd   : > { %4340 = vmax.xlane.f32.xlu0 %v4338_v43 }
 0x556   : > { %v4341_v32 = vpop.xlane.xlu0 %4340 }
 0x557   : > { %v4342_v29 = vmax.f32 %v4339_v19, %v4341_v32  ;;  %v4354_v32 = vld [vmem:[#allocation16] sm:$0xff] }
 0x559   : > { %v4343_v61 = vsub.f32 %v4339_v19, %v4342_v29  ;;  %4790 = vst.msk [vmem:[#allocation2] sm:$0xff] %vm4375_vm6, %v4342_v29  ;;  %4348 = vperm.xlu1 %5653, %v4342_v29   ;;  %v5804_v19 = vld [vmem:[%s6272_s23 + $0x168] sm:$0xff]   ;;  %v4355_v29 = vld [vmem:[#allocation16 + $0x8] sm:$0xff] }
 0x55b   : > { %v4344_v58 = vmul.f32 1.442695, %v4343_v61 }
 0x5d4   : > { %v4349_v42 = vpop.permute.xlu1 %4348 }
 0x5d5   : > { %v4351_v13 = vsub.f32 %v4338_v43, %v4349_v42  ;;  %v5803_v43 = vld [vmem:[%s6272_s23 + $0x170] sm:$0xff]  }
 0x5d7   : > { %v4352_v14 = vmul.f32 1.442695, %v4351_v13 }
 0x5d9   : > { %5753 = vpow2.f32 %v4352_v14  ;;  %v5805_v14 = vld [vmem:[%s6272_s23 + $0x160] sm:$0xff]  }
 0x5da   : > { %5755 = vpow2.f32 %v4344_v58 }
 0x5e6   : > { %v8051_v48 = vpop.eup %5753 }
 0x5e7   : > { %4372 = vadd.xlane.f32.xlu0 %v8051_v48  ;;  %v4387_v27 = vrot.slane %v8051_v48, %v6341_v57  ;;  %v8067_v22 = vpop.eup %5755  ;;  %v4380_v10 = vcombine.high %v8051_v48, %v8051_v48 }
 0x5e8   : > { %v4371_v2 = vmul.f32 %v8067_v22, %v4370_v6 }
 0x5e9   : > { %v4403_v33 = vrot.slane %v4387_v27, %v6341_v57  ;;  %v4395_v9 = vcombine.high %v4387_v27, %v4387_v27  ;;  %v4394_v63 = vrot.slane %v4380_v10, %v6341_v57  ;;  %v5806_v27 = vld [vmem:[%s6272_s23 + $0x158] sm:$0xff]  }
 0x5eb   : > { %v4437_v18 = vpack.c.bf16 %v4403_v33, %v4403_v33  ;;  %v4417_v23 = vrot.slane %v4395_v9, %v6341_v57  ;;  %v4425_v54 = vcombine.high %v4403_v33, %v4403_v33  ;;  %v8135_v0 = vrot.slane %v4394_v63, %v6341_v57  ;;  %v5807_v33 = vld [vmem:[%s6272_s23 + $0x150] sm:$0xff]   ;;  %v5816_v9 = vld [vmem:[%s6272_s23 + $0x188] sm:$0xff]  }
 0x5ec   : > { %v4396_v58 = vcombine.high %v4394_v63, %v4394_v63 }
 0x5ed   : > { %5381 = vmatmul.mubr.bf16.vlgmr.msra.gmra.mxu1 %v4437_v18  ;;  %v4438_v47 = vpack.c.bf16 %v4417_v23, %v4417_v23  ;;  %v4439_v62 = vpack.c.bf16 %v4425_v54, %v4425_v54  ;;  %v4427_v45 = vcombine.high %v4417_v23, %v4417_v23  ;;  %v4441_v21 = vpack.c.bf16 %v8135_v0, %v8135_v0  ;;  %v5808_v18 = vld [vmem:[%s6272_s23 + $0x148] sm:$0xff]   ;;  %v5817_v23 = vld [vmem:[%s6272_s23 + $0x180] sm:$0xff]   ;;  %v5822_v54 = vld [vmem:[%s6272_s23 + $0x1d8] sm:$0xff]  }
 0x5ee   : > { %5385 = vmatpush3.bf16.msra.mxu1 %v5770_v46  ;;  %5400 = vmatprep.mubr.msk.bf16.mxu1 %vm6077_vm7, %v6076_v55  ;;  %v4424_v46 = vrot.slane %v4396_v58, %v6341_v57  ;;  %v5812_v57 = vld [vmem:[%s6272_s23 + $0x1a8] sm:$0xff]  }
 0x5ef   : > { %5386 = vmatprep.subr.bf16.mxu1 %v6076_v55  ;;  %v4440_v4 = vpack.c.bf16 %v4427_v45, %v4427_v45  ;;  %v4377_v58 = vld [vmem:[#allocation4] sm:$0xff] }
 0x5f2   : > { %5387 = vmatpush3.bf16.msra.mxu1 %v5771_v28  ;;  %v4442_v28 = vpack.c.bf16 %v4424_v46, %v4424_v46 }
 0x5f3   : > { %5388 = vmatprep.subr.bf16.mxu1 %v6076_v55 }
 0x5f6   : > { %5389 = vmatpush3.bf16.msra.mxu1 %v5772_v25  ;;  %v5810_v25 = vld [vmem:[%s6272_s23 + $0x1b8] sm:$0xff]  }
 0x5f7   : > { %5390 = vmatprep.subr.bf16.mxu1 %v6076_v55 }
 0x5fa   : > { %5391 = vmatpush3.bf16.msra.mxu1 %v5773_v60  ;;  %v5811_v60 = vld [vmem:[%s6272_s23 + $0x1b0] sm:$0xff]  }
 0x5fb   : > { %5392 = vmatprep.subr.bf16.mxu1 %v6076_v55 }
 0x5fd   : > { %4358 = vperm.xlu0 %5654, %v8067_v22   ;;  %v5813_v22 = vld [vmem:[%s6272_s23 + $0x1a0] sm:$0xff]  }
 0x5fe   : > { %5393 = vmatpush3.bf16.msra.mxu1 %v5774_v11  ;;  %v5814_v11 = vld [vmem:[%s6272_s23 + $0x198] sm:$0xff]  }
 0x5ff   : > { %5394 = vmatprep.subr.bf16.mxu1 %v6076_v55 }
 0x602   : > { %5395 = vmatpush3.bf16.msra.mxu1 %v5775_v26  ;;  %v5815_v26 = vld [vmem:[%s6272_s23 + $0x190] sm:$0xff]  }
 0x603   : > { %5396 = vmatprep.subr.bf16.mxu1 %v6076_v55 }
 0x606   : > { %5397 = vmatpush3.bf16.msra.mxu1 %v5776_v38  ;;  %v4426_v38 = vcombine.high %v8135_v0, %v8135_v0 }
 0x607   : > { %5398 = vmatprep.subr.bf16.mxu1 %v6076_v55 }
 0x60a   : > { %5399 = vmatpush3.bf16.msra.mxu1 %v5777_v49  ;;  %v4443_v49 = vpack.c.bf16 %v4426_v38, %v4426_v38 }
 0x60b   : > { %5404 = vmatprep.subr.bf16.mxu1 %v6076_v55 }
 0x60d   : > { %5401 = vmatmul.mubr.bf16.vlgmr.msra.gmra.mxu1 %v4438_v47 }
 0x60e   : > { %5405 = vmatpush3.bf16.msra.mxu1 %v5778_v17  ;;  %5420 = vmatprep.mubr.msk.bf16.mxu1 %vm6077_vm7, %v6076_v55  ;;  %v5818_v17 = vld [vmem:[%s6272_s23 + $0x1f8] sm:$0xff]  }
 0x60f   : > { %5406 = vmatprep.subr.bf16.mxu1 %v6076_v55 }
 0x612   : > { %5407 = vmatpush3.bf16.msra.mxu1 %v5779_v15 }
 0x613   : > { %5408 = vmatprep.subr.bf16.mxu1 %v6076_v55 }
 0x616   : > { %5409 = vmatpush3.bf16.msra.mxu1 %v5780_v5 }
 0x617   : > { %5410 = vmatprep.subr.bf16.mxu1 %v6076_v55 }
 0x61a   : > { %5411 = vmatpush3.bf16.msra.mxu1 %v5781_v53  ;;  %v5819_v53 = vld [vmem:[%s6272_s23 + $0x1f0] sm:$0xff]  }
 0x61b   : > { %5412 = vmatprep.subr.bf16.mxu1 %v6076_v55 }
 0x61e   : > { %5413 = vmatpush3.bf16.msra.mxu1 %v5782_v44 }
 0x61f   : > { %5414 = vmatprep.subr.bf16.mxu1 %v6076_v55 }
 0x622   : > { %5415 = vmatpush3.bf16.msra.mxu1 %v5783_v31  ;;  %v5820_v31 = vld [vmem:[%s6272_s23 + $0x1e8] sm:$0xff]  }
 0x623   : > { %5416 = vmatprep.subr.bf16.mxu1 %v6076_v55 }
 0x626   : > { %5417 = vmatpush3.bf16.msra.mxu1 %v5784_v24  ;;  %v5821_v24 = vld [vmem:[%s6272_s23 + $0x1e0] sm:$0xff]  }
 0x627   : > { %5418 = vmatprep.subr.bf16.mxu1 %v6076_v55 }
 0x62a   : > { %5419 = vmatpush3.bf16.msra.mxu1 %v5785_v12  ;;  %v5823_v12 = vld [vmem:[%s6272_s23 + $0x1d0] sm:$0xff]  }
 0x62b   : > { %5424 = vmatprep.subr.bf16.mxu1 %v6076_v55 }
 0x62d   : > { %5421 = vmatmul.mubr.bf16.vlgmr.msra.gmra.mxu1 %v4439_v62  ;;  %v5824_v62 = vld [vmem:[%s6272_s23 + $0x1c8] sm:$0xff]  }
 0x62e   : > { %5425 = vmatpush3.bf16.msra.mxu1 %v5786_v30  ;;  %5440 = vmatprep.mubr.msk.bf16.mxu1 %vm6077_vm7, %v6076_v55  ;;  %v4428_v30 = vcombine.high %v4424_v46, %v4424_v46 }
 0x62f   : > { %5426 = vmatprep.subr.bf16.mxu1 %v6076_v55 }
 0x632   : > { %5427 = vmatpush3.bf16.msra.mxu1 %v5787_v39  ;;  %v5825_v39 = vld [vmem:[%s6272_s23 + $0x1c0] sm:$0xff]  }
 0x633   : > { %5428 = vmatprep.subr.bf16.mxu1 %v6076_v55 }
 0x636   : > { %5429 = vmatpush3.bf16.msra.mxu1 %v5788_v36  ;;  %v4444_v36 = vpack.c.bf16 %v4428_v30, %v4428_v30 }
 0x637   : > { %5430 = vmatprep.subr.bf16.mxu1 %v6076_v55 }
 0x63a   : > { %5431 = vmatpush3.bf16.msra.mxu1 %v5789_v35 }
 0x63b   : > { %5432 = vmatprep.subr.bf16.mxu1 %v6076_v55 }
 0x63e   : > { %5433 = vmatpush3.bf16.msra.mxu1 %v5790_v41 }
 0x63f   : > { %5434 = vmatprep.subr.bf16.mxu1 %v6076_v55 }
 0x642   : > { %5435 = vmatpush3.bf16.msra.mxu1 %v5791_v1 }
 0x643   : > { %5436 = vmatprep.subr.bf16.mxu1 %v6076_v55 }
 0x646   : > { %5437 = vmatpush3.bf16.msra.mxu1 %v5792_v51 }
 0x647   : > { %5438 = vmatprep.subr.bf16.mxu1 %v6076_v55 }
 0x64a   : > { %5439 = vmatpush3.bf16.msra.mxu1 %v5793_v50 }
 0x64b   : > { %5444 = vmatprep.subr.bf16.mxu1 %v6076_v55 }
 0x64d   : > { %5441 = vmatmul.mubr.bf16.vlgmr.msra.gmra.mxu1 %v4440_v4 }
 0x64e   : > { %5445 = vmatpush3.bf16.msra.mxu1 %v5794_v3  ;;  %5460 = vmatprep.mubr.msk.bf16.mxu1 %vm6077_vm7, %v6076_v55 }
 0x64f   : > { %5446 = vmatprep.subr.bf16.mxu1 %v6076_v55 }
 0x652   : > { %5447 = vmatpush3.bf16.msra.mxu1 %v5795_v56 }
 0x653   : > { %5448 = vmatprep.subr.bf16.mxu1 %v6076_v55 }
 0x656   : > { %5449 = vmatpush3.bf16.msra.mxu1 %v5796_v8 }
 0x657   : > { %5450 = vmatprep.subr.bf16.mxu1 %v6076_v55 }
 0x65a   : > { %5451 = vmatpush3.bf16.msra.mxu1 %v5797_v59 }
 0x65b   : > { %5452 = vmatprep.subr.bf16.mxu1 %v6076_v55 }
 0x65e   : > { %5453 = vmatpush3.bf16.msra.mxu1 %v5798_v20 }
 0x65f   : > { %5454 = vmatprep.subr.bf16.mxu1 %v6076_v55 }
 0x662   : > { %5455 = vmatpush3.bf16.msra.mxu1 %v5799_v34 }
 0x663   : > { %5456 = vmatprep.subr.bf16.mxu1 %v6076_v55 }
 0x666   : > { %5457 = vmatpush3.bf16.msra.mxu1 %v5800_v52 }
 0x667   : > { %5458 = vmatprep.subr.bf16.mxu1 %v6076_v55 }
 0x66a   : > { %5459 = vmatpush3.bf16.msra.mxu1 %v5801_v40 }
 0x66b   : > { %5464 = vmatprep.subr.bf16.mxu1 %v6076_v55 }
 0x66d   : > { %5461 = vmatmul.mubr.bf16.vlgmr.msra.gmra.mxu1 %v4441_v21 }
 0x66e   : > { %5465 = vmatpush3.bf16.msra.mxu1 %v5802_v16  ;;  %5480 = vmatprep.mubr.msk.bf16.mxu1 %vm6077_vm7, %v6076_v55 }
 0x66f   : > { %5466 = vmatprep.subr.bf16.mxu1 %v6076_v55 }
 0x670   : > { %v4373_v7 = vpop.xlane.xlu0 %4372 }
 0x671   : > { %v4374_v37 = vadd.f32 %v4373_v7, %v4371_v2 }
 0x672   : > { %5467 = vmatpush3.bf16.msra.mxu1 %v5803_v43 }
 0x673   : > { %4376 = vst.msk [vmem:[#allocation3] sm:$0xff] %vm4375_vm6, %v4374_v37  ;;  %5468 = vmatprep.subr.bf16.mxu1 %v6076_v55 }
 0x676   : > { %5469 = vmatpush3.bf16.msra.mxu1 %v5804_v19 }
 0x677   : > { %5470 = vmatprep.subr.bf16.mxu1 %v6076_v55 }
 0x678   : > { %v8153_v61 = vpop.permute.xlu0 %4358 }
 0x679   : > { %v4361_v42 = vmul.f32 %v8153_v61, %v4354_v32  ;;  %v4362_v13 = vmul.f32 %v8153_v61, %v4355_v29 }
 0x67a   : > { %5471 = vmatpush3.bf16.msra.mxu1 %v5805_v14 }
 0x67b   : > { %4363 = vst [vmem:[#allocation16] sm:$0xff] %v4361_v42  ;;  %4364 = vst [vmem:[#allocation16 + $0x8] sm:$0xff] %v4362_v13  ;;  %5472 = vmatprep.subr.bf16.mxu1 %v6076_v55 }
 0x67c   : > { %4369 = vst [vmem:[%s4368_s19] sm:$0xff] %v8051_v48  ;;  %v5809_v48 = vld [vmem:[%s6272_s23 + $0x140] sm:$0xff]  }
 0x67e   : > { %5473 = vmatpush3.bf16.msra.mxu1 %v5806_v27 }
 0x67f   : > { %5474 = vmatprep.subr.bf16.mxu1 %v6076_v55 }
 0x682   : > { %5475 = vmatpush3.bf16.msra.mxu1 %v5807_v33 }
 0x683   : > { %5476 = vmatprep.subr.bf16.mxu1 %v6076_v55 }
 0x686   : > { %5477 = vmatpush3.bf16.msra.mxu1 %v5808_v18 }
 0x687   : > { %5478 = vmatprep.subr.bf16.mxu1 %v6076_v55 }
 0x68a   : > { %5479 = vmatpush3.bf16.msra.mxu1 %v5809_v48 }
 0x68b   : > { %5484 = vmatprep.subr.bf16.mxu1 %v6076_v55 }
 0x68d   : > { %5481 = vmatmul.mubr.bf16.vlgmr.msra.gmra.mxu1 %v4442_v28  ;;  %v4378_v28 = vmul.f32 %v4377_v58, %v8153_v61 }
 0x68e   : > { %5485 = vmatpush3.bf16.msra.mxu1 %v5810_v25  ;;  %5500 = vmatprep.mubr.msk.bf16.mxu1 %vm6077_vm7, %v6076_v55 }
 0x68f   : > { %5486 = vmatprep.subr.bf16.mxu1 %v6076_v55 }
 0x692   : > { %5487 = vmatpush3.bf16.msra.mxu1 %v5811_v60 }
 0x693   : > { %5488 = vmatprep.subr.bf16.mxu1 %v6076_v55 }
 0x696   : > { %5489 = vmatpush3.bf16.msra.mxu1 %v5812_v57 }
 0x697   : > { %5490 = vmatprep.subr.bf16.mxu1 %v6076_v55 }
 0x69a   : > { %5491 = vmatpush3.bf16.msra.mxu1 %v5813_v22 }
 0x69b   : > { %5492 = vmatprep.subr.bf16.mxu1 %v6076_v55 }
 0x69e   : > { %5493 = vmatpush3.bf16.msra.mxu1 %v5814_v11 }
 0x69f   : > { %5494 = vmatprep.subr.bf16.mxu1 %v6076_v55 }
 0x6a2   : > { %5495 = vmatpush3.bf16.msra.mxu1 %v5815_v26 }
 0x6a3   : > { %5496 = vmatprep.subr.bf16.mxu1 %v6076_v55 }
 0x6a6   : > { %5497 = vmatpush3.bf16.msra.mxu1 %v5816_v9 }
 0x6a7   : > { %5498 = vmatprep.subr.bf16.mxu1 %v6076_v55 }
 0x6aa   : > { %5499 = vmatpush3.bf16.msra.mxu1 %v5817_v23 }
 0x6ab   : > { %5504 = vmatprep.subr.bf16.mxu1 %v6076_v55 }
 0x6ad   : > { %5501 = vmatmul.mubr.bf16.vlgmr.msra.gmra.mxu1 %v4443_v49  ;;  %v4479_v47 = vpop.f32.mrf.mxu1 }
 0x6ae   : > { %5505 = vmatpush3.bf16.msra.mxu1 %v5818_v17  ;;  %5520 = vmatprep.mubr.msk.bf16.mxu1 %vm6077_vm7, %v6076_v55 }
 0x6af   : > { %v5382_v15 = vpop.f32.mrf.mxu1  ;;  %5506 = vmatprep.subr.bf16.mxu1 %v6076_v55 }
 0x6b1   : > { %v4482_v5 = vpop.f32.mrf.mxu1 }
 0x6b2   : > { %5507 = vmatpush3.bf16.msra.mxu1 %v5819_v53 }
 0x6b3   : > { %v5383_v44 = vpop.f32.mrf.mxu1  ;;  %5508 = vmatprep.subr.bf16.mxu1 %v6076_v55 }
 0x6b6   : > { %5509 = vmatpush3.bf16.msra.mxu1 %v5820_v31 }
 0x6b7   : > { %5510 = vmatprep.subr.bf16.mxu1 %v6076_v55 }
 0x6ba   : > { %5511 = vmatpush3.bf16.msra.mxu1 %v5821_v24 }
 0x6bb   : > { %5512 = vmatprep.subr.bf16.mxu1 %v6076_v55 }
 0x6be   : > { %5513 = vmatpush3.bf16.msra.mxu1 %v5822_v54 }
 0x6bf   : > { %5514 = vmatprep.subr.bf16.mxu1 %v6076_v55 }
 0x6c2   : > { %5515 = vmatpush3.bf16.msra.mxu1 %v5823_v12 }
 0x6c3   : > { %5516 = vmatprep.subr.bf16.mxu1 %v6076_v55 }
 0x6c6   : > { %5517 = vmatpush3.bf16.msra.mxu1 %v5824_v62 }
 0x6c7   : > { %5518 = vmatprep.subr.bf16.mxu1 %v6076_v55 }
 0x6ca   : > { %5519 = vmatpush3.bf16.msra.mxu1 %v5825_v39 }
 0x6cd   : > { %v4519_v35 = vpop.f32.mrf.mxu1  ;;  %5521 = vmatmul.mubr.bf16.vlgmr.msra.gmra.mxu1 %v4444_v36 }
 0x6ce   : > { %v4773_v41 = vrot.slane %v4519_v35, 7 }
 0x6cf   : > { %v5402_v1 = vpop.f32.mrf.mxu1 }
 0x6d0   : > { %v4774_v51 = vsel %vm8447_vm8, %v4773_v41, %v4479_v47 }
 0x6d1   : > { %v4522_v45 = vpop.f32.mrf.mxu1 }
 0x6d3   : > { %v5403_v50 = vpop.f32.mrf.mxu1 }
 0x6ed   : > { %v4559_v4 = vpop.f32.mrf.mxu1 }
 0x6ee   : > { %v4775_v3 = vrot.slane %v4559_v4, 6 }
 0x6ef   : > { %v5422_v56 = vpop.f32.mrf.mxu1 }
 0x6f0   : > { %v4776_v8 = vsel %vm8448_vm9, %v4775_v3, %v4774_v51 }
 0x6f1   : > { %v4562_v59 = vpop.f32.mrf.mxu1 }
 0x6f3   : > { %v5423_v20 = vpop.f32.mrf.mxu1 }
 0x70d   : > { %v4599_v55 = vpop.f32.mrf.mxu1 }
 0x70e   : > { %v4777_v10 = vrot.slane %v4599_v55, 5 }
 0x70f   : > { %v5442_v34 = vpop.f32.mrf.mxu1 }
 0x710   : > { %v4778_v63 = vsel %vm8449_vm10, %v4777_v10, %v4776_v8 }
 0x711   : > { %v4602_v52 = vpop.f32.mrf.mxu1 }
 0x713   : > { %v5443_v0 = vpop.f32.mrf.mxu1 }
 0x72d   : > { %v4639_v40 = vpop.f32.mrf.mxu1 }
 0x72e   : > { %v4779_v21 = vrot.slane %v4639_v40, 4 }
 0x72f   : > { %v5462_v6 = vpop.f32.mrf.mxu1 }
 0x730   : > { %v4780_v16 = vsel %vm8450_vm11, %v4779_v21, %v4778_v63 }
 0x731   : > { %v4642_v2 = vpop.f32.mrf.mxu1 }
 0x733   : > { %v5463_v7 = vpop.f32.mrf.mxu1 }
 0x74d   : > { %v4679_v37 = vpop.f32.mrf.mxu1 }
 0x74e   : > { %v4781_v27 = vrot.slane %v4679_v37, 3 }
 0x74f   : > { %v5482_v43 = vpop.f32.mrf.mxu1 }
 0x750   : > { %v4782_v46 = vsel %vm4331_vm0, %v4781_v27, %v4780_v16 }
 0x751   : > { %v4682_v19 = vpop.f32.mrf.mxu1 }
 0x753   : > { %v5483_v32 = vpop.f32.mrf.mxu1 }
 0x76d   : > { %v4719_v29 = vpop.f32.mrf.mxu1 }
 0x76e   : > { %v4783_v33 = vrot.slane %v4719_v29, 2 }
 0x76f   : > { %v5502_v42 = vpop.f32.mrf.mxu1 }
 0x770   : > { %v4784_v25 = vsel %vm4333_vm3, %v4783_v33, %v4782_v46 }
 0x771   : > { %v4722_v13 = vpop.f32.mrf.mxu1 }
 0x773   : > { %v5503_v14 = vpop.f32.mrf.mxu1 }
 0x78d   : > { %v4759_v18 = vpop.f32.mrf.mxu1 }
 0x78e   : > { %v4785_v48 = vrot.slane %v4759_v18, 1 }
 0x78f   : > { %v5522_v60 = vpop.f32.mrf.mxu1  ;;  %4794 = sbr.rel (%p5068_p5) target bundleno = 2083 (0x823), region = 80 }
 0x790   : > { %v4786_v57 = vsel %vm4335_vm4, %v4785_v48, %v4784_v25 }
 0x791   : > { %v4788_v22 = vadd.f32 %v4786_v57, %v4378_v28  ;;  %v4762_v11 = vpop.f32.mrf.mxu1 }
 0x793   : > { %4789 = vst [vmem:[#allocation4] sm:$0xff] %v4788_v22  ;;  %v5523_v26 = vpop.f32.mrf.mxu1 }
 0x794   : > { %v4795_v9 = vld [vmem:[#allocation3] sm:$0xff]  ;;  %v6078_v38 = vmov 0   ;;  %v4806_v61 = vld [vmem:[#allocation16] sm:$0xff]  ;;  %v4807_v47 = vld [vmem:[#allocation16 + $0x8] sm:$0xff] }
 0x795   : > { %5826 = vset.pattern.permute.xlu0 %v6078_v38  ;;  %5827 = vrcp.f32 %v4795_v9 }
 0x79a   : > { %v4798_v49 = vld [vmem:[#allocation4] sm:$0xff] }
 0x7a2   : > { %v5828_v23 = vpop.eup %5827 }
 0x7a3   : > { %4801 = vperm.xlu0 %5826, %v5828_v23  }
 0x81e   : > { %v4802_v17 = vpop.permute.xlu0 %4801 }
 0x81f   : > { %v4804_v15 = vmul.f32 %v4802_v17, %v4798_v49  ;;  %v4808_v5 = vmul.f32 %v4806_v61, %v4802_v17  ;;  %v4809_v53 = vmul.f32 %v4807_v47, %v4802_v17 }
 0x821   : > { %4805 = vst [vmem:[#allocation15] sm:$0xff] %v4804_v15  ;;  %4810 = vst [vmem:[#allocation16] sm:$0xff] %v4808_v5 }
 0x822   : > { %4811 = vst [vmem:[#allocation16 + $0x8] sm:$0xff] %v4809_v53 }
 0x823 PF: > { %p5578_p4 = scmp.eq.s32.totalorder %s6163_s2, 1  ;;  %s6079_s14 = smov [#allocation15]  }
 0x824   : > { %s4821_s23 = sshll.u32 %s6079_s14, 4  ;;  %s6080_s21 = smov [#allocation16]   ;;  %s4822_s23 = int_to_ptr.vmem [resolvable:$true] %s4821_s23 }
 0x825   : > { %s4835_s29 = sshll.u32 %s6080_s21, 4  ;;  %s5934_s18 = scalar_lea.vmem %s4822_s23, 128  ;;  %s4836_s29 = int_to_ptr.vmem [resolvable:$true] %s4835_s29 }
 0x826   : > { %p5935_p12 = scmp.ne.s32.totalorder %s4822_s23, %s5934_s18  ;;  %p5941_p7 = scmp.lt.s32.totalorder %s4822_s23, %s4822_s23 }
 0x827   : > { %p5942_p8 = scmp.lt.s32.totalorder %s5934_s18, %s5934_s18 }
 0x828   : > { %p5936_p13 = pnand %p5935_p12, %p5578_p4 }
 0x829   : > { %p5943_p3 = por %p5942_p8, %p5941_p7 }
 0x82a   : > { %p5937_p6 = pneg %p5936_p13 }
 0x82c   : > { %p5944_p10 = pnand %p5943_p3, %p5937_p6 }
 0x82e   : > { %5947 = shalt.err (!%p5944_p10)
}
 0x82f   : > { %5550 = dma.vmem_to_hbm [thread:$0]  (%p5578_p4), %s4822_s23, 128, %s8264_s8, [#allocation8]  }
 0x830   : > { %s5958_s25 = scalar_lea.vmem %s4836_s29, 256  ;;  %p5965_p1 = scmp.lt.s32.totalorder %s4836_s29, %s4836_s29 }
 0x831   : > { %p5959_p9 = scmp.ne.s32.totalorder %s4836_s29, %s5958_s25  ;;  %p5966_p2 = scmp.lt.s32.totalorder %s5958_s25, %s5958_s25 }
 0x833   : > { %p5960_p11 = pnand %p5959_p9, %p5578_p4  ;;  %p5967_p5 = por %p5966_p2, %p5965_p1 }
 0x835   : > { %p5961_p0 = pneg %p5960_p11 }
 0x837   : > { %p5968_p12 = pnand %p5967_p5, %p5961_p0 }
 0x839   : > { %5971 = shalt.err (!%p5968_p12)
}
 0x83a   : > { %5552 = dma.vmem_to_hbm [thread:$0]  (%p5578_p4), %s4836_s29, 256, %s8265_s9, [#allocation17]  }
 0x83b   : > { %6027 = dma.done.wait (%p5578_p4), [#allocation8], 128  }
 0x83c   : > { %6029 = vsyncadd (%p5578_p4), [#allocation8], 4294967168 }
 0x83d   : > { %6031 = dma.done.wait (%p5578_p4), [#allocation17], 256  }
 0x83e   : > { %6033 = vsyncadd (%p5578_p4), [#allocation17], 4294967040 }
 0x83f PF: > { %s27_s16 = sadd.s32 1, %s6056_s16   ;;  %s8451_s11 = smov %s6040_s12 }
 0x840   : > { %p24_p13 = scmp.ge.s32.totalorder %s27_s16, 4   ;;  %s8452_s12 = smov %s6044_s13 }
 0x841   : > { %s8453_s13 = smov %s6189_s22  ;;  %s8454_s14 = smov %s6052_s15 }
 0x842   : > { %s8455_s15 = smov %s8457_s17  ;;  %26 = sbr.rel (!%p24_p13) target bundleno = 11 (0xb), region = 130 }
 0x847   :  { %4852 = vsyncpa [#allocation7], 1 }
 0x848   :  { %4854 = vsyncpa [#allocation7 + $0x1], 1 }
 0x849   :  { %4855 = vsyncpa [#allocation10], 1 }
 0x84a   :  { %4856 = vsyncpa [#allocation14], 1 }
 0x84b   :  { %4857 = vsyncpa [#allocation8], 1 }
 0x84c   :  { %4859 = vsyncpa [#allocation8 + $0x1], 1 }
 0x84d   :  { %4860 = vsyncpa [#allocation17], 1 }

</bundles_post_ra>
